<compile_context>
chip_gen: v7x
topology: tpu7x:2x2x1
jax: 0.10.0
libtpu: 0.0.40
codegen_flags: <defaults>
</compile_context>

<pallas_src>
import functools

import jax
import jax.numpy as jnp
import numpy as np
from jax.experimental import pallas as pl
from jax.experimental.pallas import tpu as pltpu


# ----------------------------------------------------------------------------
# Banded weight construction (wrapper-side, pure JAX, done once per call)
# ----------------------------------------------------------------------------
def _banded_weights(w, W):
    """Fold the kw taps and the W output positions into one banded weight matrix.

    w: (Cout, Cin, 3, 3, 3) PyTorch Conv3d weight.
    Returns Wb: (9*W*Cin, W*Cout) with
      Wb[(kd*3+kh)*W*Cin + wp*Cin + ci, w*Cout + co] =
          w[co, ci, kd, kh, wp - w + 1]  if 0 <= wp - w + 1 <= 2 else 0
    (out-of-range W taps are left as zeros, i.e. the W zero-padding lives in the band),
    so each (kd,kh) tap of the 3x3x3 conv is one matmul against a shifted slab.
    """
    Cout, Cin = w.shape[0], w.shape[1]
    blocks = []
    for kd in range(3):
        for kh in range(3):
            blk = jnp.zeros((W, Cin, W, Cout), jnp.float32)
            for kw in range(3):
                # sel[wp, w] = 1  iff  wp == w + kw - 1
                sel = jnp.eye(W, W, k=1 - kw, dtype=jnp.float32)
                tap = w[:, :, kd, kh, kw].astype(jnp.float32).T        # (Cin, Cout)
                blk = blk + sel[:, None, :, None] * tap[None, :, None, :]
            blocks.append(blk.reshape(W * Cin, W * Cout))
    return jnp.concatenate(blocks, axis=0)                             # (9*W*Cin, W*Cout)


# ----------------------------------------------------------------------------
# In-kernel helpers
# ----------------------------------------------------------------------------
def _fill_padded(pad_ref, x, D, H):
    """Zero only the D/H halo faces of pad_ref and write the interior (cast to bf16)."""
    Hp = H + 2
    L = pad_ref.shape[-1]
    dt = pad_ref.dtype
    pad_ref[0:1, :, :] = jnp.zeros((1, Hp, L), dt)                     # d = 0 face
    pad_ref[D + 1:D + 2, :, :] = jnp.zeros((1, Hp, L), dt)             # d = D+1 face
    pad_ref[1:D + 1, 0:1, :] = jnp.zeros((D, 1, L), dt)                # h = 0 rows
    pad_ref[1:D + 1, H + 1:H + 2, :] = jnp.zeros((D, 1, L), dt)        # h = H+1 rows
    pad_ref[1:D + 1, 1:H + 1, :] = x.astype(dt)                        # interior, lane offset 0


def _conv3d_banded(pad_ref, w_ref, D, H, W, Cin, Cout):
    """9 accumulating MXU matmuls, one per (kd, kh) tap, on shifted padded slabs."""
    L = W * Cin
    DH = D * H
    acc = jnp.zeros((DH, W * Cout), jnp.float32)
    for kd in range(3):
        for kh in range(3):
            t = kd * 3 + kh
            slab = pad_ref[kd:kd + D, kh:kh + H, :].reshape(DH, L)     # bf16
            acc = acc + jnp.dot(slab, w_ref[t * L:(t + 1) * L, :],
                                preferred_element_type=jnp.float32)
    return acc                                                          # (DH, W*Cout) f32


def _instance_norm_relu(acc, D, H, W, C):
    """InstanceNorm3d(affine=False, eps=1e-5) + ReLU; reductions ride the MXU."""
    DH, WC = acc.shape
    inv_n = 1.0 / float(D * H * W)

    # sublane (row) sums of x and x^2 in one pass over acc
    ones_row = jnp.ones((1, DH), jnp.float32)
    row_sum = jnp.dot(ones_row, acc, preferred_element_type=jnp.float32)        # (1, WC)
    row_sq = jnp.dot(ones_row, acc * acc, preferred_element_type=jnp.float32)   # (1, WC)

    # fold the W lane groups -> per-channel, and broadcast back, with tiny 0/1 matrices
    r = jax.lax.broadcasted_iota(jnp.int32, (WC, C), 0)
    c = jax.lax.broadcasted_iota(jnp.int32, (WC, C), 1)
    fold = (r % C == c).astype(jnp.float32)                                     # (WC, C)
    br = jax.lax.broadcasted_iota(jnp.int32, (C, WC), 0)
    bc = jax.lax.broadcasted_iota(jnp.int32, (C, WC), 1)
    bcast = (bc % C == br).astype(jnp.float32)                                  # (C, WC)

    mean_c = jnp.dot(row_sum, fold, preferred_element_type=jnp.float32) * inv_n  # (1, C)
    m2_c = jnp.dot(row_sq, fold, preferred_element_type=jnp.float32) * inv_n
    scale_c = jax.lax.rsqrt(m2_c - mean_c * mean_c + 1e-5)                       # (1, C)

    mean_row = jnp.dot(mean_c, bcast, preferred_element_type=jnp.float32)        # (1, WC)
    scale_row = jnp.dot(scale_c, bcast, preferred_element_type=jnp.float32)      # (1, WC)

    return jnp.maximum((acc - mean_row) * scale_row, 0.0)                        # (DH, WC)


# ----------------------------------------------------------------------------
# Fused EncoderBlock kernel (conv1+IN+ReLU -> conv2+IN+ReLU -> optional MaxPool3d(2))
# ----------------------------------------------------------------------------
def _encoder_kernel(x_ref, w1_ref, w2_ref, *rest, D, H, W, Cin, Cmid, Cout, pool):
    # x_ref  : (1, D, H, W*Cin)            f32   one batch element (lane-flat NDHWC)
    # w1_ref : (9*W*Cin,  W*Cmid)          bf16  banded conv1 weights
    # w2_ref : (9*W*Cmid, W*Cout)          bf16  banded conv2 weights
    # feat   : (1, D, H, W*Cout)           f32
    # out    : (1, D/2, H/2, (W/2)*Cout)   f32   (only if pool)
    # pad1   : (D+2, H+2, W*Cin)           bf16  VMEM scratch (D/H zero halo)
    # pad2   : (D+2, H+2, W*Cmid)          bf16  VMEM scratch
    if pool:
        feat_ref, out_ref, pad1_ref, pad2_ref = rest
    else:
        feat_ref, pad1_ref, pad2_ref = rest

    # ---- conv1 + InstanceNorm + ReLU (no bias: IN cancels it exactly) -------------
    _fill_padded(pad1_ref, x_ref[0], D, H)
    acc1 = _conv3d_banded(pad1_ref, w1_ref, D, H, W, Cin, Cmid)
    y1 = _instance_norm_relu(acc1, D, H, W, Cmid)                      # (DH, W*Cmid) f32

    # ---- conv2 + InstanceNorm + ReLU (intermediate stays in VMEM, cast to bf16) ---
    _fill_padded(pad2_ref, y1.reshape(D, H, W * Cmid), D, H)
    acc2 = _conv3d_banded(pad2_ref, w2_ref, D, H, W, Cmid, Cout)
    y2 = _instance_norm_relu(acc2, D, H, W, Cout)                      # (DH, W*Cout) f32

    WC = W * Cout
    feat_ref[0] = y2.reshape(D, H, WC)                                 # lane-dense store

    # ---- fused MaxPool3d(kernel=2, stride=2) epilogue -------------------------------
    if pool:
        D2, H2, W2 = D // 2, H // 2, W // 2
        zh = y2.reshape(D, H2, 2, WC)
        yh = jnp.maximum(zh[:, :, 0, :], zh[:, :, 1, :])               # pool H -> (D, H2, WC)
        zd = yh.reshape(D2, 2, H2, WC)
        yd = jnp.maximum(zd[:, 0], zd[:, 1])                           # pool D -> (D2, H2, WC)
        # pool W: paired w positions are Cout lanes apart
        pieces = [
            jnp.maximum(yd[..., (2 * wi) * Cout:(2 * wi + 1) * Cout],
                        yd[..., (2 * wi + 1) * Cout:(2 * wi + 2) * Cout])
            for wi in range(W2)
        ]
        out_ref[0] = jnp.concatenate(pieces, axis=-1)                  # (D2, H2, W2*Cout)


# ----------------------------------------------------------------------------
# EncoderBlock forward
# ----------------------------------------------------------------------------
def encoder_block(x, params, bottleneck=False):
    """x: (N, D, H, W, Cin) channels-last.  Returns (out, feat) like the PyTorch module."""
    N, D, H, W, Cin = x.shape
    Cmid = params["w1"].shape[0]
    Cout = params["w2"].shape[0]
    pool = not bottleneck
    if pool:
        assert D % 2 == 0 and H % 2 == 0 and W % 2 == 0
    # Lane-density guard: conv outputs (and the pooled output) must be 128-lane dense
    # or stores degrade to masked vst.msk — pad channels/width otherwise.
    assert (W * Cmid) % 128 == 0 and (W * Cout) % 128 == 0
    if pool:
        assert ((W // 2) * Cout) % 128 == 0

    # biases b1/b2 are intentionally dropped: InstanceNorm3d(affine=False) subtracts the
    # per-channel mean, so a per-channel constant added before it is exactly cancelled.
    w1b = _banded_weights(params["w1"], W).astype(jnp.bfloat16)        # (9*W*Cin,  W*Cmid)
    w2b = _banded_weights(params["w2"], W).astype(jnp.bfloat16)        # (9*W*Cmid, W*Cout)
    x_flat = x.reshape(N, D, H, W * Cin)                               # contiguous, free

    kernel = functools.partial(_encoder_kernel, D=D, H=H, W=W,
                               Cin=Cin, Cmid=Cmid, Cout=Cout, pool=pool)

    feat_shape = jax.ShapeDtypeStruct((N, D, H, W * Cout), jnp.float32)
    feat_spec = pl.BlockSpec((1, D, H, W * Cout), lambda n: (n, 0, 0, 0))
    if pool:
        out_shape = (feat_shape,
                     jax.ShapeDtypeStruct((N, D // 2, H // 2, (W // 2) * Cout), jnp.float32))
        out_specs = (feat_spec,
                     pl.BlockSpec((1, D // 2, H // 2, (W // 2) * Cout),
                                  lambda n: (n, 0, 0, 0)))
    else:
        out_shape = feat_shape
        out_specs = feat_spec

    # VMEM plan from actual buffer sizes (double-buffered ins/outs + scratch) + headroom.
    f32b, bf16b = 4, 2
    per_step = (2 * D * H * W * Cin * f32b
                + 2 * w1b.size * bf16b + 2 * w2b.size * bf16b
                + 2 * D * H * W * Cout * f32b
                + (2 * (D // 2) * (H // 2) * (W // 2) * Cout * f32b if pool else 0)
                + (D + 2) * (H + 2) * W * (Cin + Cmid) * bf16b)
    vmem_limit = int(min(100 * 1024 * 1024, max(16 * 1024 * 1024, 2 * per_step)))

    res = pl.pallas_call(
        kernel,
        out_shape=out_shape,
        grid=(N,),
        in_specs=[
            pl.BlockSpec((1, D, H, W * Cin), lambda n: (n, 0, 0, 0)),
            pl.BlockSpec(w1b.shape, lambda n: (0, 0)),                 # resident across batch
            pl.BlockSpec(w2b.shape, lambda n: (0, 0)),
        ],
        out_specs=out_specs,
        scratch_shapes=[
            pltpu.VMEM((D + 2, H + 2, W * Cin), jnp.bfloat16),         # padded conv1 input
            pltpu.VMEM((D + 2, H + 2, W * Cmid), jnp.bfloat16),        # padded conv2 input
        ],
        compiler_params=pltpu.CompilerParams(
            dimension_semantics=("parallel",),                         # megacore over batch
            vmem_limit_bytes=vmem_limit,
        ),
    )(x_flat, w1b, w2b)

    if pool:
        feat_flat, pooled = res
        feat = feat_flat.reshape(N, D, H, W, Cout)
        out = pooled.reshape(N, D // 2, H // 2, W // 2, Cout)
        return out, feat
    feat = res.reshape(N, D, H, W, Cout)
    return feat, feat


# ----------------------------------------------------------------------------
# Pure-JAX reference (matches kernel numerics: conv operands rounded to bf16,
# accumulation and the IN/ReLU/pool epilogue in f32; bias kept — IN cancels it)
# ----------------------------------------------------------------------------
def _ref_conv_in_relu(x, w, b):
    xq = x.astype(jnp.bfloat16).astype(jnp.float32)
    wq = jnp.transpose(w.astype(jnp.bfloat16).astype(jnp.float32), (2, 3, 4, 1, 0))
    y = jax.lax.conv_general_dilated(
        xq, wq, window_strides=(1, 1, 1), padding="SAME",
        dimension_numbers=("NDHWC", "DHWIO", "NDHWC"))
    y = y + b
    mean = jnp.mean(y, axis=(1, 2, 3), keepdims=True)
    var = jnp.mean(jnp.square(y - mean), axis=(1, 2, 3), keepdims=True)
    return jnp.maximum((y - mean) * jax.lax.rsqrt(var + 1e-5), 0.0)


def _ref_encoder_block(x, params, bottleneck=False):
    feat = _ref_conv_in_relu(x, params["w1"], params["b1"])
    feat = _ref_conv_in_relu(feat, params["w2"], params["b2"])
    if bottleneck:
        return feat, feat
    N, D, H, W, C = feat.shape
    out = feat.reshape(N, D // 2, 2, H // 2, 2, W // 2, 2, C).max(axis=(2, 4, 6))
    return out, feat


# ----------------------------------------------------------------------------
if __name__ == "__main__":
    # Module hyperparameters (small): in_channels=4, out_channels=32, bottleneck=False
    N, Cin, Cout = 2, 4, 32
    Cmid = Cout // 2
    D = H = W = 8

    key = jax.random.PRNGKey(0)
    k_x, k_w1, k_b1, k_w2, k_b2 = jax.random.split(key, 5)

    # PyTorch-style NCDHW input, transposed to the kernel's channels-last layout.
    x_ncdhw = jax.random.normal(k_x, (N, Cin, D, H, W), jnp.float32)
    x = jnp.transpose(x_ncdhw, (0, 2, 3, 4, 1))                        # (N, D, H, W, Cin)

    params = {
        # Conv3d weights kept in PyTorch layout (out_c, in_c, kD, kH, kW).
        "w1": jax.random.normal(k_w1, (Cmid, Cin, 3, 3, 3), jnp.float32) * 0.1,
        "b1": jax.random.normal(k_b1, (Cmid,), jnp.float32) * 0.1,
        "w2": jax.random.normal(k_w2, (Cout, Cmid, 3, 3, 3), jnp.float32) * 0.1,
        "b2": jax.random.normal(k_b2, (Cout,), jnp.float32) * 0.1,
    }

    fwd = jax.jit(functools.partial(encoder_block, bottleneck=False))
    out, feat = fwd(x, params)
    out = jax.block_until_ready(out)
    feat = jax.block_until_ready(feat)

    # Sanity-check against the reference.  The reference rounds the conv operands to
    # bf16 exactly like the MXU path; the 1e-2 headroom absorbs the bf16 rounding of the
    # intermediate activation (kept in VMEM as bf16 between the two fused convs).
    ref_out, ref_feat = _ref_encoder_block(x, params, bottleneck=False)
    np.testing.assert_allclose(np.asarray(feat), np.asarray(ref_feat), atol=1e-2, rtol=1e-2)
    np.testing.assert_allclose(np.asarray(out), np.asarray(ref_out), atol=1e-2, rtol=1e-2)
    assert out.shape == (N, D // 2, H // 2, W // 2, Cout)
    assert feat.shape == (N, D, H, W, Cout)

    print("KERNEL_OK")
</pallas_src>

<mosaic_0001>
module attributes {stable_mosaic.version = 11 : i64} {
  func.func @_encoder_kernel(%arg0: i32, %arg1: memref<1x8x8x32xf32, #tpu.memory_space<vmem>>, %arg2: memref<288x128xbf16, #tpu.memory_space<vmem>>, %arg3: memref<1152x256xbf16, #tpu.memory_space<vmem>>, %arg4: memref<1x8x8x256xf32, #tpu.memory_space<vmem>>, %arg5: memref<1x4x4x128xf32, #tpu.memory_space<vmem>>, %arg6: memref<10x10x32xbf16, #tpu.memory_space<vmem>>, %arg7: memref<10x10x128xbf16, #tpu.memory_space<vmem>>) attributes {dimension_semantics = [#tpu.dimension_semantics<parallel>], iteration_bounds = array<i64: 2>, scalar_prefetch = 0 : i64, scratch_operands = 2 : i64, tpu.core_type = #tpu.core_type<tc>, window_params = [{transform_indices = @transform_0, window_bounds = array<i64: 1, 8, 8, 32>}, {pipeline_mode = #tpu.pipeline_mode<synchronous>, transform_indices = @transform_1, window_bounds = array<i64: 288, 128>}, {pipeline_mode = #tpu.pipeline_mode<synchronous>, transform_indices = @transform_2, window_bounds = array<i64: 1152, 256>}, {transform_indices = @transform_3, window_bounds = array<i64: 1, 8, 8, 256>}, {transform_indices = @transform_4, window_bounds = array<i64: 1, 4, 4, 128>}]} {
    %c0 = arith.constant 0 : index
    %c0_0 = arith.constant 0 : index
    %c0_1 = arith.constant 0 : index
    %c0_2 = arith.constant 0 : index
    %0 = vector.load %arg1[%c0, %c0_0, %c0_1, %c0_2] : memref<1x8x8x32xf32, #tpu.memory_space<vmem>>, vector<1x8x8x32xf32>
    %1 = vector.shape_cast %0 : vector<1x8x8x32xf32> to vector<8x8x32xf32>
    %cst = arith.constant 0.000000e+00 : bf16
    %2 = vector.broadcast %cst : bf16 to vector<1x10x32xbf16>
    %c0_3 = arith.constant 0 : index
    %c0_4 = arith.constant 0 : index
    %c0_5 = arith.constant 0 : index
    %3 = vector.load %arg6[%c0_3, %c0_4, %c0_5] : memref<10x10x32xbf16, #tpu.memory_space<vmem>>, vector<1x10x32xbf16>
    tpu.vector_store %arg6[%c0_3, %c0_4, %c0_5], %2 {strides = array<i32>} : memref<10x10x32xbf16, #tpu.memory_space<vmem>>, vector<1x10x32xbf16>,
    %cst_6 = arith.constant 0.000000e+00 : bf16
    %4 = vector.broadcast %cst_6 : bf16 to vector<1x10x32xbf16>
    %c9 = arith.constant 9 : index
    %c0_7 = arith.constant 0 : index
    %c0_8 = arith.constant 0 : index
    %5 = vector.load %arg6[%c9, %c0_7, %c0_8] : memref<10x10x32xbf16, #tpu.memory_space<vmem>>, vector<1x10x32xbf16>
    tpu.vector_store %arg6[%c9, %c0_7, %c0_8], %4 {strides = array<i32>} : memref<10x10x32xbf16, #tpu.memory_space<vmem>>, vector<1x10x32xbf16>,
    %cst_9 = arith.constant 0.000000e+00 : bf16
    %6 = vector.broadcast %cst_9 : bf16 to vector<8x1x32xbf16>
    %c1 = arith.constant 1 : index
    %c0_10 = arith.constant 0 : index
    %c0_11 = arith.constant 0 : index
    %7 = vector.load %arg6[%c1, %c0_10, %c0_11] : memref<10x10x32xbf16, #tpu.memory_space<vmem>>, vector<8x1x32xbf16>
    tpu.vector_store %arg6[%c1, %c0_10, %c0_11], %6 {strides = array<i32>} : memref<10x10x32xbf16, #tpu.memory_space<vmem>>, vector<8x1x32xbf16>,
    %cst_12 = arith.constant 0.000000e+00 : bf16
    %8 = vector.broadcast %cst_12 : bf16 to vector<8x1x32xbf16>
    %c1_13 = arith.constant 1 : index
    %c9_14 = arith.constant 9 : index
    %c0_15 = arith.constant 0 : index
    %9 = vector.load %arg6[%c1_13, %c9_14, %c0_15] : memref<10x10x32xbf16, #tpu.memory_space<vmem>>, vector<8x1x32xbf16>
    tpu.vector_store %arg6[%c1_13, %c9_14, %c0_15], %8 {strides = array<i32>} : memref<10x10x32xbf16, #tpu.memory_space<vmem>>, vector<8x1x32xbf16>,
    %10 = arith.truncf %1 : vector<8x8x32xf32> to vector<8x8x32xbf16>
    %c1_16 = arith.constant 1 : index
    %c1_17 = arith.constant 1 : index
    %c0_18 = arith.constant 0 : index
    %11 = vector.load %arg6[%c1_16, %c1_17, %c0_18] : memref<10x10x32xbf16, #tpu.memory_space<vmem>>, vector<8x8x32xbf16>
    tpu.vector_store %arg6[%c1_16, %c1_17, %c0_18], %10 {strides = array<i32>} : memref<10x10x32xbf16, #tpu.memory_space<vmem>>, vector<8x8x32xbf16>,
    %cst_19 = arith.constant 0.000000e+00 : f32
    %12 = vector.broadcast %cst_19 : f32 to vector<64x128xf32>
    %c0_20 = arith.constant 0 : index
    %c0_21 = arith.constant 0 : index
    %c0_22 = arith.constant 0 : index
    %13 = vector.load %arg6[%c0_20, %c0_21, %c0_22] : memref<10x10x32xbf16, #tpu.memory_space<vmem>>, vector<8x8x32xbf16>
    %14 = vector.shape_cast %13 : vector<8x8x32xbf16> to vector<64x32xbf16>
    %c0_23 = arith.constant 0 : index
    %c0_24 = arith.constant 0 : index
    %15 = vector.load %arg2[%c0_23, %c0_24] : memref<288x128xbf16, #tpu.memory_space<vmem>>, vector<32x128xbf16>
    %cst_25 = arith.constant dense<0.000000e+00> : vector<64x128xf32>
    %16 = tpu.matmul %14, %15, %cst_25 {dimension_numbers = #tpu.dot_dimension_numbers<[1], [0], [0], [1], [0, 0, 1, 1], [], []>} : vector<64x32xbf16>, vector<32x128xbf16>, vector<64x128xf32> -> vector<64x128xf32>
    %17 = arith.addf %12, %16 : vector<64x128xf32>
    %c0_26 = arith.constant 0 : index
    %c1_27 = arith.constant 1 : index
    %c0_28 = arith.constant 0 : index
    %18 = vector.load %arg6[%c0_26, %c1_27, %c0_28] : memref<10x10x32xbf16, #tpu.memory_space<vmem>>, vector<8x8x32xbf16>
    %19 = vector.shape_cast %18 : vector<8x8x32xbf16> to vector<64x32xbf16>
    %c32 = arith.constant 32 : index
    %c0_29 = arith.constant 0 : index
    %20 = vector.load %arg2[%c32, %c0_29] : memref<288x128xbf16, #tpu.memory_space<vmem>>, vector<32x128xbf16>
    %cst_30 = arith.constant dense<0.000000e+00> : vector<64x128xf32>
    %21 = tpu.matmul %19, %20, %cst_30 {dimension_numbers = #tpu.dot_dimension_numbers<[1], [0], [0], [1], [0, 0, 1, 1], [], []>} : vector<64x32xbf16>, vector<32x128xbf16>, vector<64x128xf32> -> vector<64x128xf32>
    %22 = arith.addf %17, %21 : vector<64x128xf32>
    %c0_31 = arith.constant 0 : index
    %c2 = arith.constant 2 : index
    %c0_32 = arith.constant 0 : index
    %23 = vector.load %arg6[%c0_31, %c2, %c0_32] : memref<10x10x32xbf16, #tpu.memory_space<vmem>>, vector<8x8x32xbf16>
    %24 = vector.shape_cast %23 : vector<8x8x32xbf16> to vector<64x32xbf16>
    %c64 = arith.constant 64 : index
    %c0_33 = arith.constant 0 : index
    %25 = vector.load %arg2[%c64, %c0_33] : memref<288x128xbf16, #tpu.memory_space<vmem>>, vector<32x128xbf16>
    %cst_34 = arith.constant dense<0.000000e+00> : vector<64x128xf32>
    %26 = tpu.matmul %24, %25, %cst_34 {dimension_numbers = #tpu.dot_dimension_numbers<[1], [0], [0], [1], [0, 0, 1, 1], [], []>} : vector<64x32xbf16>, vector<32x128xbf16>, vector<64x128xf32> -> vector<64x128xf32>
    %27 = arith.addf %22, %26 : vector<64x128xf32>
    %c1_35 = arith.constant 1 : index
    %c0_36 = arith.constant 0 : index
    %c0_37 = arith.constant 0 : index
    %28 = vector.load %arg6[%c1_35, %c0_36, %c0_37] : memref<10x10x32xbf16, #tpu.memory_space<vmem>>, vector<8x8x32xbf16>
    %29 = vector.shape_cast %28 : vector<8x8x32xbf16> to vector<64x32xbf16>
    %c96 = arith.constant 96 : index
    %c0_38 = arith.constant 0 : index
    %30 = vector.load %arg2[%c96, %c0_38] : memref<288x128xbf16, #tpu.memory_space<vmem>>, vector<32x128xbf16>
    %cst_39 = arith.constant dense<0.000000e+00> : vector<64x128xf32>
    %31 = tpu.matmul %29, %30, %cst_39 {dimension_numbers = #tpu.dot_dimension_numbers<[1], [0], [0], [1], [0, 0, 1, 1], [], []>} : vector<64x32xbf16>, vector<32x128xbf16>, vector<64x128xf32> -> vector<64x128xf32>
    %32 = arith.addf %27, %31 : vector<64x128xf32>
    %c1_40 = arith.constant 1 : index
    %c1_41 = arith.constant 1 : index
    %c0_42 = arith.constant 0 : index
    %33 = vector.load %arg6[%c1_40, %c1_41, %c0_42] : memref<10x10x32xbf16, #tpu.memory_space<vmem>>, vector<8x8x32xbf16>
    %34 = vector.shape_cast %33 : vector<8x8x32xbf16> to vector<64x32xbf16>
    %c128 = arith.constant 128 : index
    %c0_43 = arith.constant 0 : index
    %35 = vector.load %arg2[%c128, %c0_43] : memref<288x128xbf16, #tpu.memory_space<vmem>>, vector<32x128xbf16>
    %cst_44 = arith.constant dense<0.000000e+00> : vector<64x128xf32>
    %36 = tpu.matmul %34, %35, %cst_44 {dimension_numbers = #tpu.dot_dimension_numbers<[1], [0], [0], [1], [0, 0, 1, 1], [], []>} : vector<64x32xbf16>, vector<32x128xbf16>, vector<64x128xf32> -> vector<64x128xf32>
    %37 = arith.addf %32, %36 : vector<64x128xf32>
    %c1_45 = arith.constant 1 : index
    %c2_46 = arith.constant 2 : index
    %c0_47 = arith.constant 0 : index
    %38 = vector.load %arg6[%c1_45, %c2_46, %c0_47] : memref<10x10x32xbf16, #tpu.memory_space<vmem>>, vector<8x8x32xbf16>
    %39 = vector.shape_cast %38 : vector<8x8x32xbf16> to vector<64x32xbf16>
    %c160 = arith.constant 160 : index
    %c0_48 = arith.constant 0 : index
    %40 = vector.load %arg2[%c160, %c0_48] : memref<288x128xbf16, #tpu.memory_space<vmem>>, vector<32x128xbf16>
    %cst_49 = arith.constant dense<0.000000e+00> : vector<64x128xf32>
    %41 = tpu.matmul %39, %40, %cst_49 {dimension_numbers = #tpu.dot_dimension_numbers<[1], [0], [0], [1], [0, 0, 1, 1], [], []>} : vector<64x32xbf16>, vector<32x128xbf16>, vector<64x128xf32> -> vector<64x128xf32>
    %42 = arith.addf %37, %41 : vector<64x128xf32>
    %c2_50 = arith.constant 2 : index
    %c0_51 = arith.constant 0 : index
    %c0_52 = arith.constant 0 : index
    %43 = vector.load %arg6[%c2_50, %c0_51, %c0_52] : memref<10x10x32xbf16, #tpu.memory_space<vmem>>, vector<8x8x32xbf16>
    %44 = vector.shape_cast %43 : vector<8x8x32xbf16> to vector<64x32xbf16>
    %c192 = arith.constant 192 : index
    %c0_53 = arith.constant 0 : index
    %45 = vector.load %arg2[%c192, %c0_53] : memref<288x128xbf16, #tpu.memory_space<vmem>>, vector<32x128xbf16>
    %cst_54 = arith.constant dense<0.000000e+00> : vector<64x128xf32>
    %46 = tpu.matmul %44, %45, %cst_54 {dimension_numbers = #tpu.dot_dimension_numbers<[1], [0], [0], [1], [0, 0, 1, 1], [], []>} : vector<64x32xbf16>, vector<32x128xbf16>, vector<64x128xf32> -> vector<64x128xf32>
    %47 = arith.addf %42, %46 : vector<64x128xf32>
    %c2_55 = arith.constant 2 : index
    %c1_56 = arith.constant 1 : index
    %c0_57 = arith.constant 0 : index
    %48 = vector.load %arg6[%c2_55, %c1_56, %c0_57] : memref<10x10x32xbf16, #tpu.memory_space<vmem>>, vector<8x8x32xbf16>
    %49 = vector.shape_cast %48 : vector<8x8x32xbf16> to vector<64x32xbf16>
    %c224 = arith.constant 224 : index
    %c0_58 = arith.constant 0 : index
    %50 = vector.load %arg2[%c224, %c0_58] : memref<288x128xbf16, #tpu.memory_space<vmem>>, vector<32x128xbf16>
    %cst_59 = arith.constant dense<0.000000e+00> : vector<64x128xf32>
    %51 = tpu.matmul %49, %50, %cst_59 {dimension_numbers = #tpu.dot_dimension_numbers<[1], [0], [0], [1], [0, 0, 1, 1], [], []>} : vector<64x32xbf16>, vector<32x128xbf16>, vector<64x128xf32> -> vector<64x128xf32>
    %52 = arith.addf %47, %51 : vector<64x128xf32>
    %c2_60 = arith.constant 2 : index
    %c2_61 = arith.constant 2 : index
    %c0_62 = arith.constant 0 : index
    %53 = vector.load %arg6[%c2_60, %c2_61, %c0_62] : memref<10x10x32xbf16, #tpu.memory_space<vmem>>, vector<8x8x32xbf16>
    %54 = vector.shape_cast %53 : vector<8x8x32xbf16> to vector<64x32xbf16>
    %c256 = arith.constant 256 : index
    %c0_63 = arith.constant 0 : index
    %55 = vector.load %arg2[%c256, %c0_63] : memref<288x128xbf16, #tpu.memory_space<vmem>>, vector<32x128xbf16>
    %cst_64 = arith.constant dense<0.000000e+00> : vector<64x128xf32>
    %56 = tpu.matmul %54, %55, %cst_64 {dimension_numbers = #tpu.dot_dimension_numbers<[1], [0], [0], [1], [0, 0, 1, 1], [], []>} : vector<64x32xbf16>, vector<32x128xbf16>, vector<64x128xf32> -> vector<64x128xf32>
    %57 = arith.addf %52, %56 : vector<64x128xf32>
    %cst_65 = arith.constant 1.000000e+00 : f32
    %58 = vector.broadcast %cst_65 : f32 to vector<1x64xf32>
    %cst_66 = arith.constant dense<0.000000e+00> : vector<1x128xf32>
    %59 = tpu.matmul %58, %57, %cst_66 {dimension_numbers = #tpu.dot_dimension_numbers<[1], [0], [0], [1], [0, 0, 1, 1], [], []>} : vector<1x64xf32>, vector<64x128xf32>, vector<1x128xf32> -> vector<1x128xf32>
    %60 = arith.mulf %57, %57 : vector<64x128xf32>
    %cst_67 = arith.constant dense<0.000000e+00> : vector<1x128xf32>
    %61 = tpu.matmul %58, %60, %cst_67 {dimension_numbers = #tpu.dot_dimension_numbers<[1], [0], [0], [1], [0, 0, 1, 1], [], []>} : vector<1x64xf32>, vector<64x128xf32>, vector<1x128xf32> -> vector<1x128xf32>
    %62 = tpu.iota {dimensions = array<i32: 0>} : vector<128x16xi32>
    %63 = tpu.iota {dimensions = array<i32: 1>} : vector<128x16xi32>
    %c16_i32 = arith.constant 16 : i32
    %c0_i32 = arith.constant 0 : i32
    %64 = arith.cmpi eq, %c16_i32, %c0_i32 : i32
    %c1_i32 = arith.constant 1 : i32
    %65 = arith.select %64, %c1_i32, %c16_i32 : i32
    %66 = vector.broadcast %65 : i32 to vector<128x16xi32>
    %67 = arith.remsi %62, %66 : vector<128x16xi32>
    %c0_i32_68 = arith.constant 0 : i32
    %68 = vector.broadcast %c0_i32_68 : i32 to vector<128x16xi32>
    %69 = arith.cmpi ne, %67, %68 : vector<128x16xi32>
    %c0_i32_69 = arith.constant 0 : i32
    %70 = vector.broadcast %c0_i32_69 : i32 to vector<128x16xi32>
    %71 = arith.cmpi slt, %67, %70 : vector<128x16xi32>
    %c0_i32_70 = arith.constant 0 : i32
    %72 = arith.cmpi slt, %65, %c0_i32_70 : i32
    %73 = vector.broadcast %72 : i1 to vector<128x16xi1>
    %74 = vector.broadcast %73 : vector<128x16xi1> to vector<128x16xi1>
    %75 = arith.xori %71, %74 : vector<128x16xi1>
    %76 = arith.andi %75, %69 : vector<128x16xi1>
    %77 = vector.broadcast %65 : i32 to vector<128x16xi32>
    %78 = arith.addi %67, %77 : vector<128x16xi32>
    %79 = arith.select %76, %78, %67 : vector<128x16xi1>, vector<128x16xi32>
    %80 = arith.cmpi eq, %79, %63 : vector<128x16xi32>
    %81 = arith.extui %80 : vector<128x16xi1> to vector<128x16xi32>
    %82 = arith.sitofp %81 : vector<128x16xi32> to vector<128x16xf32>
    %83 = tpu.iota {dimensions = array<i32: 0>} : vector<16x128xi32>
    %84 = tpu.iota {dimensions = array<i32: 1>} : vector<16x128xi32>
    %c16_i32_71 = arith.constant 16 : i32
    %c0_i32_72 = arith.constant 0 : i32
    %85 = arith.cmpi eq, %c16_i32_71, %c0_i32_72 : i32
    %c1_i32_73 = arith.constant 1 : i32
    %86 = arith.select %85, %c1_i32_73, %c16_i32_71 : i32
    %87 = vector.broadcast %86 : i32 to vector<16x128xi32>
    %88 = arith.remsi %84, %87 : vector<16x128xi32>
    %c0_i32_74 = arith.constant 0 : i32
    %89 = vector.broadcast %c0_i32_74 : i32 to vector<16x128xi32>
    %90 = arith.cmpi ne, %88, %89 : vector<16x128xi32>
    %c0_i32_75 = arith.constant 0 : i32
    %91 = vector.broadcast %c0_i32_75 : i32 to vector<16x128xi32>
    %92 = arith.cmpi slt, %88, %91 : vector<16x128xi32>
    %c0_i32_76 = arith.constant 0 : i32
    %93 = arith.cmpi slt, %86, %c0_i32_76 : i32
    %94 = vector.broadcast %93 : i1 to vector<16x128xi1>
    %95 = vector.broadcast %94 : vector<16x128xi1> to vector<16x128xi1>
    %96 = arith.xori %92, %95 : vector<16x128xi1>
    %97 = arith.andi %96, %90 : vector<16x128xi1>
    %98 = vector.broadcast %86 : i32 to vector<16x128xi32>
    %99 = arith.addi %88, %98 : vector<16x128xi32>
    %100 = arith.select %97, %99, %88 : vector<16x128xi1>, vector<16x128xi32>
    %101 = arith.cmpi eq, %100, %83 : vector<16x128xi32>
    %102 = arith.extui %101 : vector<16x128xi1> to vector<16x128xi32>
    %103 = arith.sitofp %102 : vector<16x128xi32> to vector<16x128xf32>
    %cst_77 = arith.constant dense<0.000000e+00> : vector<1x16xf32>
    %104 = tpu.matmul %59, %82, %cst_77 {dimension_numbers = #tpu.dot_dimension_numbers<[1], [0], [0], [1], [0, 0, 1, 1], [], []>} : vector<1x128xf32>, vector<128x16xf32>, vector<1x16xf32> -> vector<1x16xf32>
    %cst_78 = arith.constant 0.001953125 : f32
    %105 = vector.broadcast %cst_78 : f32 to vector<1x16xf32>
    %106 = arith.mulf %104, %105 : vector<1x16xf32>
    %cst_79 = arith.constant dense<0.000000e+00> : vector<1x16xf32>
    %107 = tpu.matmul %61, %82, %cst_79 {dimension_numbers = #tpu.dot_dimension_numbers<[1], [0], [0], [1], [0, 0, 1, 1], [], []>} : vector<1x128xf32>, vector<128x16xf32>, vector<1x16xf32> -> vector<1x16xf32>
    %cst_80 = arith.constant 0.001953125 : f32
    %108 = vector.broadcast %cst_80 : f32 to vector<1x16xf32>
    %109 = arith.mulf %107, %108 : vector<1x16xf32>
    %110 = arith.mulf %106, %106 : vector<1x16xf32>
    %111 = arith.subf %109, %110 : vector<1x16xf32>
    %cst_81 = arith.constant 9.99999974E-6 : f32
    %112 = vector.broadcast %cst_81 : f32 to vector<1x16xf32>
    %113 = arith.addf %111, %112 : vector<1x16xf32>
    %114 = math.rsqrt %113 : vector<1x16xf32>
    %cst_82 = arith.constant dense<0.000000e+00> : vector<1x128xf32>
    %115 = tpu.matmul %106, %103, %cst_82 {dimension_numbers = #tpu.dot_dimension_numbers<[1], [0], [0], [1], [0, 0, 1, 1], [], []>} : vector<1x16xf32>, vector<16x128xf32>, vector<1x128xf32> -> vector<1x128xf32>
    %cst_83 = arith.constant dense<0.000000e+00> : vector<1x128xf32>
    %116 = tpu.matmul %114, %103, %cst_83 {dimension_numbers = #tpu.dot_dimension_numbers<[1], [0], [0], [1], [0, 0, 1, 1], [], []>} : vector<1x16xf32>, vector<16x128xf32>, vector<1x128xf32> -> vector<1x128xf32>
    %117 = vector.broadcast %115 : vector<1x128xf32> to vector<64x128xf32>
    %118 = arith.subf %57, %117 : vector<64x128xf32>
    %119 = vector.broadcast %116 : vector<1x128xf32> to vector<64x128xf32>
    %120 = arith.mulf %118, %119 : vector<64x128xf32>
    %cst_84 = arith.constant 0.000000e+00 : f32
    %121 = vector.broadcast %cst_84 : f32 to vector<64x128xf32>
    %122 = arith.maximumf %120, %121 : vector<64x128xf32>
    %123 = vector.shape_cast %122 : vector<64x128xf32> to vector<8x8x128xf32>
    %cst_85 = arith.constant 0.000000e+00 : bf16
    %124 = vector.broadcast %cst_85 : bf16 to vector<1x10x128xbf16>
    %c0_86 = arith.constant 0 : index
    %c0_87 = arith.constant 0 : index
    %c0_88 = arith.constant 0 : index
    %125 = vector.load %arg7[%c0_86, %c0_87, %c0_88] : memref<10x10x128xbf16, #tpu.memory_space<vmem>>, vector<1x10x128xbf16>
    tpu.vector_store %arg7[%c0_86, %c0_87, %c0_88], %124 {strides = array<i32>} : memref<10x10x128xbf16, #tpu.memory_space<vmem>>, vector<1x10x128xbf16>,
    %cst_89 = arith.constant 0.000000e+00 : bf16
    %126 = vector.broadcast %cst_89 : bf16 to vector<1x10x128xbf16>
    %c9_90 = arith.constant 9 : index
    %c0_91 = arith.constant 0 : index
    %c0_92 = arith.constant 0 : index
    %127 = vector.load %arg7[%c9_90, %c0_91, %c0_92] : memref<10x10x128xbf16, #tpu.memory_space<vmem>>, vector<1x10x128xbf16>
    tpu.vector_store %arg7[%c9_90, %c0_91, %c0_92], %126 {strides = array<i32>} : memref<10x10x128xbf16, #tpu.memory_space<vmem>>, vector<1x10x128xbf16>,
    %cst_93 = arith.constant 0.000000e+00 : bf16
    %128 = vector.broadcast %cst_93 : bf16 to vector<8x1x128xbf16>
    %c1_94 = arith.constant 1 : index
    %c0_95 = arith.constant 0 : index
    %c0_96 = arith.constant 0 : index
    %129 = vector.load %arg7[%c1_94, %c0_95, %c0_96] : memref<10x10x128xbf16, #tpu.memory_space<vmem>>, vector<8x1x128xbf16>
    tpu.vector_store %arg7[%c1_94, %c0_95, %c0_96], %128 {strides = array<i32>} : memref<10x10x128xbf16, #tpu.memory_space<vmem>>, vector<8x1x128xbf16>,
    %cst_97 = arith.constant 0.000000e+00 : bf16
    %130 = vector.broadcast %cst_97 : bf16 to vector<8x1x128xbf16>
    %c1_98 = arith.constant 1 : index
    %c9_99 = arith.constant 9 : index
    %c0_100 = arith.constant 0 : index
    %131 = vector.load %arg7[%c1_98, %c9_99, %c0_100] : memref<10x10x128xbf16, #tpu.memory_space<vmem>>, vector<8x1x128xbf16>
    tpu.vector_store %arg7[%c1_98, %c9_99, %c0_100], %130 {strides = array<i32>} : memref<10x10x128xbf16, #tpu.memory_space<vmem>>, vector<8x1x128xbf16>,
    %132 = arith.truncf %123 : vector<8x8x128xf32> to vector<8x8x128xbf16>
    %c1_101 = arith.constant 1 : index
    %c1_102 = arith.constant 1 : index
    %c0_103 = arith.constant 0 : index
    %133 = vector.load %arg7[%c1_101, %c1_102, %c0_103] : memref<10x10x128xbf16, #tpu.memory_space<vmem>>, vector<8x8x128xbf16>
    tpu.vector_store %arg7[%c1_101, %c1_102, %c0_103], %132 {strides = array<i32>} : memref<10x10x128xbf16, #tpu.memory_space<vmem>>, vector<8x8x128xbf16>,
    %cst_104 = arith.constant 0.000000e+00 : f32
    %134 = vector.broadcast %cst_104 : f32 to vector<64x256xf32>
    %c0_105 = arith.constant 0 : index
    %c0_106 = arith.constant 0 : index
    %c0_107 = arith.constant 0 : index
    %135 = vector.load %arg7[%c0_105, %c0_106, %c0_107] : memref<10x10x128xbf16, #tpu.memory_space<vmem>>, vector<8x8x128xbf16>
    %136 = vector.shape_cast %135 : vector<8x8x128xbf16> to vector<64x128xbf16>
    %c0_108 = arith.constant 0 : index
    %c0_109 = arith.constant 0 : index
    %137 = vector.load %arg3[%c0_108, %c0_109] : memref<1152x256xbf16, #tpu.memory_space<vmem>>, vector<128x256xbf16>
    %cst_110 = arith.constant dense<0.000000e+00> : vector<64x256xf32>
    %138 = tpu.matmul %136, %137, %cst_110 {dimension_numbers = #tpu.dot_dimension_numbers<[1], [0], [0], [1], [0, 0, 1, 1], [], []>} : vector<64x128xbf16>, vector<128x256xbf16>, vector<64x256xf32> -> vector<64x256xf32>
    %139 = arith.addf %134, %138 : vector<64x256xf32>
    %c0_111 = arith.constant 0 : index
    %c1_112 = arith.constant 1 : index
    %c0_113 = arith.constant 0 : index
    %140 = vector.load %arg7[%c0_111, %c1_112, %c0_113] : memref<10x10x128xbf16, #tpu.memory_space<vmem>>, vector<8x8x128xbf16>
    %141 = vector.shape_cast %140 : vector<8x8x128xbf16> to vector<64x128xbf16>
    %c128_114 = arith.constant 128 : index
    %c0_115 = arith.constant 0 : index
    %142 = vector.load %arg3[%c128_114, %c0_115] : memref<1152x256xbf16, #tpu.memory_space<vmem>>, vector<128x256xbf16>
    %cst_116 = arith.constant dense<0.000000e+00> : vector<64x256xf32>
    %143 = tpu.matmul %141, %142, %cst_116 {dimension_numbers = #tpu.dot_dimension_numbers<[1], [0], [0], [1], [0, 0, 1, 1], [], []>} : vector<64x128xbf16>, vector<128x256xbf16>, vector<64x256xf32> -> vector<64x256xf32>
    %144 = arith.addf %139, %143 : vector<64x256xf32>
    %c0_117 = arith.constant 0 : index
    %c2_118 = arith.constant 2 : index
    %c0_119 = arith.constant 0 : index
    %145 = vector.load %arg7[%c0_117, %c2_118, %c0_119] : memref<10x10x128xbf16, #tpu.memory_space<vmem>>, vector<8x8x128xbf16>
    %146 = vector.shape_cast %145 : vector<8x8x128xbf16> to vector<64x128xbf16>
    %c256_120 = arith.constant 256 : index
    %c0_121 = arith.constant 0 : index
    %147 = vector.load %arg3[%c256_120, %c0_121] : memref<1152x256xbf16, #tpu.memory_space<vmem>>, vector<128x256xbf16>
    %cst_122 = arith.constant dense<0.000000e+00> : vector<64x256xf32>
    %148 = tpu.matmul %146, %147, %cst_122 {dimension_numbers = #tpu.dot_dimension_numbers<[1], [0], [0], [1], [0, 0, 1, 1], [], []>} : vector<64x128xbf16>, vector<128x256xbf16>, vector<64x256xf32> -> vector<64x256xf32>
    %149 = arith.addf %144, %148 : vector<64x256xf32>
    %c1_123 = arith.constant 1 : index
    %c0_124 = arith.constant 0 : index
    %c0_125 = arith.constant 0 : index
    %150 = vector.load %arg7[%c1_123, %c0_124, %c0_125] : memref<10x10x128xbf16, #tpu.memory_space<vmem>>, vector<8x8x128xbf16>
    %151 = vector.shape_cast %150 : vector<8x8x128xbf16> to vector<64x128xbf16>
    %c384 = arith.constant 384 : index
    %c0_126 = arith.constant 0 : index
    %152 = vector.load %arg3[%c384, %c0_126] : memref<1152x256xbf16, #tpu.memory_space<vmem>>, vector<128x256xbf16>
    %cst_127 = arith.constant dense<0.000000e+00> : vector<64x256xf32>
    %153 = tpu.matmul %151, %152, %cst_127 {dimension_numbers = #tpu.dot_dimension_numbers<[1], [0], [0], [1], [0, 0, 1, 1], [], []>} : vector<64x128xbf16>, vector<128x256xbf16>, vector<64x256xf32> -> vector<64x256xf32>
    %154 = arith.addf %149, %153 : vector<64x256xf32>
    %c1_128 = arith.constant 1 : index
    %c1_129 = arith.constant 1 : index
    %c0_130 = arith.constant 0 : index
    %155 = vector.load %arg7[%c1_128, %c1_129, %c0_130] : memref<10x10x128xbf16, #tpu.memory_space<vmem>>, vector<8x8x128xbf16>
    %156 = vector.shape_cast %155 : vector<8x8x128xbf16> to vector<64x128xbf16>
    %c512 = arith.constant 512 : index
    %c0_131 = arith.constant 0 : index
    %157 = vector.load %arg3[%c512, %c0_131] : memref<1152x256xbf16, #tpu.memory_space<vmem>>, vector<128x256xbf16>
    %cst_132 = arith.constant dense<0.000000e+00> : vector<64x256xf32>
    %158 = tpu.matmul %156, %157, %cst_132 {dimension_numbers = #tpu.dot_dimension_numbers<[1], [0], [0], [1], [0, 0, 1, 1], [], []>} : vector<64x128xbf16>, vector<128x256xbf16>, vector<64x256xf32> -> vector<64x256xf32>
    %159 = arith.addf %154, %158 : vector<64x256xf32>
    %c1_133 = arith.constant 1 : index
    %c2_134 = arith.constant 2 : index
    %c0_135 = arith.constant 0 : index
    %160 = vector.load %arg7[%c1_133, %c2_134, %c0_135] : memref<10x10x128xbf16, #tpu.memory_space<vmem>>, vector<8x8x128xbf16>
    %161 = vector.shape_cast %160 : vector<8x8x128xbf16> to vector<64x128xbf16>
    %c640 = arith.constant 640 : index
    %c0_136 = arith.constant 0 : index
    %162 = vector.load %arg3[%c640, %c0_136] : memref<1152x256xbf16, #tpu.memory_space<vmem>>, vector<128x256xbf16>
    %cst_137 = arith.constant dense<0.000000e+00> : vector<64x256xf32>
    %163 = tpu.matmul %161, %162, %cst_137 {dimension_numbers = #tpu.dot_dimension_numbers<[1], [0], [0], [1], [0, 0, 1, 1], [], []>} : vector<64x128xbf16>, vector<128x256xbf16>, vector<64x256xf32> -> vector<64x256xf32>
    %164 = arith.addf %159, %163 : vector<64x256xf32>
    %c2_138 = arith.constant 2 : index
    %c0_139 = arith.constant 0 : index
    %c0_140 = arith.constant 0 : index
    %165 = vector.load %arg7[%c2_138, %c0_139, %c0_140] : memref<10x10x128xbf16, #tpu.memory_space<vmem>>, vector<8x8x128xbf16>
    %166 = vector.shape_cast %165 : vector<8x8x128xbf16> to vector<64x128xbf16>
    %c768 = arith.constant 768 : index
    %c0_141 = arith.constant 0 : index
    %167 = vector.load %arg3[%c768, %c0_141] : memref<1152x256xbf16, #tpu.memory_space<vmem>>, vector<128x256xbf16>
    %cst_142 = arith.constant dense<0.000000e+00> : vector<64x256xf32>
    %168 = tpu.matmul %166, %167, %cst_142 {dimension_numbers = #tpu.dot_dimension_numbers<[1], [0], [0], [1], [0, 0, 1, 1], [], []>} : vector<64x128xbf16>, vector<128x256xbf16>, vector<64x256xf32> -> vector<64x256xf32>
    %169 = arith.addf %164, %168 : vector<64x256xf32>
    %c2_143 = arith.constant 2 : index
    %c1_144 = arith.constant 1 : index
    %c0_145 = arith.constant 0 : index
    %170 = vector.load %arg7[%c2_143, %c1_144, %c0_145] : memref<10x10x128xbf16, #tpu.memory_space<vmem>>, vector<8x8x128xbf16>
    %171 = vector.shape_cast %170 : vector<8x8x128xbf16> to vector<64x128xbf16>
    %c896 = arith.constant 896 : index
    %c0_146 = arith.constant 0 : index
    %172 = vector.load %arg3[%c896, %c0_146] : memref<1152x256xbf16, #tpu.memory_space<vmem>>, vector<128x256xbf16>
    %cst_147 = arith.constant dense<0.000000e+00> : vector<64x256xf32>
    %173 = tpu.matmul %171, %172, %cst_147 {dimension_numbers = #tpu.dot_dimension_numbers<[1], [0], [0], [1], [0, 0, 1, 1], [], []>} : vector<64x128xbf16>, vector<128x256xbf16>, vector<64x256xf32> -> vector<64x256xf32>
    %174 = arith.addf %169, %173 : vector<64x256xf32>
    %c2_148 = arith.constant 2 : index
    %c2_149 = arith.constant 2 : index
    %c0_150 = arith.constant 0 : index
    %175 = vector.load %arg7[%c2_148, %c2_149, %c0_150] : memref<10x10x128xbf16, #tpu.memory_space<vmem>>, vector<8x8x128xbf16>
    %176 = vector.shape_cast %175 : vector<8x8x128xbf16> to vector<64x128xbf16>
    %c1024 = arith.constant 1024 : index
    %c0_151 = arith.constant 0 : index
    %177 = vector.load %arg3[%c1024, %c0_151] : memref<1152x256xbf16, #tpu.memory_space<vmem>>, vector<128x256xbf16>
    %cst_152 = arith.constant dense<0.000000e+00> : vector<64x256xf32>
    %178 = tpu.matmul %176, %177, %cst_152 {dimension_numbers = #tpu.dot_dimension_numbers<[1], [0], [0], [1], [0, 0, 1, 1], [], []>} : vector<64x128xbf16>, vector<128x256xbf16>, vector<64x256xf32> -> vector<64x256xf32>
    %179 = arith.addf %174, %178 : vector<64x256xf32>
    %cst_153 = arith.constant 1.000000e+00 : f32
    %180 = vector.broadcast %cst_153 : f32 to vector<1x64xf32>
    %cst_154 = arith.constant dense<0.000000e+00> : vector<1x256xf32>
    %181 = tpu.matmul %180, %179, %cst_154 {dimension_numbers = #tpu.dot_dimension_numbers<[1], [0], [0], [1], [0, 0, 1, 1], [], []>} : vector<1x64xf32>, vector<64x256xf32>, vector<1x256xf32> -> vector<1x256xf32>
    %182 = arith.mulf %179, %179 : vector<64x256xf32>
    %cst_155 = arith.constant dense<0.000000e+00> : vector<1x256xf32>
    %183 = tpu.matmul %180, %182, %cst_155 {dimension_numbers = #tpu.dot_dimension_numbers<[1], [0], [0], [1], [0, 0, 1, 1], [], []>} : vector<1x64xf32>, vector<64x256xf32>, vector<1x256xf32> -> vector<1x256xf32>
    %184 = tpu.iota {dimensions = array<i32: 0>} : vector<256x32xi32>
    %185 = tpu.iota {dimensions = array<i32: 1>} : vector<256x32xi32>
    %c32_i32 = arith.constant 32 : i32
    %c0_i32_156 = arith.constant 0 : i32
    %186 = arith.cmpi eq, %c32_i32, %c0_i32_156 : i32
    %c1_i32_157 = arith.constant 1 : i32
    %187 = arith.select %186, %c1_i32_157, %c32_i32 : i32
    %188 = vector.broadcast %187 : i32 to vector<256x32xi32>
    %189 = arith.remsi %184, %188 : vector<256x32xi32>
    %c0_i32_158 = arith.constant 0 : i32
    %190 = vector.broadcast %c0_i32_158 : i32 to vector<256x32xi32>
    %191 = arith.cmpi ne, %189, %190 : vector<256x32xi32>
    %c0_i32_159 = arith.constant 0 : i32
    %192 = vector.broadcast %c0_i32_159 : i32 to vector<256x32xi32>
    %193 = arith.cmpi slt, %189, %192 : vector<256x32xi32>
    %c0_i32_160 = arith.constant 0 : i32
    %194 = arith.cmpi slt, %187, %c0_i32_160 : i32
    %195 = vector.broadcast %194 : i1 to vector<256x32xi1>
    %196 = vector.broadcast %195 : vector<256x32xi1> to vector<256x32xi1>
    %197 = arith.xori %193, %196 : vector<256x32xi1>
    %198 = arith.andi %197, %191 : vector<256x32xi1>
    %199 = vector.broadcast %187 : i32 to vector<256x32xi32>
    %200 = arith.addi %189, %199 : vector<256x32xi32>
    %201 = arith.select %198, %200, %189 : vector<256x32xi1>, vector<256x32xi32>
    %202 = arith.cmpi eq, %201, %185 : vector<256x32xi32>
    %203 = arith.extui %202 : vector<256x32xi1> to vector<256x32xi32>
    %204 = arith.sitofp %203 : vector<256x32xi32> to vector<256x32xf32>
    %205 = tpu.iota {dimensions = array<i32: 0>} : vector<32x256xi32>
    %206 = tpu.iota {dimensions = array<i32: 1>} : vector<32x256xi32>
    %c32_i32_161 = arith.constant 32 : i32
    %c0_i32_162 = arith.constant 0 : i32
    %207 = arith.cmpi eq, %c32_i32_161, %c0_i32_162 : i32
    %c1_i32_163 = arith.constant 1 : i32
    %208 = arith.select %207, %c1_i32_163, %c32_i32_161 : i32
    %209 = vector.broadcast %208 : i32 to vector<32x256xi32>
    %210 = arith.remsi %206, %209 : vector<32x256xi32>
    %c0_i32_164 = arith.constant 0 : i32
    %211 = vector.broadcast %c0_i32_164 : i32 to vector<32x256xi32>
    %212 = arith.cmpi ne, %210, %211 : vector<32x256xi32>
    %c0_i32_165 = arith.constant 0 : i32
    %213 = vector.broadcast %c0_i32_165 : i32 to vector<32x256xi32>
    %214 = arith.cmpi slt, %210, %213 : vector<32x256xi32>
    %c0_i32_166 = arith.constant 0 : i32
    %215 = arith.cmpi slt, %208, %c0_i32_166 : i32
    %216 = vector.broadcast %215 : i1 to vector<32x256xi1>
    %217 = vector.broadcast %216 : vector<32x256xi1> to vector<32x256xi1>
    %218 = arith.xori %214, %217 : vector<32x256xi1>
    %219 = arith.andi %218, %212 : vector<32x256xi1>
    %220 = vector.broadcast %208 : i32 to vector<32x256xi32>
    %221 = arith.addi %210, %220 : vector<32x256xi32>
    %222 = arith.select %219, %221, %210 : vector<32x256xi1>, vector<32x256xi32>
    %223 = arith.cmpi eq, %222, %205 : vector<32x256xi32>
    %224 = arith.extui %223 : vector<32x256xi1> to vector<32x256xi32>
    %225 = arith.sitofp %224 : vector<32x256xi32> to vector<32x256xf32>
    %cst_167 = arith.constant dense<0.000000e+00> : vector<1x32xf32>
    %226 = tpu.matmul %181, %204, %cst_167 {dimension_numbers = #tpu.dot_dimension_numbers<[1], [0], [0], [1], [0, 0, 1, 1], [], []>} : vector<1x256xf32>, vector<256x32xf32>, vector<1x32xf32> -> vector<1x32xf32>
    %cst_168 = arith.constant 0.001953125 : f32
    %227 = vector.broadcast %cst_168 : f32 to vector<1x32xf32>
    %228 = arith.mulf %226, %227 : vector<1x32xf32>
    %cst_169 = arith.constant dense<0.000000e+00> : vector<1x32xf32>
    %229 = tpu.matmul %183, %204, %cst_169 {dimension_numbers = #tpu.dot_dimension_numbers<[1], [0], [0], [1], [0, 0, 1, 1], [], []>} : vector<1x256xf32>, vector<256x32xf32>, vector<1x32xf32> -> vector<1x32xf32>
    %cst_170 = arith.constant 0.001953125 : f32
    %230 = vector.broadcast %cst_170 : f32 to vector<1x32xf32>
    %231 = arith.mulf %229, %230 : vector<1x32xf32>
    %232 = arith.mulf %228, %228 : vector<1x32xf32>
    %233 = arith.subf %231, %232 : vector<1x32xf32>
    %cst_171 = arith.constant 9.99999974E-6 : f32
    %234 = vector.broadcast %cst_171 : f32 to vector<1x32xf32>
    %235 = arith.addf %233, %234 : vector<1x32xf32>
    %236 = math.rsqrt %235 : vector<1x32xf32>
    %cst_172 = arith.constant dense<0.000000e+00> : vector<1x256xf32>
    %237 = tpu.matmul %228, %225, %cst_172 {dimension_numbers = #tpu.dot_dimension_numbers<[1], [0], [0], [1], [0, 0, 1, 1], [], []>} : vector<1x32xf32>, vector<32x256xf32>, vector<1x256xf32> -> vector<1x256xf32>
    %cst_173 = arith.constant dense<0.000000e+00> : vector<1x256xf32>
    %238 = tpu.matmul %236, %225, %cst_173 {dimension_numbers = #tpu.dot_dimension_numbers<[1], [0], [0], [1], [0, 0, 1, 1], [], []>} : vector<1x32xf32>, vector<32x256xf32>, vector<1x256xf32> -> vector<1x256xf32>
    %239 = vector.broadcast %237 : vector<1x256xf32> to vector<64x256xf32>
    %240 = arith.subf %179, %239 : vector<64x256xf32>
    %241 = vector.broadcast %238 : vector<1x256xf32> to vector<64x256xf32>
    %242 = arith.mulf %240, %241 : vector<64x256xf32>
    %cst_174 = arith.constant 0.000000e+00 : f32
    %243 = vector.broadcast %cst_174 : f32 to vector<64x256xf32>
    %244 = arith.maximumf %242, %243 : vector<64x256xf32>
    %245 = vector.shape_cast %244 : vector<64x256xf32> to vector<8x8x256xf32>
    %c0_175 = arith.constant 0 : index
    %c0_176 = arith.constant 0 : index
    %c0_177 = arith.constant 0 : index
    %c0_178 = arith.constant 0 : index
    %246 = vector.load %arg4[%c0_175, %c0_176, %c0_177, %c0_178] : memref<1x8x8x256xf32, #tpu.memory_space<vmem>>, vector<1x8x8x256xf32>
    %247 = vector.shape_cast %246 : vector<1x8x8x256xf32> to vector<8x8x256xf32>
    %248 = vector.shape_cast %245 : vector<8x8x256xf32> to vector<1x8x8x256xf32>
    tpu.vector_store %arg4[%c0_175, %c0_176, %c0_177, %c0_178], %248 {strides = array<i32>} : memref<1x8x8x256xf32, #tpu.memory_space<vmem>>, vector<1x8x8x256xf32>,
    %249 = vector.shape_cast %244 : vector<64x256xf32> to vector<8x4x2x256xf32>
    %250 = vector.extract_strided_slice %249 {offsets = [0, 0, 0, 0], sizes = [8, 4, 1, 256], strides = [1, 1, 1, 1]} : vector<8x4x2x256xf32> to vector<8x4x1x256xf32>
    %251 = vector.shape_cast %250 : vector<8x4x1x256xf32> to vector<8x4x256xf32>
    %252 = vector.extract_strided_slice %249 {offsets = [0, 0, 1, 0], sizes = [8, 4, 1, 256], strides = [1, 1, 1, 1]} : vector<8x4x2x256xf32> to vector<8x4x1x256xf32>
    %253 = vector.shape_cast %252 : vector<8x4x1x256xf32> to vector<8x4x256xf32>
    %254 = arith.maximumf %251, %253 : vector<8x4x256xf32>
    %255 = vector.shape_cast %254 : vector<8x4x256xf32> to vector<4x2x4x256xf32>
    %256 = vector.extract_strided_slice %255 {offsets = [0, 0, 0, 0], sizes = [4, 1, 4, 256], strides = [1, 1, 1, 1]} : vector<4x2x4x256xf32> to vector<4x1x4x256xf32>
    %257 = vector.shape_cast %256 : vector<4x1x4x256xf32> to vector<4x4x256xf32>
    %258 = vector.extract_strided_slice %255 {offsets = [0, 1, 0, 0], sizes = [4, 1, 4, 256], strides = [1, 1, 1, 1]} : vector<4x2x4x256xf32> to vector<4x1x4x256xf32>
    %259 = vector.shape_cast %258 : vector<4x1x4x256xf32> to vector<4x4x256xf32>
    %260 = arith.maximumf %257, %259 : vector<4x4x256xf32>
    %261 = vector.extract_strided_slice %260 {offsets = [0, 0, 0], sizes = [4, 4, 32], strides = [1, 1, 1]} : vector<4x4x256xf32> to vector<4x4x32xf32>
    %262 = vector.extract_strided_slice %260 {offsets = [0, 0, 32], sizes = [4, 4, 32], strides = [1, 1, 1]} : vector<4x4x256xf32> to vector<4x4x32xf32>
    %263 = arith.maximumf %261, %262 : vector<4x4x32xf32>
    %264 = vector.extract_strided_slice %260 {offsets = [0, 0, 64], sizes = [4, 4, 32], strides = [1, 1, 1]} : vector<4x4x256xf32> to vector<4x4x32xf32>
    %265 = vector.extract_strided_slice %260 {offsets = [0, 0, 96], sizes = [4, 4, 32], strides = [1, 1, 1]} : vector<4x4x256xf32> to vector<4x4x32xf32>
    %266 = arith.maximumf %264, %265 : vector<4x4x32xf32>
    %267 = vector.extract_strided_slice %260 {offsets = [0, 0, 128], sizes = [4, 4, 32], strides = [1, 1, 1]} : vector<4x4x256xf32> to vector<4x4x32xf32>
    %268 = vector.extract_strided_slice %260 {offsets = [0, 0, 160], sizes = [4, 4, 32], strides = [1, 1, 1]} : vector<4x4x256xf32> to vector<4x4x32xf32>
    %269 = arith.maximumf %267, %268 : vector<4x4x32xf32>
    %270 = vector.extract_strided_slice %260 {offsets = [0, 0, 192], sizes = [4, 4, 32], strides = [1, 1, 1]} : vector<4x4x256xf32> to vector<4x4x32xf32>
    %271 = vector.extract_strided_slice %260 {offsets = [0, 0, 224], sizes = [4, 4, 32], strides = [1, 1, 1]} : vector<4x4x256xf32> to vector<4x4x32xf32>
    %272 = arith.maximumf %270, %271 : vector<4x4x32xf32>
    %273 = tpu.concatenate %263, %266, %269, %272 in 2 : vector<4x4x32xf32>, vector<4x4x32xf32>, vector<4x4x32xf32>, vector<4x4x32xf32> -> vector<4x4x128xf32>
    %c0_179 = arith.constant 0 : index
    %c0_180 = arith.constant 0 : index
    %c0_181 = arith.constant 0 : index
    %c0_182 = arith.constant 0 : index
    %274 = vector.load %arg5[%c0_179, %c0_180, %c0_181, %c0_182] : memref<1x4x4x128xf32, #tpu.memory_space<vmem>>, vector<1x4x4x128xf32>
    %275 = vector.shape_cast %274 : vector<1x4x4x128xf32> to vector<4x4x128xf32>
    %276 = vector.shape_cast %273 : vector<4x4x128xf32> to vector<1x4x4x128xf32>
    tpu.vector_store %arg5[%c0_179, %c0_180, %c0_181, %c0_182], %276 {strides = array<i32>} : memref<1x4x4x128xf32, #tpu.memory_space<vmem>>, vector<1x4x4x128xf32>,
    return
  }
  func.func @transform_0(%arg0: i32) -> (i32, i32, i32, i32) {
    %c0_i32 = arith.constant 0 : i32
    %c0_i32_0 = arith.constant 0 : i32
    %c0_i32_1 = arith.constant 0 : i32
    %c0_i32_2 = arith.constant 0 : i32
    return %arg0, %c0_i32, %c0_i32_0, %c0_i32_1 : i32, i32, i32, i32
  }
  func.func @transform_1(%arg0: i32) -> (i32, i32) {
    %c0_i32 = arith.constant 0 : i32
    %c0_i32_0 = arith.constant 0 : i32
    %c0_i32_1 = arith.constant 0 : i32
    return %c0_i32, %c0_i32_0 : i32, i32
  }
  func.func @transform_2(%arg0: i32) -> (i32, i32) {
    %c0_i32 = arith.constant 0 : i32
    %c0_i32_0 = arith.constant 0 : i32
    %c0_i32_1 = arith.constant 0 : i32
    return %c0_i32, %c0_i32_0 : i32, i32
  }
  func.func @transform_3(%arg0: i32) -> (i32, i32, i32, i32) {
    %c0_i32 = arith.constant 0 : i32
    %c0_i32_0 = arith.constant 0 : i32
    %c0_i32_1 = arith.constant 0 : i32
    %c0_i32_2 = arith.constant 0 : i32
    return %arg0, %c0_i32, %c0_i32_0, %c0_i32_1 : i32, i32, i32, i32
  }
  func.func @transform_4(%arg0: i32) -> (i32, i32, i32, i32) {
    %c0_i32 = arith.constant 0 : i32
    %c0_i32_0 = arith.constant 0 : i32
    %c0_i32_1 = arith.constant 0 : i32
    %c0_i32_2 = arith.constant 0 : i32
    return %arg0, %c0_i32, %c0_i32_0, %c0_i32_1 : i32, i32, i32, i32
  }
}

</mosaic_0001>

<bundles_post_ra>
// kernel: encoder_block.1
= control target key start
LH: loop header
LB: loop body
LE: loop exit
PB: predicated region body
PF: predicated region fallthrough
CT: control target
= control target key end

     0   :  { %s9224_s15 = smov 0   ;;  %s12119_s0 = inlined_call_operand.vmem [shape: f32[2,8,8,32], index: 0, kind: input, shape index: {}]   ;;  %s12120_s1 = inlined_call_operand.vmem [shape: bf16[288,128], index: 1, kind: input, shape index: {}]   ;;  %s12121_s2 = inlined_call_operand.vmem [shape: bf16[1152,256], index: 2, kind: input, shape index: {}]   ;;  %s12122_s3 = inlined_call_operand.vmem [shape: f32[2,8,8,256], index: 3, kind: output, shape index: {0}]   ;;  %s12123_s4 = inlined_call_operand.vmem [shape: f32[2,4,4,128], index: 4, kind: output, shape index: {1}]  }
   0x1 LB: > { %s7528_s16 = sadd.s32 4294967295, %s9187_s15   ;;  %p7532_p0 = scmp.ge.s32.totalorder %s9187_s15, 1  ;;  %s9187_s15 = sphi %s9224_s15, %s15_s15  }
   0x2   : > { %p165_p1 = scmp.lt.s32.totalorder %s9187_s15, 3 }
   0x4   : > { %p166_p2 = pnand %p7532_p0, %p165_p1 }
   0x6   : > { %169 = sbr.rel (%p166_p2) target bundleno = 2696 (0xa88), region = 32 }
   0xd   : > { %v8920_v0 = vld [vmem:[%s12120_s1 + $0x10] sm:$0xff]   ;;  %p196_p3 = scmp.lt.s32.totalorder %s7528_s16, 1  ;;  %v8921_v1 = vld [vmem:[%s12120_s1 + $0x18] sm:$0xff]   ;;  %vm220_vm0 = vcmask 257024   ;;  %vm222_vm1 = vcmask 253952   ;;  %v12151_v2 = vmov 0  }
   0xe   : > { %8290 = vmatprep.subr.bf16.mxu0 %v8920_v0  ;;  %vm12127_vm2 = vsmask.f32 256  ;;  %221 = vst.msk [vmem:[#allocation2] sm:$0xf] %vm220_vm0, %v12151_v2  ;;  %v231_v4 = vld [vmem:[#allocation2 + $0x8] sm:$0x1] }
   0xf   : > { %s12386_s16 = smov (!%p196_p3, %s7528_s16), 1  ;;  %8291 = vmatpush3.bf16.msra.mxu0 %v8920_v0  ;;  %223 = vst.msk [vmem:[#allocation2 + $0x4] sm:$0x1] %vm222_vm1, %v12151_v2  ;;  %vm9246_vm3 = vmand %vm222_vm1, %vm12127_vm2  ;;  %vm12126_vm4 = vsmask.f32 7938  ;;  %v9300_v42 = vld [vmem:[%s12120_s1] sm:$0xff]  }
  0x10   : > { %v257_v5 = vld [vmem:[#allocation2 + $0xc] sm:$0x1]  ;;  %225 = vst.msk [vmem:[#allocation2 + $0x48] sm:$0xf] %vm220_vm0, %v12151_v2  ;;  %2798 = vst [vmem:[#allocation3] sm:$0xf] %v12151_v2  ;;  %8292 = vmatprep.subr.bf16.mxu0 %v8921_v1 }
  0x11   : > { %226 = vst.msk [vmem:[#allocation2 + $0x4c] sm:$0x1] %vm222_vm1, %v12151_v2  ;;  %2799 = vst [vmem:[#allocation3 + $0x4] sm:$0x1] %v12151_v2  ;;  %s8089_s21 = sshll.u32 %s12386_s16, 6  ;;  %v232_v6 = vsel %vm9246_vm3, 0, %v231_v4 }
  0x12   : > { %2801 = vst [vmem:[#allocation3 + $0x48] sm:$0xf] %v12151_v2  ;;  %2802 = vst [vmem:[#allocation3 + $0x4c] sm:$0x1] %v12151_v2  ;;  %s9270_s24 = scalar_lea.vmem %s12119_s0, %s8089_s21  ;;  %v234_v9 = vld [vmem:[#allocation2 + $0x10] sm:$0x1] }
  0x13   : > { %vm9263_vm5 = vmand %vm222_vm1, %vm12126_vm4  ;;  %233 = vst [vmem:[#allocation2 + $0x8] sm:$0x1] %v232_v6  ;;  %v212_v10 = vld [vmem:[%s9270_s24] sm:$0xff]  ;;  %v213_v11 = vld [vmem:[%s9270_s24 + $0x8] sm:$0xff]  ;;  %v235_v12 = vsel %vm9246_vm3, 0, %v234_v9  ;;  %8293 = vmatpush3.bf16.msra.mxu0 %v8921_v1  ;;  %vm12124_vm10 = vcmask 261120  }
  0x14   : > { %v258_v8 = vsel %vm9263_vm5, 0, %v257_v5  ;;  %v8092_v13 = vpack.c.bf16 %v212_v10, %v212_v10  ;;  %v214_v14 = vld [vmem:[%s9270_s24 + $0x10] sm:$0xff]  ;;  %236 = vst [vmem:[#allocation2 + $0x10] sm:$0x1] %v235_v12  ;;  %v237_v15 = vld [vmem:[#allocation2 + $0x18] sm:$0x1]  ;;  %v8093_v16 = vpack.c.bf16 %v213_v11, %v213_v11  ;;  %vm9291_vm6 = vmand %vm220_vm0, %vm12126_vm4  ;;  %8302 = vmatprep.subr.bf16.mxu0 %v9300_v42 }
  0x15   : > { %259 = vst [vmem:[#allocation2 + $0xc] sm:$0x1] %v258_v8  ;;  %v238_v17 = vsel %vm9246_vm3, 0, %v237_v15  ;;  %v260_v18 = vld [vmem:[#allocation2 + $0x14] sm:$0x1]  ;;  %v8094_v20 = vpack.c.bf16 %v214_v14, %v214_v14  ;;  %v215_v47 = vld [vmem:[%s9270_s24 + $0x18] sm:$0xff] }
  0x16   : > { %v263_v19 = vld [vmem:[#allocation2 + $0x1c] sm:$0x1]  ;;  %v314_v21 = vshrl.u32 %v8092_v13, 16  ;;  %v317_v22 = vshll.u32 %v8092_v13, 16  ;;  %239 = vst [vmem:[#allocation2 + $0x18] sm:$0x1] %v238_v17  ;;  %v8095_v53 = vpack.c.bf16 %v215_v47, %v215_v47 }
  0x17   : > { %v261_v23 = vsel %vm9263_vm5, 0, %v260_v18  ;;  %v264_v24 = vsel %vm9263_vm5, 0, %v263_v19  ;;  %v9285_v25 = vld [vmem:[#allocation2] sm:$0xf]  ;;  %v322_v26 = vshrl.u32 %v8093_v16, 16  ;;  %v325_v27 = vshll.u32 %v8093_v16, 16 }
  0x18   : > { %262 = vst [vmem:[#allocation2 + $0x14] sm:$0x1] %v261_v23  ;;  %265 = vst [vmem:[#allocation2 + $0x1c] sm:$0x1] %v264_v24  ;;  %v316_v28 = vrot.slane %v314_v21, 7  ;;  %v467_v29 = vshrl.u32 %v9285_v25, 16 }
  0x19   : > { %v470_v30 = vshll.u32 %v9285_v25, 16  ;;  %v9295_v33 = vld [vmem:[#allocation2 + $0x4] sm:$0x1]  ;;  %v324_v34 = vrot.slane %v322_v26, 7  ;;  %v330_v35 = vshrl.u32 %v8094_v20, 16  ;;  %v333_v36 = vshll.u32 %v8094_v20, 16 }
  0x1a   : > { %v395_v32 = vld [vmem:[#allocation2 + $0x8] sm:$0xf]  ;;  %v319_v37 = vor.u32 %v317_v22, %v316_v28  ;;  %v320_v38 = vrot.slane %v316_v28, 4  ;;  %vm463_vm7 = vsmask.f32 3328  ;;  %v469_v40 = vrot.slane %v467_v29, 4 }
  0x1b   : > { %v472_v41 = vrot.slane %v470_v30, 5  ;;  %v327_v43 = vor.u32 %v325_v27, %v324_v34  ;;  %v328_v44 = vrot.slane %v324_v34, 4  ;;  %v332_v45 = vrot.slane %v330_v35, 7  ;;  %v401_v46 = vld [vmem:[#allocation2 + $0x10] sm:$0xf]  ;;  %v216_v50 = vld [vmem:[%s9270_s24 + $0x20] sm:$0xff] }
  0x1c   : > { %v398_v39 = vld [vmem:[#allocation2 + $0xc] sm:$0x1]  ;;  %v396_v48 = vsel %vm9291_vm6, %v319_v37, %v395_v32  ;;  %v240_v51 = vld [vmem:[#allocation2 + $0x20] sm:$0x1]  ;;  %v243_v52 = vld [vmem:[#allocation2 + $0x28] sm:$0x1]  ;;  %v9316_v1 = vpack.c.bf16 %v216_v50, %v216_v50 }
  0x1d   : > { %v399_v49 = vsel %vm9246_vm3, %v320_v38, %v398_v39  ;;  %397 = vst [vmem:[#allocation2 + $0x8] sm:$0xf] %v396_v48  ;;  %v335_v54 = vor.u32 %v333_v36, %v332_v45  ;;  %v336_v55 = vrot.slane %v332_v45, 4  ;;  %v402_v56 = vsel %vm9291_vm6, %v327_v43, %v401_v46  ;;  %v407_v57 = vld [vmem:[#allocation2 + $0x18] sm:$0xf]  ;;  %v217_v10 = vld [vmem:[%s9270_s24 + $0x28] sm:$0xff] }
  0x1e   : > { %400 = vst [vmem:[#allocation2 + $0xc] sm:$0x1] %v399_v49  ;;  %v241_v58 = vsel %vm9246_vm3, 0, %v240_v51  ;;  %v266_v59 = vld [vmem:[#allocation2 + $0x24] sm:$0x1]  ;;  %v473_v60 = vor.u32 %v472_v41, %v469_v40  ;;  %v476_v61 = vshll.u32 %v9295_v33, 16  ;;  %v9332_v18 = vpack.c.bf16 %v217_v10, %v217_v10 }
  0x1f   : > { %403 = vst [vmem:[#allocation2 + $0x10] sm:$0xf] %v402_v56  ;;  %v404_v62 = vld [vmem:[#allocation2 + $0x14] sm:$0x1]  ;;  %v410_v63 = vld [vmem:[#allocation2 + $0x1c] sm:$0x1]  ;;  %v408_v5 = vsel %vm9291_vm6, %v335_v54, %v407_v57 }
  0x20   : > { %242 = vst [vmem:[#allocation2 + $0x20] sm:$0x1] %v241_v58  ;;  %v244_v0 = vsel %vm9246_vm3, 0, %v243_v52  ;;  %v405_v4 = vsel %vm9246_vm3, %v328_v44, %v404_v62  ;;  %v411_v6 = vsel %vm9246_vm3, %v336_v55, %v410_v63  ;;  %v267_v8 = vsel %vm9263_vm5, 0, %v266_v59  ;;  %v269_v9 = vld [vmem:[#allocation2 + $0x2c] sm:$0x1] }
  0x21   : > { %245 = vst [vmem:[#allocation2 + $0x28] sm:$0x1] %v244_v0  ;;  %406 = vst [vmem:[#allocation2 + $0x14] sm:$0x1] %v405_v4  ;;  %v270_v11 = vsel %vm9263_vm5, 0, %v269_v9  ;;  %v338_v12 = vshrl.u32 %v8095_v53, 16 }
  0x22   : > { %409 = vst [vmem:[#allocation2 + $0x18] sm:$0xf] %v408_v5  ;;  %412 = vst [vmem:[#allocation2 + $0x1c] sm:$0x1] %v411_v6  ;;  %v341_v13 = vshll.u32 %v8095_v53, 16  ;;  %v346_v15 = vshrl.u32 %v9316_v1, 16 }
  0x23   : > { %268 = vst [vmem:[#allocation2 + $0x24] sm:$0x1] %v267_v8  ;;  %v246_v14 = vld [vmem:[#allocation2 + $0x30] sm:$0x1]  ;;  %vm464_vm8 = vsmask.f32 7440 }
  0x24   : > { %271 = vst [vmem:[#allocation2 + $0x2c] sm:$0x1] %v270_v11  ;;  %v247_v16 = vsel %vm9246_vm3, 0, %v246_v14  ;;  %v249_v17 = vld [vmem:[#allocation2 + $0x38] sm:$0x1]  ;;  %v340_v19 = vrot.slane %v338_v12, 7  ;;  %vm9351_vm9 = vmor %vm463_vm7, %vm464_vm8 }
  0x25   : > { %248 = vst [vmem:[#allocation2 + $0x30] sm:$0x1] %v247_v16  ;;  %v250_v20 = vsel %vm9246_vm3, 0, %v249_v17  ;;  %v272_v21 = vld [vmem:[#allocation2 + $0x34] sm:$0x1]  ;;  %v9336_v23 = vrot.slane %v473_v60, 4 }
  0x26   : > { %v275_v22 = vld [vmem:[#allocation2 + $0x3c] sm:$0x1]  ;;  %v9338_v24 = vrot.slane %v476_v61, 5  ;;  %251 = vst [vmem:[#allocation2 + $0x38] sm:$0x1] %v250_v20  ;;  %v273_v26 = vsel %vm9263_vm5, 0, %v272_v21  ;;  %v343_v30 = vor.u32 %v341_v13, %v340_v19 }
  0x27   : > { %v276_v27 = vsel %vm9263_vm5, 0, %v275_v22  ;;  %v9344_v28 = vld [vmem:[#allocation2 + $0x8] sm:$0xf]  ;;  %v9346_v29 = vld [vmem:[#allocation2 + $0xc] sm:$0x1]  ;;  %v348_v32 = vrot.slane %v346_v15, 7 }
  0x28   : > { %v349_v34 = vshll.u32 %v9316_v1, 16  ;;  %274 = vst [vmem:[#allocation2 + $0x34] sm:$0x1] %v273_v26  ;;  %277 = vst [vmem:[#allocation2 + $0x3c] sm:$0x1] %v276_v27  ;;  %v12194_v35 = vmov 0  ;;  %v479_v53 = vsel %vm9351_vm9, %v9336_v23, %v9338_v24 }
  0x29   : > { %v12195_v35 = vsel %vm9351_vm9, 4294967295, %v12194_v35  ;;  %v481_v36 = vshrl.u32 %v9344_v28, 16  ;;  %v484_v37 = vshll.u32 %v9344_v28, 16  ;;  %v490_v38 = vshll.u32 %v9346_v29, 16  ;;  %v9358_v39 = vld [vmem:[#allocation2 + $0x10] sm:$0xf] }
  0x2a   : > { %v354_v40 = vshrl.u32 %v9332_v18, 16  ;;  %v495_v41 = vshrl.u32 %v9358_v39, 16  ;;  %v498_v43 = vshll.u32 %v9358_v39, 16  ;;  %v344_v44 = vrot.slane %v340_v19, 4  ;;  %v413_v46 = vld [vmem:[#allocation2 + $0x20] sm:$0xf] }
  0x2b   : > { %v352_v45 = vrot.slane %v348_v32, 4  ;;  %v483_v47 = vrot.slane %v481_v36, 4  ;;  %v486_v48 = vrot.slane %v484_v37, 5  ;;  %v492_v49 = vrot.slane %v490_v38, 5  ;;  %v9363_v50 = vld [vmem:[#allocation2 + $0x18] sm:$0xf] }
  0x2c   : > { %v414_v51 = vsel %vm9291_vm6, %v343_v30, %v413_v46  ;;  %v218_v52 = vld [vmem:[%s9270_s24 + $0x30] sm:$0xff]  ;;  %v9374_v55 = vld [vmem:[#allocation2 + $0x1c] sm:$0x1]  ;;  %v497_v56 = vrot.slane %v495_v41, 4  ;;  %v500_v57 = vrot.slane %v498_v43, 5  ;;  %v351_v58 = vor.u32 %v349_v34, %v348_v32  ;;  %v9511_v3 = vld [vmem:[%s12120_s1 + $0x40] sm:$0xff]  }
  0x2d   : > { %v9372_v54 = vld [vmem:[#allocation2 + $0x14] sm:$0x1]  ;;  %415 = vst [vmem:[#allocation2 + $0x20] sm:$0xf] %v414_v51  ;;  %v487_v59 = vor.u32 %v486_v48, %v483_v47  ;;  %v509_v61 = vshrl.u32 %v9363_v50, 16  ;;  %v512_v62 = vshll.u32 %v9363_v50, 16  ;;  %v8098_v5 = vpack.c.bf16 %v218_v52, %v218_v52 }
  0x2e   : > { %v504_v60 = vshll.u32 %v9372_v54, 16  ;;  %v416_v63 = vld [vmem:[#allocation2 + $0x24] sm:$0x1]  ;;  %v501_v0 = vor.u32 %v500_v57, %v497_v56  ;;  %v518_v1 = vshll.u32 %v9374_v55, 16  ;;  %v419_v4 = vld [vmem:[#allocation2 + $0x28] sm:$0xf] }
  0x2f   : > { %v357_v6 = vshll.u32 %v9332_v18, 16  ;;  %v488_v8 = vrot.slane %v487_v59, 4  ;;  %v511_v10 = vrot.slane %v509_v61, 4  ;;  %v514_v11 = vrot.slane %v512_v62, 5  ;;  %v422_v12 = vld [vmem:[#allocation2 + $0x2c] sm:$0x1] }
  0x30   : > { %v506_v9 = vrot.slane %v504_v60, 5  ;;  %v502_v13 = vrot.slane %v501_v0, 4  ;;  %v520_v14 = vrot.slane %v518_v1, 5  ;;  %v417_v15 = vsel %vm9246_vm3, %v344_v44, %v416_v63  ;;  %v425_v21 = vld [vmem:[#allocation2 + $0x30] sm:$0xf]  ;;  %v8923_v52 = vld [vmem:[%s12120_s1 + $0x8] sm:$0xff]  }
  0x31   : > { %v420_v16 = vsel %vm9291_vm6, %v351_v58, %v419_v4  ;;  %v493_v17 = vsel %vm9351_vm9, %v488_v8, %v492_v49  ;;  %v515_v19 = vor.u32 %v514_v11, %v511_v10  ;;  %418 = vst [vmem:[#allocation2 + $0x24] sm:$0x1] %v417_v15  ;;  %v423_v18 = vsel %vm9246_vm3, %v352_v45, %v422_v12  ;;  %v428_v22 = vld [vmem:[#allocation2 + $0x34] sm:$0x1]  ;;  %v431_v45 = vld [vmem:[#allocation2 + $0x38] sm:$0xf] }
  0x32   : > { %421 = vst [vmem:[#allocation2 + $0x28] sm:$0xf] %v420_v16  ;;  %v356_v20 = vrot.slane %v354_v40, 7  ;;  %v7547_v23 = vcombine.low %v479_v53, %v493_v17  ;;  %424 = vst [vmem:[#allocation2 + $0x2c] sm:$0x1] %v423_v18  ;;  %v362_v24 = vshrl.u32 %v8098_v5, 16  ;;  %v507_v27 = vsel %vm9351_vm9, %v502_v13, %v506_v9 }
  0x33   : > { %v365_v26 = vshll.u32 %v8098_v5, 16  ;;  %v516_v30 = vrot.slane %v515_v19, 4  ;;  %v434_v51 = vld [vmem:[#allocation2 + $0x3c] sm:$0x1]  ;;  %vm817_vm11 = vcmask 1042432   ;;  %vm818_vm12 = vcmask 1046532  }
  0x34   : > { %v9391_v32 = vld [vmem:[#allocation2 + $0x20] sm:$0xf]  ;;  %v359_v34 = vor.u32 %v357_v6, %v356_v20  ;;  %v360_v36 = vrot.slane %v356_v20, 4  ;;  %8294 = vmatprep.mubr.msk.bf16.mxu0 %vm12124_vm10, %v7547_v23  ;;  %v364_v40 = vrot.slane %v362_v24, 7  ;;  %v219_v15 = vld [vmem:[%s9270_s24 + $0x38] sm:$0xff]  ;;  %vm9468_vm13 = vmor %vm817_vm11, %vm818_vm12  ;;  %vm12130_vm14 = vmmov 0  }
  0x35   : > { %v523_v37 = vshrl.u32 %v9391_v32, 16  ;;  %v526_v38 = vshll.u32 %v9391_v32, 16  ;;  %v521_v41 = vsel %vm9351_vm9, %v516_v30, %v520_v14  ;;  %v8929_v31 = vld [vmem:[%s12120_s1 + $0x30] sm:$0xff]   ;;  %vm12125_vm1 = vcmask 523264   ;;  %s8090_s7 = sshll.u32 %s12386_s16, 7  ;;  %s9196_s11 = smov 96  }
  0x36   : > { %v426_v43 = vsel %vm9291_vm6, %v359_v34, %v425_v21  ;;  %v429_v44 = vsel %vm9246_vm3, %v360_v36, %v428_v22  ;;  %v7548_v46 = vcombine.low %v507_v27, %v521_v41  ;;  %v367_v49 = vor.u32 %v365_v26, %v364_v40  ;;  %s11536_s10 = scalar_lea.vmem %s12122_s3, %s8090_s7  ;;  %s9197_s12 = smov 64  }
  0x37   : > { %v525_v47 = vrot.slane %v523_v37, 4  ;;  %v528_v48 = vrot.slane %v526_v38, 5  ;;  %427 = vst [vmem:[#allocation2 + $0x30] sm:$0xf] %v426_v43  ;;  %430 = vst [vmem:[#allocation2 + $0x34] sm:$0x1] %v429_v44  ;;  %v8099_v27 = vpack.c.bf16 %v219_v15, %v219_v15 }
  0x38   : > { %v368_v53 = vrot.slane %v364_v40, 4  ;;  %8295 = vmatmul.mubr.msk.bf16.vlgmr.msra.gmra.mrb[0].mxu0 %vm12124_vm10, %v7548_v46  ;;  %v9408_v57 = vld [vmem:[#allocation2 + $0x24] sm:$0x1]  ;;  %v432_v59 = vsel %vm9291_vm6, %v367_v49, %v431_v45  ;;  %v830_v15 = vrot.slane %v9372_v54, 5  ;;  %s9198_s13 = smov 32   ;;  %s8091_s14 = sshll.u32 %s12386_s16, 4 }
  0x39   : > { %v9406_v56 = vld [vmem:[#allocation2 + $0x28] sm:$0xf]  ;;  %v529_v58 = vor.u32 %v528_v48, %v525_v47  ;;  %8303 = vmatpush3.bf16.msra.mxu0 %v9300_v42  ;;  %v9413_v60 = vld [vmem:[#allocation2 + $0x2c] sm:$0x1]  ;;  %v532_v61 = vshll.u32 %v9408_v57, 16  ;;  %v9424_v42 = vld [vmem:[%s12120_s1 + $0x20] sm:$0xff]   ;;  %s210_s19 = scalar_lea.vmem %s12123_s4, %s8091_s14 }
  0x3a   : > { %v537_v62 = vshrl.u32 %v9406_v56, 16  ;;  %v540_v63 = vshll.u32 %v9406_v56, 16  ;;  %433 = vst [vmem:[#allocation2 + $0x38] sm:$0xf] %v432_v59  ;;  %v435_v0 = vsel %vm9246_vm3, %v368_v53, %v434_v51  ;;  %v546_v1 = vshll.u32 %v9413_v60, 16  ;;  %8304 = vmatprep.subr.bf16.mxu0 %v8923_v52 }
  0x3b   : > { %436 = vst [vmem:[#allocation2 + $0x3c] sm:$0x1] %v435_v0  ;;  %v530_v4 = vrot.slane %v529_v58, 4  ;;  %v534_v5 = vrot.slane %v532_v61, 5  ;;  %v370_v45 = vshrl.u32 %v8099_v27, 16  ;;  %v373_v58 = vshll.u32 %v8099_v27, 16 }
  0x3c   : > { %v539_v6 = vrot.slane %v537_v62, 4  ;;  %v542_v8 = vrot.slane %v540_v63, 5  ;;  %v548_v10 = vrot.slane %v546_v1, 5  ;;  %v252_v48 = vld [vmem:[#allocation2 + $0x40] sm:$0x1]  ;;  %v7558_v0 = vcombine.low %v9358_v39, %v9363_v50 }
  0x3d   : > { %8305 = vmatpush3.bf16.msra.mxu0 %v8923_v52  ;;  %v535_v16 = vsel %vm9351_vm9, %v530_v4, %v534_v5  ;;  %v253_v49 = vsel %vm9246_vm3, 0, %v252_v48  ;;  %v7557_v52 = vcombine.low %v9285_v25, %v9344_v28  ;;  %v372_v53 = vrot.slane %v370_v45, 7  ;;  %v793_v62 = vld [vmem:[#allocation2] sm:$0xe]  ;;  %v794_v63 = vld [vmem:[#allocation2 + $0x8] sm:$0xe] }
  0x3e   : > { %v543_v9 = vor.u32 %v542_v8, %v539_v6  ;;  %v9426_v11 = vld [vmem:[#allocation2 + $0x30] sm:$0xf]  ;;  %v9428_v12 = vld [vmem:[#allocation2 + $0x34] sm:$0x1]  ;;  %8314 = vmatprep.subr.bf16.mxu0 %v9424_v42  ;;  %254 = vst [vmem:[#allocation2 + $0x40] sm:$0x1] %v253_v49  ;;  %v7559_v25 = vcombine.low %v9391_v32, %v9406_v56 }
  0x3f   : > { %v551_v13 = vshrl.u32 %v9426_v11, 16  ;;  %v554_v14 = vshll.u32 %v9426_v11, 16  ;;  %v560_v19 = vshll.u32 %v9428_v12, 16  ;;  %v375_v61 = vor.u32 %v373_v58, %v372_v53  ;;  %v8928_v6 = vld [vmem:[%s12120_s1 + $0x28] sm:$0xff]   ;;  %v796_v50 = vld [vmem:[#allocation2 + $0x18] sm:$0xe] }
  0x40   : > { %v544_v17 = vrot.slane %v543_v9, 4  ;;  %v822_v4 = vrot.slane %v9295_v33, 5  ;;  %v826_v5 = vrot.slane %v9346_v29, 5  ;;  %v7567_v8 = vrot.slane %v793_v62, 9  ;;  %v278_v33 = vld [vmem:[#allocation2 + $0x44] sm:$0x1] }
  0x41   : > { %v9437_v18 = vld [vmem:[#allocation2 + $0x38] sm:$0xf]  ;;  %v553_v20 = vrot.slane %v551_v13, 4  ;;  %v556_v21 = vrot.slane %v554_v14, 5  ;;  %v562_v37 = vrot.slane %v560_v19, 5  ;;  %v7568_v9 = vrot.slane %v794_v63, 9 }
  0x42   : > { %v549_v22 = vsel %vm9351_vm9, %v544_v17, %v548_v10  ;;  %v9441_v23 = vld [vmem:[#allocation2 + $0x3c] sm:$0x1]  ;;  %v565_v24 = vshrl.u32 %v9437_v18, 16  ;;  %v568_v26 = vshll.u32 %v9437_v18, 16  ;;  %v12196_v39 = vmov 0 }
  0x43   : > { %v7549_v30 = vcombine.low %v535_v16, %v549_v22  ;;  %v557_v34 = vor.u32 %v556_v21, %v553_v20  ;;  %v574_v36 = vshll.u32 %v9441_v23, 16  ;;  %v12197_v39 = vsel %vm9468_vm13, 4294967295, %v12196_v39  ;;  %v795_v29 = vld [vmem:[#allocation2 + $0x10] sm:$0xe]  ;;  %v797_v10 = vld [vmem:[#allocation2 + $0x20] sm:$0xe] }
  0x44   : > { %v567_v38 = vrot.slane %v565_v24, 4  ;;  %v570_v40 = vrot.slane %v568_v26, 5  ;;  %v823_v32 = vsel %vm9468_vm13, %v7567_v8, %v822_v4  ;;  %v827_v56 = vsel %vm9468_vm13, %v7568_v9, %v826_v5  ;;  %v798_v13 = vld [vmem:[#allocation2 + $0x28] sm:$0xe]  ;;  %v800_v27 = vld [vmem:[#allocation2 + $0x38] sm:$0xe] }
  0x45   : > { %8298 = vmatprep.mubr.msk.bf16.mxu0 %vm12124_vm10, %v7549_v30  ;;  %v558_v41 = vrot.slane %v557_v34, 4  ;;  %v576_v44 = vrot.slane %v574_v36, 5  ;;  %v437_v1 = vld [vmem:[#allocation2 + $0x40] sm:$0xf]  ;;  %v279_v14 = vsel %vm9263_vm5, 0, %v278_v33  ;;  %v834_v16 = vrot.slane %v9374_v55, 5 }
  0x46   : > { %v571_v43 = vor.u32 %v570_v40, %v567_v38  ;;  %v438_v28 = vsel %vm9291_vm6, %v375_v61, %v437_v1  ;;  %280 = vst [vmem:[#allocation2 + $0x44] sm:$0x1] %v279_v14  ;;  %v7575_v17 = vcombine.low %v823_v32, %v827_v56  ;;  %v7569_v19 = vrot.slane %v795_v29, 9  ;;  %v1094_v36 = vld [vmem:[#allocation2 + $0x8] sm:$0xf]  ;;  %v8930_v45 = vld [vmem:[%s12120_s1 + $0x38] sm:$0xff]  }
  0x47   : > { %v563_v46 = vsel %vm9351_vm9, %v558_v41, %v562_v37  ;;  %439 = vst [vmem:[#allocation2 + $0x40] sm:$0xf] %v438_v28  ;;  %v7570_v20 = vrot.slane %v796_v50, 9  ;;  %v7571_v21 = vrot.slane %v797_v10, 9  ;;  %v838_v22 = vrot.slane %v9408_v57, 5 }
  0x48   : > { %v572_v47 = vrot.slane %v571_v43, 4  ;;  %v7572_v24 = vrot.slane %v798_v13, 9  ;;  %v842_v7 = vrot.slane %v9413_v60, 5  ;;  %v376_v54 = vrot.slane %v372_v53, 4  ;;  %v9513_v48 = vld [vmem:[#allocation2 + $0xc] sm:$0x1] }
  0x49   : > { %v835_v55 = vsel %vm9468_vm13, %v7570_v20, %v834_v16  ;;  %v839_v26 = vsel %vm9468_vm13, %v7571_v21, %v838_v22  ;;  %v846_v40 = vrot.slane %v9428_v12, 5  ;;  %v7574_v41 = vrot.slane %v800_v27, 9  ;;  %v9515_v12 = vld [vmem:[#allocation2 + $0x14] sm:$0x1]  ;;  %v1098_v53 = vld [vmem:[#allocation2 + $0x18] sm:$0xf] }
  0x4a   : > { %v577_v51 = vsel %vm9351_vm9, %v572_v47, %v576_v44  ;;  %v843_v57 = vsel %vm9468_vm13, %v7572_v24, %v842_v7  ;;  %v850_v43 = vrot.slane %v9441_v23, 5  ;;  %v1096_v44 = vld [vmem:[#allocation2 + $0x10] sm:$0xf]  ;;  %v1114_v47 = vshll.u32 %v1094_v36, 16  ;;  %v1100_v28 = vld [vmem:[#allocation2 + $0x20] sm:$0xf] }
  0x4b   : > { %v7550_v59 = vcombine.low %v563_v46, %v577_v51  ;;  %v7577_v38 = vcombine.low %v839_v26, %v843_v57  ;;  %v1111_v46 = vshrl.u32 %v1094_v36, 16  ;;  %v1125_v23 = vshrl.u32 %v1096_v44, 16  ;;  %v8931_v62 = vld [vmem:[#allocation2 + $0x8] ss:$8 sps:$4 sm:$0xff]   ;;  %v9525_v4 = vld [vmem:[#allocation2 + $0x1c] sm:$0x1] }
  0x4c   : > { %v1128_v49 = vshll.u32 %v1096_v44, 16  ;;  %v1120_v1 = vshll.u32 %v9513_v48, 16  ;;  %v1139_v5 = vshrl.u32 %v1098_v53, 16  ;;  %v1142_v8 = vshll.u32 %v1098_v53, 16  ;;  %v1102_v9 = vld [vmem:[#allocation2 + $0x28] sm:$0xf] }
  0x4d   : > { %8299 = vmatmul.mubr.msk.bf16.gmra.mrb[4].mxu0 %vm12124_vm10, %v7550_v59  ;;  %v440_v60 = vld [vmem:[#allocation2 + $0x44] sm:$0x1]  ;;  %v1113_v58 = vrot.slane %v1111_v46, 4  ;;  %v1116_v59 = vrot.slane %v1114_v47, 5  ;;  %v1127_v63 = vrot.slane %v1125_v23, 4  ;;  %v1153_v29 = vshrl.u32 %v1100_v28, 16 }
  0x4e   : > { %8306 = vmatprep.mubr.msk.bf16.mxu0 %vm12124_vm10, %v7557_v52  ;;  %v441_v37 = vsel %vm9246_vm3, %v376_v54, %v440_v60  ;;  %v851_v52 = vsel %vm9468_vm13, %v7574_v41, %v850_v43  ;;  %v1156_v50 = vshll.u32 %v1100_v28, 16  ;;  %v1122_v32 = vrot.slane %v1120_v1, 5  ;;  %v9529_v10 = vld [vmem:[#allocation2 + $0x24] sm:$0x1]  ;;  %v8932_v14 = vld [vmem:[#allocation2 + $0x18] ss:$8 sps:$4 sm:$0xff]  }
  0x4f   : > { %442 = vst [vmem:[#allocation2 + $0x44] sm:$0x1] %v441_v37  ;;  %v1148_v13 = vshll.u32 %v9525_v4, 16  ;;  %v1141_v21 = vrot.slane %v1139_v5, 4  ;;  %v1144_v22 = vrot.slane %v1142_v8, 5  ;;  %v1155_v7 = vrot.slane %v1153_v29, 4 }
  0x50   : > { %v1158_v54 = vrot.slane %v1156_v50, 5  ;;  %v1106_v26 = vld [vmem:[#allocation2 + $0x38] sm:$0xf] }
  0x51   : > { %v1145_v36 = vor.u32 %v1144_v22, %v1141_v21  ;;  %v1150_v37 = vrot.slane %v1148_v13, 5  ;;  %v1198_v46 = vshll.u32 %v1106_v26, 16 }
  0x52   : > { %v1159_v43 = vor.u32 %v1158_v54, %v1155_v7 }
  0x55   : > { %8307 = vmatmul.mubr.msk.bf16.vlgmr.msra.gmra.mrb[0].mxu0 %vm12124_vm10, %v7558_v0  ;;  %v1130_v0 = vrot.slane %v1128_v49, 5 }
  0x56   : > { %8315 = vmatpush3.bf16.msra.mxu0 %v9424_v42  ;;  %8310 = vmatprep.mubr.msk.bf16.mxu0 %vm12124_vm10, %v7559_v25  ;;  %v7560_v42 = vcombine.low %v9426_v11, %v9437_v18  ;;  %v831_v11 = vsel %vm9468_vm13, %v7569_v19, %v830_v15  ;;  %v799_v18 = vld [vmem:[#allocation2 + $0x30] sm:$0xe]  ;;  %v1134_v25 = vshll.u32 %v9515_v12, 16  ;;  %v1167_v15 = vshrl.u32 %v1102_v9, 16 }
  0x57   : > { %8316 = vmatprep.subr.bf16.mxu0 %v8928_v6  ;;  %v7576_v30 = vcombine.low %v831_v11, %v835_v55  ;;  %v7573_v34 = vrot.slane %v799_v18, 9  ;;  %v1131_v33 = vor.u32 %v1130_v0, %v1127_v63  ;;  %v8934_v19 = vld [vmem:[#allocation2 + $0x28] ss:$8 sps:$4 sm:$0xff]   ;;  %v1162_v55 = vshll.u32 %v9529_v10, 16  ;;  %v9536_v18 = vld [vmem:[#allocation2 + $0x2c] sm:$0x1] }
  0x58   : > { %v1136_v56 = vrot.slane %v1134_v25, 5  ;;  %v8936_v11 = vld [vmem:[%s12120_s1 + $0x48] sm:$0xff]   ;;  %v1169_v57 = vrot.slane %v1167_v15, 4  ;;  %v1176_v44 = vshll.u32 %v9536_v18, 16  ;;  %v1160_v63 = vrot.slane %v1159_v43, 4 }
  0x59   : > { %v847_v51 = vsel %vm9468_vm13, %v7573_v34, %v846_v40  ;;  %v1132_v24 = vrot.slane %v1131_v33, 4  ;;  %v1108_v34 = vld [vmem:[#allocation2 + $0x40] sm:$0xf]  ;;  %v1164_v49 = vrot.slane %v1162_v55, 5  ;;  %v1200_v25 = vrot.slane %v1198_v46, 5 }
  0x5a   : > { %8317 = vmatpush3.bf16.msra.mxu0 %v8928_v6  ;;  %v7578_v61 = vcombine.low %v847_v51, %v851_v52  ;;  %v1117_v6 = vor.u32 %v1116_v59, %v1113_v58  ;;  %v1209_v47 = vshrl.u32 %v1108_v34, 16  ;;  %v1212_v23 = vshll.u32 %v1108_v34, 16  ;;  %v8937_v51 = vld [vmem:[%s12120_s1 + $0x50] sm:$0xff]  }
  0x5b   : > { %8326 = vmatprep.subr.bf16.mxu0 %v8929_v31  ;;  %v1137_v41 = vsel %vm9351_vm9, %v1132_v24, %v1136_v56  ;;  %v1146_v59 = vrot.slane %v1145_v36, 4  ;;  %v1178_v0 = vrot.slane %v1176_v44, 5  ;;  %v1165_v50 = vsel %vm9351_vm9, %v1160_v63, %v1164_v49  ;;  %v1340_v36 = vld [vmem:[#allocation2 + $0x30] sm:$0xe]  ;;  %v1636_v63 = vld [vmem:[#allocation2 + $0x18] sm:$0xf] }
  0x5c   : > { %v1118_v20 = vrot.slane %v1117_v6, 4  ;;  %v1211_v28 = vrot.slane %v1209_v47, 4  ;;  %v1214_v5 = vrot.slane %v1212_v23, 5  ;;  %v1369_v43 = vrot.slane %v9525_v4, 5 }
  0x5d   : > { %8311 = vmatmul.mubr.msk.bf16.gmra.mrb[4].mxu0 %vm12124_vm10, %v7560_v42  ;;  %v1170_v42 = vshll.u32 %v1102_v9, 16  ;;  %v1151_v33 = vsel %vm9351_vm9, %v1146_v59, %v1150_v37  ;;  %v1373_v46 = vrot.slane %v9529_v10, 5  ;;  %v1377_v23 = vrot.slane %v9536_v18, 5  ;;  %v1634_v59 = vld [vmem:[#allocation2 + $0x10] sm:$0xf] }
  0x5e   : > { %8318 = vmatprep.mubr.msk.bf16.mxu0 %vm12124_vm10, %v7575_v17  ;;  %v1123_v40 = vsel %vm9351_vm9, %v1118_v20, %v1122_v32  ;;  %v1215_v56 = vor.u32 %v1214_v5, %v1211_v28  ;;  %v8938_v20 = vld [vmem:[%s12120_s1 + $0x58] sm:$0xff]   ;;  %v7610_v49 = vrot.slane %v1340_v36, 9  ;;  %v1651_v5 = vshrl.u32 %v1634_v59, 16 }
  0x5f   : > { %v1172_v27 = vrot.slane %v1170_v42, 5 }
  0x60   : > { %v1216_v7 = vrot.slane %v1215_v56, 4  ;;  %v1653_v56 = vrot.slane %v1651_v5, 4 }
  0x61   : > { %v1173_v52 = vor.u32 %v1172_v27, %v1169_v57  ;;  %v1337_v57 = vld [vmem:[#allocation2 + $0x18] sm:$0xe]  ;;  %v1338_v27 = vld [vmem:[#allocation2 + $0x20] sm:$0xe] }
  0x63   : > { %v1174_v6 = vrot.slane %v1173_v52, 4  ;;  %v1341_v52 = vld [vmem:[#allocation2 + $0x38] sm:$0xe] }
  0x65   : > { %8319 = vmatmul.mubr.msk.bf16.vlgmr.msra.gmra.mrb[0].mxu0 %vm12124_vm10, %v7576_v30  ;;  %v1179_v15 = vsel %vm9351_vm9, %v1174_v6, %v1178_v0  ;;  %v1654_v6 = vshll.u32 %v1634_v59, 16 }
  0x66   : > { %8327 = vmatpush3.bf16.msra.mxu0 %v8929_v31  ;;  %8322 = vmatprep.mubr.msk.bf16.mxu0 %vm12124_vm10, %v7577_v38  ;;  %v1104_v31 = vld [vmem:[#allocation2 + $0x30] sm:$0xf]  ;;  %v9538_v38 = vld [vmem:[#allocation2 + $0x34] sm:$0x1] }
  0x67   : > { %8328 = vmatprep.subr.bf16.mxu0 %v8930_v45  ;;  %v1181_v16 = vshrl.u32 %v1104_v31, 16  ;;  %v1184_v17 = vshll.u32 %v1104_v31, 16  ;;  %v1190_v58 = vshll.u32 %v9538_v38, 16  ;;  %v9554_v31 = vld [vmem:[#allocation2 + $0x44] sm:$0x1] }
  0x68   : > { %v1218_v13 = vshll.u32 %v9554_v31, 16  ;;  %v1389_v28 = vrot.slane %v9554_v31, 5 }
  0x69   : > { %v1183_v60 = vrot.slane %v1181_v16, 4  ;;  %v1186_v30 = vrot.slane %v1184_v17, 5  ;;  %v1192_v9 = vrot.slane %v1190_v58, 5  ;;  %v1336_v16 = vld [vmem:[#allocation2 + $0x10] sm:$0xe]  ;;  %v7596_v17 = vcombine.low %v1151_v33, %v1165_v50 }
  0x6a   : > { %8329 = vmatpush3.bf16.msra.mxu0 %v8930_v45  ;;  %v1195_v45 = vshrl.u32 %v1106_v26, 16  ;;  %v1220_v54 = vrot.slane %v1218_v13, 5  ;;  %v7606_v55 = vrot.slane %v1336_v16, 9  ;;  %v1365_v26 = vrot.slane %v9515_v12, 5  ;;  %v1638_v50 = vld [vmem:[#allocation2 + $0x20] sm:$0xf] }
  0x6b   : > { %8338 = vmatprep.subr.bf16.mxu0 %v9511_v3  ;;  %v1187_v53 = vor.u32 %v1186_v30, %v1183_v60  ;;  %v8939_v60 = vld [vmem:[%s12120_s1 + $0x60] sm:$0xff]   ;;  %v1339_v30 = vld [vmem:[#allocation2 + $0x28] sm:$0xe]  ;;  %v1665_v33 = vshrl.u32 %v1636_v63, 16  ;;  %v1656_v13 = vrot.slane %v1654_v6, 5 }
  0x6c   : > { %v1197_v1 = vrot.slane %v1195_v45, 4  ;;  %v1366_v37 = vsel %vm9468_vm13, %v7606_v55, %v1365_v26  ;;  %v7608_v45 = vrot.slane %v1338_v27, 9  ;;  %v7609_v47 = vrot.slane %v1339_v30, 9  ;;  %v1642_v16 = vld [vmem:[#allocation2 + $0x30] sm:$0xf]  ;;  %v8947_v6 = vld [vmem:[%s12120_s1 + $0x80] sm:$0xff]  }
  0x6d   : > { %8323 = vmatmul.mubr.msk.bf16.gmra.mrb[4].mxu0 %vm12124_vm10, %v7578_v61  ;;  %v9552_v61 = vld [vmem:[#allocation2 + $0x3c] sm:$0x1]  ;;  %v1188_v8 = vrot.slane %v1187_v53, 4  ;;  %v1342_v53 = vld [vmem:[#allocation2 + $0x40] sm:$0xe]  ;;  %v1707_v27 = vshrl.u32 %v1642_v16, 16 }
  0x6e   : > { %8330 = vmatprep.mubr.msk.bf16.mxu0 %vm12124_vm10, %v8931_v62  ;;  %v7595_v62 = vcombine.low %v1123_v40, %v1137_v41  ;;  %v1204_v29 = vshll.u32 %v9552_v61, 16  ;;  %v1201_v32 = vor.u32 %v1200_v25, %v1197_v1  ;;  %v7607_v41 = vrot.slane %v1337_v57, 9  ;;  %v9625_v30 = vld [vmem:[#allocation2 + $0x24] sm:$0x1] }
  0x6f   : > { %v1193_v42 = vsel %vm9351_vm9, %v1188_v8, %v1192_v9  ;;  %v1374_v58 = vsel %vm9468_vm13, %v7608_v45, %v1373_v46  ;;  %v1378_v10 = vsel %vm9468_vm13, %v7609_v47, %v1377_v23  ;;  %v1385_v1 = vrot.slane %v9552_v61, 5  ;;  %v9609_v8 = vld [vmem:[%s12120_s1 + $0x70] sm:$0xff]   ;;  %v1648_v23 = vld [vmem:[#allocation2 + $0x48] sm:$0xf] }
  0x70   : > { %v7597_v22 = vcombine.low %v1179_v15, %v1193_v42  ;;  %v1202_v24 = vrot.slane %v1201_v32, 4  ;;  %v1370_v4 = vsel %vm9468_vm13, %v7607_v41, %v1369_v43  ;;  %v7612_v25 = vrot.slane %v1342_v53, 9  ;;  %v9611_v9 = vld [vmem:[#allocation2 + $0x14] sm:$0x1]  ;;  %v8941_v32 = vld [vmem:[#allocation2 + $0x10] ss:$8 sps:$4 sm:$0xff]  }
  0x71   : > { %v9618_v42 = vld [vmem:[#allocation2 + $0x1c] sm:$0x1]  ;;  %v1646_v43 = vld [vmem:[#allocation2 + $0x40] sm:$0xf]  ;;  %v1688_v59 = vshll.u32 %v9625_v30, 16  ;;  %v1752_v5 = vshll.u32 %v1648_v23, 16 }
  0x72   : > { %v1390_v31 = vsel %vm9468_vm13, %v7612_v25, %v1389_v28  ;;  %v1674_v57 = vshll.u32 %v9618_v42, 16  ;;  %v9634_v53 = vld [vmem:[#allocation2 + $0x3c] sm:$0x1]  ;;  %v1738_v25 = vshll.u32 %v1646_v43, 16  ;;  %v1749_v28 = vshrl.u32 %v1648_v23, 16 }
  0x75   : > { %8331 = vmatmul.mubr.msk.bf16.vlgmr.msra.gmra.mrb[0].mxu0 %vm12124_vm10, %v8932_v14  ;;  %v1335_v14 = vld [vmem:[#allocation2 + $0x8] sm:$0xe] }
  0x76   : > { %8339 = vmatpush3.bf16.msra.mxu0 %v9511_v3  ;;  %8334 = vmatprep.mubr.msk.bf16.mxu0 %vm12124_vm10, %v8934_v19  ;;  %v8935_v3 = vld [vmem:[#allocation2 + $0x38] ss:$8 sps:$4 sm:$0xff]   ;;  %v1206_v19 = vrot.slane %v1204_v29, 5  ;;  %v7605_v21 = vrot.slane %v1335_v14, 9  ;;  %v1668_v29 = vshll.u32 %v1636_v63, 16 }
  0x77   : > { %8340 = vmatprep.subr.bf16.mxu0 %v8936_v11  ;;  %v1640_v14 = vld [vmem:[#allocation2 + $0x28] sm:$0xf] }
  0x78   : > { %v1207_v34 = vsel %vm9351_vm9, %v1202_v24, %v1206_v19  ;;  %v1667_v19 = vrot.slane %v1665_v33, 4  ;;  %v1679_v24 = vshrl.u32 %v1638_v50, 16 }
  0x7a   : > { %8341 = vmatpush3.bf16.msra.mxu0 %v8936_v11  ;;  %v1361_v11 = vrot.slane %v9513_v48, 5  ;;  %v1221_v48 = vsel %vm9351_vm9, %v1216_v7, %v1220_v54  ;;  %v1682_v7 = vshll.u32 %v1638_v50, 16  ;;  %v1693_v54 = vshrl.u32 %v1640_v14, 16  ;;  %v8945_v50 = vld [vmem:[#allocation2 + $0x40] ss:$8 sps:$4 sm:$0xff]  }
  0x7b   : > { %8350 = vmatprep.subr.bf16.mxu0 %v8937_v51  ;;  %v7598_v40 = vcombine.low %v1207_v34, %v1221_v48  ;;  %v9627_v34 = vld [vmem:[#allocation2 + $0x2c] sm:$0x1]  ;;  %v1710_v48 = vshll.u32 %v1642_v16, 16  ;;  %v1681_v41 = vrot.slane %v1679_v24, 4 }
  0x7c   : > { %v1362_v12 = vsel %vm9468_vm13, %v7605_v21, %v1361_v11  ;;  %v1644_v21 = vld [vmem:[#allocation2 + $0x38] sm:$0xf]  ;;  %v1696_v11 = vshll.u32 %v1640_v14, 16  ;;  %v1684_v45 = vrot.slane %v1682_v7, 5  ;;  %v1695_v46 = vrot.slane %v1693_v54, 4 }
  0x7d   : > { %8335 = vmatmul.mubr.msk.bf16.gmra.mrb[4].mxu0 %vm12124_vm10, %v8935_v3  ;;  %v7613_v44 = vcombine.low %v1362_v12, %v1366_v37  ;;  %v7611_v3 = vrot.slane %v1341_v52, 9  ;;  %v1721_v36 = vshrl.u32 %v1644_v21, 16  ;;  %v1724_v12 = vshll.u32 %v1644_v21, 16  ;;  %v8944_v37 = vld [vmem:[#allocation2 + $0x30] ss:$8 sps:$4 sm:$0xff]  }
  0x7e   : > { %8342 = vmatprep.mubr.msk.bf16.mxu0 %vm12124_vm10, %v7595_v62  ;;  %v8940_v62 = vld [vmem:[%s12120_s1 + $0x68] sm:$0xff]   ;;  %v1698_v47 = vrot.slane %v1696_v11, 5  ;;  %v9632_v52 = vld [vmem:[#allocation2 + $0x34] sm:$0x1] }
  0x7f   : > { %v1386_v61 = vsel %vm9468_vm13, %v7611_v3, %v1385_v1  ;;  %v9652_v54 = vld [vmem:[#allocation2 + $0x4c] sm:$0x1] }
  0x80   : > { %v7616_v15 = vcombine.low %v1386_v61, %v1390_v31  ;;  %v1699_v63 = vor.u32 %v1698_v47, %v1695_v46  ;;  %v1716_v31 = vshll.u32 %v9632_v52, 16  ;;  %v8948_v47 = vld [vmem:[%s12120_s1 + $0x88] sm:$0xff]  }
  0x85   : > { %8343 = vmatmul.mubr.msk.bf16.vlgmr.msra.gmra.mrb[0].mxu0 %vm12124_vm10, %v7596_v17  ;;  %v1660_v17 = vshll.u32 %v9611_v9, 16 }
  0x86   : > { %8351 = vmatpush3.bf16.msra.mxu0 %v8937_v51  ;;  %8346 = vmatprep.mubr.msk.bf16.mxu0 %vm12124_vm10, %v7597_v22  ;;  %v1381_v51 = vrot.slane %v9538_v38, 5  ;;  %v7614_v38 = vcombine.low %v1370_v4, %v1374_v58  ;;  %v1657_v22 = vor.u32 %v1656_v13, %v1653_v56  ;;  %v1709_v4 = vrot.slane %v1707_v27, 4 }
  0x87   : > { %8352 = vmatprep.subr.bf16.mxu0 %v8938_v20  ;;  %v1662_v55 = vrot.slane %v1660_v17, 5  ;;  %v1712_v58 = vrot.slane %v1710_v48, 5  ;;  %v1700_v13 = vrot.slane %v1699_v63, 4  ;;  %v1740_v17 = vrot.slane %v1738_v25, 5 }
  0x88   : > { %v1382_v18 = vsel %vm9468_vm13, %v7610_v49, %v1381_v51  ;;  %v1676_v51 = vrot.slane %v1674_v57, 5 }
  0x89   : > { %v7615_v0 = vcombine.low %v1378_v10, %v1382_v18  ;;  %v1723_v10 = vrot.slane %v1721_v36, 4  ;;  %v1726_v18 = vrot.slane %v1724_v12, 5  ;;  %v1713_v61 = vor.u32 %v1712_v58, %v1709_v4  ;;  %v1875_v12 = vld [vmem:[#allocation2 + $0x10] sm:$0xe] }
  0x8a   : > { %8353 = vmatpush3.bf16.msra.mxu0 %v8938_v20  ;;  %v1670_v20 = vrot.slane %v1668_v29, 5  ;;  %v1730_v29 = vshll.u32 %v9634_v53, 16  ;;  %v7643_v23 = vrot.slane %v1875_v12, 9  ;;  %v1905_v4 = vrot.slane %v9618_v42, 5  ;;  %v1878_v42 = vld [vmem:[#allocation2 + $0x28] sm:$0xe] }
  0x8b   : > { %8362 = vmatprep.subr.bf16.mxu0 %v8939_v60  ;;  %v1727_v33 = vor.u32 %v1726_v18, %v1723_v10  ;;  %v1714_v21 = vrot.slane %v1713_v61, 4  ;;  %v1877_v18 = vld [vmem:[#allocation2 + $0x20] sm:$0xe]  ;;  %v7646_v25 = vrot.slane %v1878_v42, 9 }
  0x8c   : > { %v1671_v26 = vor.u32 %v1670_v20, %v1667_v19  ;;  %v1751_v19 = vrot.slane %v1749_v28, 4  ;;  %v1754_v20 = vrot.slane %v1752_v5, 5  ;;  %v1732_v7 = vrot.slane %v1730_v29, 5 }
  0x8d   : > { %8347 = vmatmul.mubr.msk.bf16.gmra.mrb[4].mxu0 %vm12124_vm10, %v7598_v40  ;;  %v1658_v40 = vrot.slane %v1657_v22, 4  ;;  %v1718_v22 = vrot.slane %v1716_v31, 5  ;;  %v1728_v24 = vrot.slane %v1727_v33, 4  ;;  %v7645_v63 = vrot.slane %v1877_v18, 9 }
  0x8e   : > { %8354 = vmatprep.mubr.msk.bf16.mxu0 %vm12124_vm10, %v7613_v44  ;;  %v8946_v44 = vld [vmem:[%s12120_s1 + $0x78] sm:$0xff]   ;;  %v1672_v49 = vrot.slane %v1671_v26, 4  ;;  %v1755_v27 = vor.u32 %v1754_v20, %v1751_v19  ;;  %v1913_v28 = vrot.slane %v9627_v34, 5  ;;  %v1921_v31 = vrot.slane %v9634_v53, 5 }
  0x8f   : > { %v1663_v3 = vsel %vm9351_vm9, %v1658_v40, %v1662_v55  ;;  %v1719_v48 = vsel %vm9351_vm9, %v1714_v21, %v1718_v22  ;;  %v1733_v36 = vsel %vm9351_vm9, %v1728_v24, %v1732_v7  ;;  %v9190_v20 = vmov 0.0|0.0  }
  0x90   : > { %v1677_v1 = vsel %vm9351_vm9, %v1672_v49, %v1676_v51  ;;  %v1901_v49 = vrot.slane %v9611_v9, 5  ;;  %v1914_v29 = vsel %vm9468_vm13, %v7646_v25, %v1913_v28  ;;  %8532 = vmatprep.subr.bf16.mxu1 %v9190_v20  ;;  %v2196_v22 = vlaneseq }
  0x95   : > { %8355 = vmatmul.mubr.msk.bf16.vlgmr.msra.gmra.mrb[0].mxu0 %vm12124_vm10, %v7614_v38  ;;  %v1702_v38 = vshll.u32 %v9627_v34, 16 }
  0x96   : > { %8363 = vmatpush3.bf16.msra.mxu0 %v8939_v60  ;;  %8358 = vmatprep.mubr.msk.bf16.mxu0 %vm12124_vm10, %v7615_v0  ;;  %v8942_v60 = vld [vmem:[#allocation2 + $0x20] ss:$8 sps:$4 sm:$0xff]   ;;  %v1735_v0 = vshrl.u32 %v1646_v43, 16  ;;  %v7635_v43 = vcombine.low %v1719_v48, %v1733_v36  ;;  %v9730_v48 = vshrl.u32 %v2196_v22, 7 }
  0x97   : > { %8364 = vmatprep.subr.bf16.mxu0 %v8940_v62  ;;  %v1704_v14 = vrot.slane %v1702_v38, 5  ;;  %v1879_v38 = vld [vmem:[#allocation2 + $0x30] sm:$0xe] }
  0x98   : > { %v1737_v16 = vrot.slane %v1735_v0, 4  ;;  %v7647_v5 = vrot.slane %v1879_v38, 9  ;;  %v9771_v38 = vadd.s32 32, %v9730_v48 }
  0x99   : > { %v1705_v26 = vsel %vm9351_vm9, %v1700_v13, %v1704_v14  ;;  %v1929_v14 = vrot.slane %v9652_v54, 5 }
  0x9a   : > { %8365 = vmatpush3.bf16.msra.mxu0 %v8940_v62  ;;  %v1685_v62 = vor.u32 %v1684_v45, %v1681_v41  ;;  %v1741_v57 = vor.u32 %v1740_v17, %v1737_v16  ;;  %v1756_v45 = vrot.slane %v1755_v27, 4  ;;  %v2247_v25 = vand.u32 15, %v9771_v38 }
  0x9b   : > { %8374 = vmatprep.subr.bf16.mxu0 %v9609_v8 }
  0x9c   : > { %v1686_v56 = vrot.slane %v1685_v62, 4 }
  0x9d   : > { %8359 = vmatmul.mubr.msk.bf16.gmra.mrb[4].mxu0 %vm12124_vm10, %v7616_v15  ;;  %v9650_v15 = vld [vmem:[#allocation2 + $0x44] sm:$0x1] }
  0x9e   : > { %8366 = vmatprep.mubr.msk.bf16.mxu0 %vm12124_vm10, %v8941_v32  ;;  %v7633_v32 = vcombine.low %v1663_v3, %v1677_v1  ;;  %v1744_v55 = vshll.u32 %v9650_v15, 16  ;;  %v1880_v3 = vld [vmem:[#allocation2 + $0x38] sm:$0xe]  ;;  %v1909_v1 = vrot.slane %v9625_v30, 5  ;;  %v1881_v30 = vld [vmem:[#allocation2 + $0x40] sm:$0xe] }
  0x9f   : > { %v7648_v61 = vrot.slane %v1880_v3, 9  ;;  %v7649_v53 = vrot.slane %v1881_v30, 9  ;;  %v9774_v3 = vadd.s32 40, %v9730_v48 }
  0xa0   : > { %v1746_v41 = vrot.slane %v1744_v55, 5  ;;  %v1910_v33 = vsel %vm9468_vm13, %v7645_v63, %v1909_v1 }
  0xa1   : > { %v2254_v28 = vand.u32 15, %v9774_v3 }
  0xa5   : > { %8367 = vmatmul.mubr.msk.bf16.vlgmr.msra.gmra.mrb[0].mxu0 %vm12124_vm10, %v8942_v60  ;;  %v1758_v60 = vshll.u32 %v9652_v54, 16 }
  0xa6   : > { %8375 = vmatpush3.bf16.msra.mxu0 %v9609_v8  ;;  %8370 = vmatprep.mubr.msk.bf16.mxu0 %vm12124_vm10, %v8944_v37  ;;  %v1690_v8 = vrot.slane %v1688_v59, 5  ;;  %v1876_v37 = vld [vmem:[#allocation2 + $0x18] sm:$0xe]  ;;  %v1902_v59 = vsel %vm9468_vm13, %v7643_v23, %v1901_v49 }
  0xa7   : > { %8376 = vmatprep.subr.bf16.mxu0 %v8946_v44  ;;  %v1760_v46 = vrot.slane %v1758_v60, 5  ;;  %v7644_v51 = vrot.slane %v1876_v37, 9 }
  0xa8   : > { %v1691_v11 = vsel %vm9351_vm9, %v1686_v56, %v1690_v8  ;;  %v1882_v8 = vld [vmem:[#allocation2 + $0x48] sm:$0xe]  ;;  %v1925_v56 = vrot.slane %v9650_v15, 5  ;;  %v12147_v15 = vmov 0.0  }
  0xa9   : > { %v7634_v40 = vcombine.low %v1691_v11, %v1705_v26  ;;  %v1761_v10 = vsel %vm9351_vm9, %v1756_v45, %v1760_v46  ;;  %v1906_v9 = vsel %vm9468_vm13, %v7644_v51, %v1905_v4  ;;  %v7650_v13 = vrot.slane %v1882_v8, 9  ;;  %8433 = vmatprep.mubr.msk.f32.mxu1 %vm12130_vm14, %v12147_v15 }
  0xaa   : > { %8377 = vmatpush3.bf16.msra.mxu0 %v8946_v44  ;;  %v1742_v44 = vrot.slane %v1741_v57, 4  ;;  %v7651_v0 = vcombine.low %v1902_v59, %v1906_v9  ;;  %v1926_v16 = vsel %vm9468_vm13, %v7649_v53, %v1925_v56  ;;  %v2219_v45 = vand.u32 15, %v9730_v48 }
  0xab   : > { %8386 = vmatprep.subr.bf16.mxu0 %v8947_v6  ;;  %v1930_v17 = vsel %vm9468_vm13, %v7650_v13, %v1929_v14  ;;  %v9747_v46 = vadd.s32 16, %v9730_v48  ;;  %v9759_v4 = vadd.s32 24, %v9730_v48  ;;  %v9846_v53 = vadd.s32 72, %v9730_v48  ;;  %v2806_v14 = vld [vmem:[#allocation3 + $0x8] sm:$0x1] }
  0xac   : > { %v1747_v58 = vsel %vm9351_vm9, %v1742_v44, %v1746_v41  ;;  %v7654_v19 = vcombine.low %v1926_v16, %v1930_v17  ;;  %v9743_v44 = vand.u32 127, %v2196_v22  ;;  %v9865_v56 = vadd.s32 88, %v9730_v48 }
  0xad   : > { %8371 = vmatmul.mubr.msk.bf16.gmra.mrb[4].mxu0 %vm12124_vm10, %v8945_v50  ;;  %v7636_v62 = vcombine.low %v1747_v58, %v1761_v10  ;;  %v7652_v50 = vcombine.low %v1910_v33, %v1914_v29  ;;  %v2240_v1 = vand.u32 15, %v9759_v4  ;;  %v12149_v33 = vmov 1.0  }
  0xae   : > { %8378 = vmatprep.mubr.msk.bf16.mxu0 %vm12124_vm10, %v7633_v32  ;;  %vm9777_vm15 = vcmp.eq.s32.totalorder %v2219_v45, %v9743_v44  ;;  %v12145_v29 = vmov 1.0|1.0   ;;  %vm9831_vm8 = vcmp.eq.s32.totalorder %v2247_v25, %v9743_v44  ;;  %vm9836_vm11 = vcmp.eq.s32.totalorder %v2254_v28, %v9743_v44 }
  0xaf   : > { %vm9802_vm6 = vcmp.eq.s32.totalorder %v2240_v1, %v9743_v44  ;;  %vm12129_vm12 = vmpackc.low %vm9836_vm11, %vm9831_vm8  ;;  %v2282_v17 = vand.u32 15, %v9846_v53  ;;  %v2296_v22 = vand.u32 15, %v9865_v56  ;;  %v9932_v45 = vadd.s32 112, %v9730_v48 }
  0xb5   : > { %8379 = vmatmul.mubr.msk.bf16.vlgmr.msra.gmra.mrb[0].mxu0 %vm12124_vm10, %v7634_v40  ;;  %v9736_v40 = vadd.s32 8, %v9730_v48 }
  0xb6   : > { %8387 = vmatpush3.bf16.msra.mxu0 %v8947_v6  ;;  %8382 = vmatprep.mubr.msk.bf16.mxu0 %vm12124_vm10, %v7635_v43  ;;  %v1917_v6 = vrot.slane %v9632_v52, 5  ;;  %v1922_v52 = vsel %vm9468_vm13, %v7648_v61, %v1921_v31  ;;  %v9807_v61 = vadd.s32 48, %v9730_v48  ;;  %v9810_v31 = vadd.s32 56, %v9730_v48 }
  0xb7   : > { %8388 = vmatprep.subr.bf16.mxu0 %v8948_v47  ;;  %v2226_v59 = vand.u32 15, %v9736_v40 }
  0xb8   : > { %v1918_v34 = vsel %vm9468_vm13, %v7647_v5, %v1917_v6  ;;  %v2268_v8 = vand.u32 15, %v9810_v31 }
  0xb9   : > { %v7653_v32 = vcombine.low %v1918_v34, %v1922_v52  ;;  %vm9782_vm0 = vcmp.eq.s32.totalorder %v2226_v59, %v9743_v44  ;;  %v2261_v52 = vand.u32 15, %v9807_v61 }
  0xba   : > { %8389 = vmatpush3.bf16.msra.mxu0 %v8948_v47  ;;  %vm12132_vm3 = vmpackc.low %vm9782_vm0, %vm9777_vm15 }
  0xbb   : > { %8520 = vmatprep.subr.bf16.mxu0 %v9190_v20 }
  0xbd   : > { %8383 = vmatmul.mubr.msk.bf16.gmra.mrb[4].mxu0 %vm12124_vm10, %v7636_v62  ;;  %v2459_v62 = vand.u32 15, %v9743_v44 }
  0xbe   : > { %8390 = vmatprep.mubr.msk.bf16.mxu0 %vm12124_vm10, %v7651_v0  ;;  %v2233_v0 = vand.u32 15, %v9747_v46 }
  0xc0   : > { %vm9797_vm5 = vcmp.eq.s32.totalorder %v2233_v0, %v9743_v44 }
  0xc1   : > { %vm12128_vm7 = vmpackc.low %vm9802_vm6, %vm9797_vm5 }
  0xc5   : > { %8391 = vmatmul.mubr.msk.bf16.vlgmr.msra.gmra.mrb[0].mxu0 %vm12124_vm10, %v7652_v50  ;;  %v9843_v50 = vadd.s32 64, %v9730_v48 }
  0xc6   : > { %8394 = vmatprep.mubr.msk.bf16.mxu0 %vm12124_vm10, %v7653_v32  ;;  %v9862_v32 = vadd.s32 80, %v9730_v48 }
  0xc7   : > { %v2275_v16 = vand.u32 15, %v9843_v50 }
  0xc9   : > { %vm9893_vm2 = vcmp.eq.s32.totalorder %v2275_v16, %v9743_v44  ;;  %v2809_v16 = vld [vmem:[#allocation3 + $0x10] sm:$0x1] }
  0xcd   : > { %8395 = vmatmul.mubr.msk.bf16.gmra.mrb[4].mxu0 %vm12124_vm10, %v7654_v19  ;;  %vm9868_vm10 = vcmp.eq.s32.totalorder %v2261_v52, %v9743_v44  ;;  %v2289_v19 = vand.u32 15, %v9862_v32 }
  0xce   : > { %8414 = vmatprep.mubr.msk.f32.mxu0 %vm12130_vm14, %v12147_v15 }
 0x198   : > { %v9710_v21 = vpop.f32.mrb[0].mxu0 }
 0x199   : > { %v9712_v24 = vpop.f32.mrb[1].mxu0  ;;  %v2120_v54 = vmul.f32 %v9710_v21, %v9710_v21 }
 0x19a   : > { %v9714_v7 = vpop.f32.mrb[2].mxu0  ;;  %v2118_v27 = vmul.f32 %v9712_v24, %v9712_v24 }
 0x19b   : > { %v8524_v11 = vpack.c.bf16 %v9714_v7, %v9710_v21  ;;  %v2121_v55 = vmul.f32 %v9714_v7, %v9714_v7  ;;  %v9722_v26 = vpop.f32.mrb[3].mxu0 }
 0x19c   : > { %v8521_v57 = vpack.c.bf16 %v9722_v26, %v9712_v24  ;;  %v2119_v60 = vmul.f32 %v9722_v26, %v9722_v26 }
 0x19d   : > { %v8536_v36 = vpack.c.bf16 %v2121_v55, %v2120_v54  ;;  %v12214_v54 = vmov 0  ;;  %v9903_v55 = vadd.s32 96, %v9730_v48 }
 0x19e   : > { %8522 = vmatpush3.bf16.msra.mxu0 %v8521_v57  ;;  %v8533_v12 = vpack.c.bf16 %v2119_v60, %v2118_v27  ;;  %v12215_v54 = vsel %vm9893_vm2, 4294967295, %v12214_v54  ;;  %v9906_v57 = vadd.s32 104, %v9730_v48  ;;  %v2815_v27 = vld [vmem:[#allocation3 + $0x20] sm:$0x1] }
 0x19f   : > { %8523 = vmatprep.subr.bf16.mxu0 %v9190_v20 }
 0x1a0   : > { %v9733_v37 = vpop.f32.mrb[4].mxu0  ;;  %8534 = vmatpush3.bf16.msra.mxu1 %v8533_v12  ;;  %v2310_v12 = vand.u32 15, %v9906_v57 }
 0x1a1   : > { %v9738_v41 = vpop.f32.mrb[5].mxu0  ;;  %8535 = vmatprep.subr.bf16.mxu1 %v9190_v20  ;;  %v2124_v47 = vmul.f32 %v9733_v37, %v9733_v37 }
 0x1a2   : > { %v9741_v43 = vpop.f32.mrb[6].mxu0  ;;  %8525 = vmatpush3.bf16.msra.mxu0 %v8524_v11  ;;  %v2122_v58 = vmul.f32 %v9738_v41, %v9738_v41  ;;  %v12216_v11 = vmov 0  ;;  %vm9954_vm9 = vcmp.eq.s32.totalorder %v2310_v12, %v9743_v44  ;;  %v2821_v12 = vld [vmem:[#allocation3 + $0x30] sm:$0x1] }
 0x1a3   : > { %v8530_v23 = vpack.c.bf16 %v9741_v43, %v9733_v37  ;;  %v2125_v49 = vmul.f32 %v9741_v43, %v9741_v43  ;;  %v9755_v51 = vpop.f32.mrb[7].mxu0  ;;  %8526 = vmatprep.subr.bf16.mxu0 %v9190_v20 }
 0x1a4   : > { %v8527_v10 = vpack.c.bf16 %v9755_v51, %v9738_v41  ;;  %v2123_v18 = vmul.f32 %v9755_v51, %v9755_v51  ;;  %8537 = vmatpush3.bf16.msra.mxu1 %v8536_v36  ;;  %v2303_v36 = vand.u32 15, %v9903_v55 }
 0x1a5   : > { %8538 = vmatprep.subr.bf16.mxu1 %v9190_v20  ;;  %v8542_v9 = vpack.c.bf16 %v2125_v49, %v2124_v47  ;;  %v9935_v47 = vadd.s32 120, %v9730_v48 }
 0x1a6   : > { %8528 = vmatpush3.bf16.msra.mxu0 %v8527_v10  ;;  %v8539_v42 = vpack.c.bf16 %v2123_v18, %v2122_v58  ;;  %vm9949_vm13 = vcmp.eq.s32.totalorder %v2303_v36, %v9743_v44  ;;  %v2317_v58 = vand.u32 15, %v9932_v45  ;;  %v2818_v36 = vld [vmem:[#allocation3 + $0x28] sm:$0x1] }
 0x1a7   : > { %8529 = vmatprep.subr.bf16.mxu0 %v9190_v20  ;;  %12222 = vst [vmem:[#allocation4_spill] sm:$0xff] %v9935_v47  ;;  %v2324_v10 = vand.u32 15, %v9935_v47 }
 0x1a8   : > { %8540 = vmatpush3.bf16.msra.mxu1 %v8539_v42 }
 0x1a9   : > { %8541 = vmatprep.subr.bf16.mxu1 %v9190_v20 }
 0x1aa   : > { %8531 = vmatpush3.bf16.msra.mxu0 %v8530_v23  ;;  %v12223_v23 = vmov 0 }
 0x1ab   : > { %8544 = vmatprep.subr.bf16.mxu0 %v9190_v20  ;;  %v12224_v23 = vsel %vm9949_vm13, 4294967295, %v12223_v23 }
 0x1ac   : > { %8543 = vmatpush3.bf16.msra.mxu1 %v8542_v9 }
 0x1ad   : > { %8415 = vmatmul.mubr.msk.f32.vlgmr.msra.gmra.mrb[8].mxu0 %vm12125_vm1, %v12149_v33  ;;  %8595 = vmatprep.subr.bf16.mxu1 %v9190_v20 }
 0x1ae   : > { %8546 = vmatpush3.bf16.msk.msra.mxu0 %vm12132_vm3, %v12145_v29  ;;  %8468 = vmatprep.mubr.msk.f32.mxu0 %vm12130_vm14, %v12147_v15  ;;  %vm9925_vm3 = vcmp.eq.s32.totalorder %v2296_v22, %v9743_v44 }
 0x1af   : > { %8434 = vmatmul.mubr.msk.f32.vlgmr.msra.gmra.mrb[0].mxu1 %vm12125_vm1, %v12149_v33  ;;  %8547 = vmatprep.subr.bf16.mxu0 %v9190_v20  ;;  %vm9873_vm1 = vcmp.eq.s32.totalorder %v2268_v8, %v9743_v44 }
 0x1b0   : > { %8517 = vmatprep.mubr.msk.f32.mxu1 %vm12130_vm14, %v12147_v15  ;;  %vm12133_vm4 = vmpackc.low %vm9873_vm1, %vm9868_vm10  ;;  %vm9920_vm14 = vcmp.eq.s32.totalorder %v2289_v19, %v9743_v44  ;;  %v8957_v19 = vld [vmem:[%s12121_s2 + $0xa4] ss:$8 sps:$4 sm:$0xff]  }
 0x1b2   : > { %8549 = vmatpush3.bf16.msk.msra.mxu0 %vm12128_vm7, %v12145_v29  ;;  %vm9898_vm7 = vcmp.eq.s32.totalorder %v2282_v17, %v9743_v44  ;;  %v2812_v17 = vld [vmem:[#allocation3 + $0x18] sm:$0x1] }
 0x1b3   : > { %8550 = vmatprep.subr.bf16.mxu0 %v9190_v20  ;;  %v12217_v11 = vsel %vm9898_vm7, 4294967295, %v12216_v11 }
 0x1b6   : > { %8552 = vmatpush3.bf16.msk.msra.mxu0 %vm12129_vm12, %v12145_v29  ;;  %vm12138_vm12 = vmpackc.low %vm9898_vm7, %vm9893_vm2  ;;  %vm9972_vm2 = vcmp.eq.s32.totalorder %v2317_v58, %v9743_v44  ;;  %vm9977_vm7 = vcmp.eq.s32.totalorder %v2324_v10, %v9743_v44  ;;  %v2824_v58 = vld [vmem:[#allocation3 + $0x38] sm:$0x1]  ;;  %v2831_v10 = vld [vmem:[#allocation3 + $0xc] sm:$0x1] }
 0x1b7   : > { %8553 = vmatprep.subr.bf16.mxu0 %v9190_v20 }
 0x1ba   : > { %8555 = vmatpush3.bf16.msk.msra.mxu0 %vm12133_vm4, %v12145_v29  ;;  %vm12141_vm4 = vmpackc.low %vm9925_vm3, %vm9920_vm14 }
 0x1bb   : > { %8556 = vmatprep.subr.bf16.mxu0 %v9190_v20 }
 0x1be   : > { %8558 = vmatpush3.bf16.msk.msra.mxu0 %vm12138_vm12, %v12145_v29  ;;  %vm12142_vm12 = vmpackc.low %vm9954_vm9, %vm9949_vm13  ;;  %vm12232_vm13 = vmmov 0  }
 0x1bf   : > { %8559 = vmatprep.subr.bf16.mxu0 %v9190_v20 }
 0x1c2   : > { %8561 = vmatpush3.bf16.msk.msra.mxu0 %vm12141_vm4, %v12145_v29  ;;  %vm12144_vm4 = vmpackc.low %vm9977_vm7, %vm9972_vm2 }
 0x1c3   : > { %8562 = vmatprep.subr.bf16.mxu0 %v9190_v20 }
 0x1c6   : > { %8564 = vmatpush3.bf16.msk.msra.mxu0 %vm12142_vm12, %v12145_v29  ;;  %vm12231_vm12 = vmpackc.low %vm9782_vm0, %vm9777_vm15 }
 0x1c7   : > { %8565 = vmatprep.subr.bf16.mxu0 %v9190_v20  ;;  %vm12234_vm15 = vmpackc.low %vm9836_vm11, %vm9831_vm8 }
 0x1c8   : > { %vm12235_vm0 = vmpackc.low %vm9873_vm1, %vm9868_vm10  ;;  %vm12240_vm10 = vnez %v12224_v23 }
 0x1c9   : > { %vm12239_vm8 = vmpackc.low %vm9925_vm3, %vm9920_vm14  ;;  %vm2468_vm14 = vcmp.eq.s32.totalorder %v2459_v62, %v9736_v40 }
 0x1ca   : > { %8567 = vmatpush3.bf16.msk.msra.mxu0 %vm12144_vm4, %v12145_v29  ;;  %vm12233_vm4 = vmpackc.low %vm9802_vm6, %vm9797_vm5  ;;  %vm12237_vm5 = vnez %v12215_v54 }
 0x1cb   : > { %8568 = vmatprep.subr.bf16.mxu0 %v9190_v20  ;;  %vm12241_vm1 = vmpackc.low %vm9954_vm9, %vm12240_vm10  ;;  %vm2467_vm9 = vcmp.eq.s32.totalorder %v2459_v62, %v9730_v48  ;;  %v2840_v62 = vld [vmem:[#allocation3 + $0x24] sm:$0x1]  ;;  %vm12255_vm10 = vnez %v12197_v39 }
 0x1cc   : > { %vm12242_vm11 = vmpackc.low %vm9977_vm7, %vm9972_vm2  ;;  %vm2619_vm2 = vcmask 130048   ;;  %vm12243_vm7 = vsmask.f32 256 }
 0x1cd   : > { %vm8593_vm3 = vmpackc.low %vm2468_vm14, %vm2467_vm9 }
 0x1ce   : > { %8597 = vmatpush3.bf16.msk.msra.mxu1 %vm8593_vm3, %v12145_v29 }
 0x280   : > { %v2114_v9 = vpop.f32.mrb[8].mxu0 }
 0x281   : > { %v8416_v42 = vpop.f32.mrb[9].mxu0  ;;  %8469 = vmatmul.mubr.f32.vlgmr.msra.gmra.mrb[10].mxu0 %v2114_v9  ;;  %v2834_v9 = vld [vmem:[#allocation3 + $0x14] sm:$0x1] }
 0x282   : > { %8570 = vmatpush3.bf16.msk.msra.mxu0 %vm12231_vm12, %v12145_v29  ;;  %v2192_v0 = vpop.f32.mrb[0].mxu1  ;;  %8503 = vmatprep.mubr.msk.f32.mxu0 %vm12232_vm13, %v12147_v15  ;;  %v2837_v42 = vld [vmem:[#allocation3 + $0x1c] sm:$0x1] }
 0x283   : > { %8571 = vmatprep.subr.bf16.mxu0 %v9190_v20  ;;  %v8435_v1 = vpop.f32.mrb[1].mxu1 }
 0x286   : > { %8573 = vmatpush3.bf16.msk.msra.mxu0 %vm12233_vm4, %v12145_v29  ;;  %vm12236_vm4 = vnez %v12217_v11 }
 0x287   : > { %8574 = vmatprep.subr.bf16.mxu0 %v9190_v20  ;;  %vm12238_vm6 = vmpackc.low %vm12236_vm4, %vm12237_vm5  ;;  %vm2967_vm4 = vcmask 1043456  }
 0x28a   : > { %8576 = vmatpush3.bf16.msk.msra.mxu0 %vm12234_vm15, %v12145_v29  ;;  %vm12246_vm15 = vsmask.f32 7938 }
 0x28b   : > { %8577 = vmatprep.subr.bf16.mxu0 %v9190_v20  ;;  %vm12250_vm5 = vmmov %vm12246_vm15 }
 0x28e   : > { %8579 = vmatpush3.bf16.msk.msra.mxu0 %vm12235_vm0, %v12145_v29 }
 0x28f   : > { %8580 = vmatprep.subr.bf16.mxu0 %v9190_v20 }
 0x292   : > { %8582 = vmatpush3.bf16.msk.msra.mxu0 %vm12238_vm6, %v12145_v29  ;;  %vm10191_vm6 = vmand %vm2967_vm4, %vm12250_vm5 }
 0x293   : > { %8583 = vmatprep.subr.bf16.mxu0 %v9190_v20 }
 0x296   : > { %8585 = vmatpush3.bf16.msk.msra.mxu0 %vm12239_vm8, %v12145_v29  ;;  %vm12253_vm8 = vnez %v12195_v35 }
 0x297   : > { %8586 = vmatprep.subr.bf16.mxu0 %v9190_v20 }
 0x29a   : > { %8588 = vmatpush3.bf16.msk.msra.mxu0 %vm12241_vm1, %v12145_v29  ;;  %vm12257_vm1 = vcmask 523264  }
 0x29b   : > { %8589 = vmatprep.subr.bf16.mxu0 %v9190_v20 }
 0x29e   : > { %8591 = vmatpush3.bf16.msk.msra.mxu0 %vm12242_vm11, %v12145_v29 }
 0x29f   : > { %8592 = vmatprep.subr.bf16.mxu0 %v9190_v20 }
 0x2a1   : > { %8504 = vmatmul.mubr.f32.vlgmr.msra.gmra.mrb[12].mxu0 %v2192_v0 }
 0x2a2   : > { %8510 = vmatprep.mubr.msk.f32.mxu0 %vm12232_vm13, %v12147_v15  ;;  %8594 = vmatpush3.bf16.msk.msra.mxu0 %vm8593_vm3, %v12145_v29  ;;  %vm2804_vm13 = vcmask 1040384  }
 0x2a3   : > { %vm10067_vm12 = vmand %vm2804_vm13, %vm12243_vm7 }
 0x2a4   : > { %vm10072_vm0 = vmand %vm2804_vm13, %vm12246_vm15  ;;  %v2807_v22 = vsel %vm10067_vm12, 0, %v2806_v14  ;;  %v2810_v54 = vsel %vm10067_vm12, 0, %v2809_v16  ;;  %v2813_v11 = vsel %vm10067_vm12, 0, %v2812_v17  ;;  %v2816_v60 = vsel %vm10067_vm12, 0, %v2815_v27  ;;  %v8951_v14 = vld [vmem:[%s12121_s2 + $0x84] ss:$8 sps:$4 sm:$0xff]  }
 0x2a5   : > { %2808 = vst [vmem:[#allocation3 + $0x8] sm:$0x1] %v2807_v22  ;;  %2811 = vst [vmem:[#allocation3 + $0x10] sm:$0x1] %v2810_v54  ;;  %v2819_v23 = vsel %vm10067_vm12, 0, %v2818_v36  ;;  %v2822_v49 = vsel %vm10067_vm12, 0, %v2821_v12  ;;  %3273 = vmatprep.subr.bf16.mxu1 %v8951_v14 }
 0x2a6   : > { %2814 = vst [vmem:[#allocation3 + $0x18] sm:$0x1] %v2813_v11  ;;  %2817 = vst [vmem:[#allocation3 + $0x20] sm:$0x1] %v2816_v60  ;;  %v2825_v18 = vsel %vm10067_vm12, 0, %v2824_v58  ;;  %v2832_v59 = vsel %vm10072_vm0, 0, %v2831_v10 }
 0x2a7   : > { %2820 = vst [vmem:[#allocation3 + $0x28] sm:$0x1] %v2819_v23  ;;  %2823 = vst [vmem:[#allocation3 + $0x30] sm:$0x1] %v2822_v49  ;;  %v2835_v0 = vsel %vm10072_vm0, 0, %v2834_v9  ;;  %v2838_v1 = vsel %vm10072_vm0, 0, %v2837_v42 }
 0x2a8   : > { %2826 = vst [vmem:[#allocation3 + $0x38] sm:$0x1] %v2825_v18  ;;  %2833 = vst [vmem:[#allocation3 + $0xc] sm:$0x1] %v2832_v59  ;;  %v8954_v16 = vld [vmem:[%s12121_s2 + $0x94] ss:$8 sps:$4 sm:$0xff]  }
 0x2a9   : > { %2836 = vst [vmem:[#allocation3 + $0x14] sm:$0x1] %v2835_v0  ;;  %2839 = vst [vmem:[#allocation3 + $0x1c] sm:$0x1] %v2838_v1  ;;  %v8952_v17 = vld [vmem:[%s12121_s2 + $0x90] ss:$8 sps:$4 sm:$0xff]  }
 0x2aa   : > { %v8955_v22 = vld [vmem:[%s12121_s2 + $0xa0] ss:$8 sps:$4 sm:$0xff]   ;;  %v8958_v54 = vld [vmem:[%s12121_s2 + $0xb0] ss:$8 sps:$4 sm:$0xff]   ;;  %v8960_v11 = vld [vmem:[%s12121_s2 + $0xb4] ss:$8 sps:$4 sm:$0xff]  }
 0x2ab   : > { %v8963_v27 = vld [vmem:[%s12121_s2 + $0xc4] ss:$8 sps:$4 sm:$0xff]   ;;  %v8961_v60 = vld [vmem:[%s12121_s2 + $0xc0] ss:$8 sps:$4 sm:$0xff]   ;;  %v2827_v36 = vld [vmem:[#allocation3 + $0x40] sm:$0x1] }
 0x2ac   : > { %v8966_v12 = vld [vmem:[%s12121_s2 + $0xd4] ss:$8 sps:$4 sm:$0xff]   ;;  %v2828_v23 = vsel %vm10067_vm12, 0, %v2827_v36  ;;  %v8964_v49 = vld [vmem:[%s12121_s2 + $0xd0] ss:$8 sps:$4 sm:$0xff]   ;;  %v10160_v42 = vsub.s32 0, %v9730_v48 }
 0x2ad   : > { %2829 = vst [vmem:[#allocation3 + $0x40] sm:$0x1] %v2828_v23  ;;  %v8969_v58 = vld [vmem:[%s12121_s2 + $0xe4] ss:$8 sps:$4 sm:$0xff]   ;;  %v8967_v10 = vld [vmem:[%s12121_s2 + $0xe0] ss:$8 sps:$4 sm:$0xff]  }
 0x2ae   : > { %v8972_v18 = vld [vmem:[%s12121_s2 + $0xf4] ss:$8 sps:$4 sm:$0xff]   ;;  %v8970_v59 = vld [vmem:[%s12121_s2 + $0xf0] ss:$8 sps:$4 sm:$0xff]   ;;  %v8975_v9 = vld [vmem:[%s12121_s2 + $0x4] ss:$8 sps:$4 sm:$0xff]  }
 0x2af   : > { %12249 = vst [vmem:[#allocation5_spill] sm:$0xff] %v10160_v42  ;;  %v2987_v29 = vld [vmem:[#allocation3 + $0x20] sm:$0xf] }
 0x354   : > { %v2539_v63 = vpop.f32.mrb[10].mxu0 }
 0x355   : > { %v2543_v25 = vmul.f32 0.001953125, %v2539_v63  ;;  %v8470_v28 = vpop.f32.mrb[11].mxu0  ;;  %v2843_v63 = vld [vmem:[#allocation3 + $0x2c] sm:$0x1] }
 0x356   : > { %v2844_v28 = vsel %vm10072_vm0, 0, %v2843_v63 }
 0x357   : > { %8511 = vmatmul.mubr.msk.f32.vlgmr.msra.gmra.mrb[14].mxu0 %vm2619_vm2, %v2543_v25  ;;  %v2615_v5 = vmul.f32 %v2543_v25, %v2543_v25  ;;  %v2841_v25 = vsel %vm10072_vm0, 0, %v2840_v62  ;;  %2845 = vst [vmem:[#allocation3 + $0x2c] sm:$0x1] %v2844_v28 }
 0x358   : > { %5451 = vmatprep.mubr.f32.mxu0 %v12147_v15  ;;  %2842 = vst [vmem:[#allocation3 + $0x24] sm:$0x1] %v2841_v25 }
 0x35e   : > { %v2996_v15 = vld [vmem:[#allocation3 + $0x2c] sm:$0x1] }
 0x374   : > { %v2610_v20 = vpop.f32.mrb[12].mxu0 }
 0x375   : > { %v2614_v6 = vmul.f32 0.001953125, %v2610_v20  ;;  %v8505_v30 = vpop.f32.mrb[13].mxu0  ;;  %v2846_v20 = vld [vmem:[#allocation3 + $0x34] sm:$0x1] }
 0x377   : > { %v2616_v34 = vsub.f32 %v2614_v6, %v2615_v5  ;;  %v2849_v5 = vld [vmem:[#allocation3 + $0x3c] sm:$0x1]  ;;  %v2847_v6 = vsel %vm10072_vm0, 0, %v2846_v20 }
 0x378   : > { %v2850_v30 = vsel %vm10072_vm0, 0, %v2849_v5  ;;  %2848 = vst [vmem:[#allocation3 + $0x34] sm:$0x1] %v2847_v6 }
 0x379   : > { %v2617_v52 = vadd.f32 1e-05, %v2616_v34  ;;  %v2852_v34 = vld [vmem:[#allocation3 + $0x44] sm:$0x1]  ;;  %2851 = vst [vmem:[#allocation3 + $0x3c] sm:$0x1] %v2850_v30 }
 0x37b   : > { %9177 = vrsqrt.f32 %v2617_v52  ;;  %v8949_v52 = vld [vmem:[%s12121_s2 + $0x80] ss:$8 sps:$4 sm:$0xff]  }
 0x385   : > { %v9178_v8 = vpop.eup %9177 }
 0x386   : > { %8518 = vmatmul.mubr.msk.f32.vlgmr.msra.gmra.mrb[2].mxu1 %vm2619_vm2, %v9178_v8  ;;  %v2853_v8 = vsel %vm10072_vm0, 0, %v2852_v34 }
 0x387   : > { %3305 = vmatprep.mubr.bf16.mxu1 %v12151_v2  ;;  %2854 = vst [vmem:[#allocation3 + $0x44] sm:$0x1] %v2853_v8  ;;  %3274 = vmatpush1.bf16.msra.mxu1 %v8949_v52  ;;  %v10171_v52 = vld [vmem:[#allocation3] sm:$0xf] }
 0x388   : > { %3275 = vmatprep.subr.bf16.mxu1 %v8954_v16  ;;  %v3050_v8 = vshrl.u32 %v10171_v52, 16  ;;  %v10180_v16 = vld [vmem:[#allocation3 + $0x4] sm:$0x1] }
 0x38a   : > { %v10175_v14 = vrot.slane %v3050_v8, 4 }
 0x38b   : > { %3276 = vmatpush1.bf16.msra.mxu1 %v8952_v17 }
 0x38c   : > { %3277 = vmatprep.subr.bf16.mxu1 %v8957_v19 }
 0x38f   : > { %3278 = vmatpush1.bf16.msra.mxu1 %v8955_v22 }
 0x390   : > { %3279 = vmatprep.subr.bf16.mxu1 %v8960_v11 }
 0x393   : > { %3280 = vmatpush1.bf16.msra.mxu1 %v8958_v54 }
 0x394   : > { %3281 = vmatprep.subr.bf16.mxu1 %v8963_v27 }
 0x397   : > { %3282 = vmatpush1.bf16.msra.mxu1 %v8961_v60 }
 0x398   : > { %3283 = vmatprep.subr.bf16.mxu1 %v8966_v12 }
 0x39b   : > { %3284 = vmatpush1.bf16.msra.mxu1 %v8964_v49 }
 0x39c   : > { %3285 = vmatprep.subr.bf16.mxu1 %v8969_v58 }
 0x39f   : > { %3286 = vmatpush1.bf16.msra.mxu1 %v8967_v10 }
 0x3a0   : > { %3287 = vmatprep.subr.bf16.mxu1 %v8972_v18 }
 0x3a3   : > { %3288 = vmatpush1.bf16.msra.mxu1 %v8970_v59 }
 0x3a4   : > { %3450 = vmatprep.subr.bf16.mxu1 %v8975_v9 }
 0x42a   : > { %v2689_v0 = vpop.f32.mrb[14].mxu0 }
 0x42b   : > { %v2769_v1 = vrot.slane %v2689_v0, %v10160_v42  ;;  %v8512_v62 = vpop.f32.mrb[15].mxu0 }
 0x42d   : > { %v2770_v63 = vsub.f32 %v9712_v24, %v2769_v1  ;;  %v2771_v25 = vsub.f32 %v9722_v26, %v2769_v1  ;;  %v2772_v28 = vsub.f32 %v9710_v21, %v2769_v1  ;;  %v2773_v20 = vsub.f32 %v9714_v7, %v2769_v1 }
 0x42e   : > { %v2774_v5 = vsub.f32 %v9738_v41, %v2769_v1  ;;  %v2775_v6 = vsub.f32 %v9755_v51, %v2769_v1  ;;  %v2776_v30 = vsub.f32 %v9733_v37, %v2769_v1  ;;  %v2777_v34 = vsub.f32 %v9741_v43, %v2769_v1 }
 0x42f   : > { %v3053_v24 = vshll.u32 %v10171_v52, 16  ;;  %v3059_v43 = vshll.u32 %v10180_v16, 16 }
 0x431   : > { %v10177_v26 = vrot.slane %v3053_v24, 5  ;;  %v3061_v13 = vrot.slane %v3059_v43, 5 }
 0x433   : > { %v3056_v37 = vor.u32 %v10177_v26, %v10175_v14  ;;  %v3549_v26 = vrot.slane %v10180_v16, 5 }
 0x459   : > { %v2762_v21 = vpop.f32.mrb[2].mxu1 }
 0x45a   : > { %v2781_v7 = vrot.slane %v2762_v21, %v10160_v42  ;;  %v8519_v41 = vpop.f32.mrb[3].mxu1 }
 0x45c   : > { %v2782_v51 = vmul.f32 %v2781_v7, %v2770_v63  ;;  %v2783_v17 = vmul.f32 %v2781_v7, %v2771_v25  ;;  %v2784_v19 = vmul.f32 %v2781_v7, %v2772_v28  ;;  %v2785_v22 = vmul.f32 %v2781_v7, %v2773_v20 }
 0x45d   : > { %v2786_v54 = vmul.f32 %v2781_v7, %v2774_v5  ;;  %v2787_v11 = vmul.f32 %v2781_v7, %v2775_v6  ;;  %v2788_v27 = vmul.f32 %v2781_v7, %v2776_v30  ;;  %v2789_v60 = vmul.f32 %v2781_v7, %v2777_v34 }
 0x45e   : > { %v2790_v36 = vmax.f32 %v2782_v51, 0.0  ;;  %v2791_v12 = vmax.f32 %v2783_v17, 0.0  ;;  %v2792_v23 = vmax.f32 %v2784_v19, 0.0  ;;  %v2793_v49 = vmax.f32 %v2785_v22, 0.0  ;;  %v2969_v22 = vld [vmem:[#allocation3 + $0x8] sm:$0xf] }
 0x45f   : > { %v2794_v58 = vmax.f32 %v2786_v54, 0.0  ;;  %v2795_v10 = vmax.f32 %v2787_v11, 0.0  ;;  %v2796_v18 = vmax.f32 %v2788_v27, 0.0  ;;  %v2797_v59 = vmax.f32 %v2789_v60, 0.0 }
 0x460   : > { %v8100_v9 = vpack.c.bf16 %v2790_v36, %v2790_v36  ;;  %v8101_v0 = vpack.c.bf16 %v2791_v12, %v2791_v12  ;;  %v8102_v1 = vpack.c.bf16 %v2792_v23, %v2792_v23  ;;  %v8103_v62 = vpack.c.bf16 %v2793_v49, %v2793_v49  ;;  %v2972_v36 = vld [vmem:[#allocation3 + $0xc] sm:$0x1] }
 0x461   : > { %v8104_v63 = vpack.c.bf16 %v2794_v58, %v2794_v58  ;;  %v8105_v25 = vpack.c.bf16 %v2795_v10, %v2795_v10  ;;  %v10185_v28 = vpack.c.bf16 %v2796_v18, %v2796_v18  ;;  %v10187_v20 = vpack.c.bf16 %v2797_v59, %v2797_v59  ;;  %v2975_v18 = vld [vmem:[#allocation3 + $0x10] sm:$0xf]  ;;  %v2978_v59 = vld [vmem:[#allocation3 + $0x14] sm:$0x1] }
 0x462   : > { %v2888_v5 = vshrl.u32 %v8100_v9, 16  ;;  %v2891_v6 = vshll.u32 %v8100_v9, 16  ;;  %v2896_v30 = vshrl.u32 %v8101_v0, 16  ;;  %v2899_v34 = vshll.u32 %v8101_v0, 16 }
 0x463   : > { %v2904_v8 = vshrl.u32 %v8102_v1, 16  ;;  %v2907_v24 = vshll.u32 %v8102_v1, 16  ;;  %v2912_v21 = vshrl.u32 %v8103_v62, 16  ;;  %v2915_v7 = vshll.u32 %v8103_v62, 16 }
 0x464   : > { %v2890_v41 = vrot.slane %v2888_v5, 7  ;;  %v2898_v51 = vrot.slane %v2896_v30, 7  ;;  %v2920_v17 = vshrl.u32 %v8104_v63, 16  ;;  %v2923_v19 = vshll.u32 %v8104_v63, 16  ;;  %v2981_v63 = vld [vmem:[#allocation3 + $0x18] sm:$0xf] }
 0x465   : > { %v2906_v54 = vrot.slane %v2904_v8, 7  ;;  %v2914_v11 = vrot.slane %v2912_v21, 7  ;;  %v2928_v27 = vshrl.u32 %v8105_v25, 16  ;;  %v2931_v60 = vshll.u32 %v8105_v25, 16  ;;  %v2984_v5 = vld [vmem:[#allocation3 + $0x1c] sm:$0x1] }
 0x466   : > { %v2893_v23 = vor.u32 %v2891_v6, %v2890_v41  ;;  %v2894_v49 = vrot.slane %v2890_v41, 4  ;;  %v2901_v58 = vor.u32 %v2899_v34, %v2898_v51  ;;  %v2902_v10 = vrot.slane %v2898_v51, 4  ;;  %v2993_v51 = vld [vmem:[#allocation3 + $0x28] sm:$0xf] }
 0x467   : > { %v2909_v9 = vor.u32 %v2907_v24, %v2906_v54  ;;  %v2910_v0 = vrot.slane %v2906_v54, 4  ;;  %v2917_v1 = vor.u32 %v2915_v7, %v2914_v11  ;;  %v2918_v62 = vrot.slane %v2914_v11, 4  ;;  %v2990_v7 = vld [vmem:[#allocation3 + $0x24] sm:$0x1] }
 0x468   : > { %v2922_v25 = vrot.slane %v2920_v17, 7  ;;  %v2930_v30 = vrot.slane %v2928_v27, 7  ;;  %v2936_v8 = vshrl.u32 %v10185_v28, 16  ;;  %v2939_v21 = vshll.u32 %v10185_v28, 16  ;;  %v2999_v28 = vld [vmem:[#allocation3 + $0x30] sm:$0xf] }
 0x469   : > { %v2944_v6 = vshrl.u32 %v10187_v20, 16  ;;  %v2947_v34 = vshll.u32 %v10187_v20, 16  ;;  %v2970_v41 = vsel %vm10191_vm6, %v2893_v23, %v2969_v22  ;;  %v2973_v24 = vsel %vm10067_vm12, %v2894_v49, %v2972_v36  ;;  %v3002_v23 = vld [vmem:[#allocation3 + $0x34] sm:$0x1]  ;;  %v3005_v36 = vld [vmem:[#allocation3 + $0x38] sm:$0xf] }
 0x46a   : > { %v2925_v54 = vor.u32 %v2923_v19, %v2922_v25  ;;  %v2926_v17 = vrot.slane %v2922_v25, 4  ;;  %v2933_v11 = vor.u32 %v2931_v60, %v2930_v30  ;;  %v2934_v27 = vrot.slane %v2930_v30, 4  ;;  %2971 = vst [vmem:[#allocation3 + $0x8] sm:$0xf] %v2970_v41  ;;  %2974 = vst [vmem:[#allocation3 + $0xc] sm:$0x1] %v2973_v24 }
 0x46b   : > { %v2938_v33 = vrot.slane %v2936_v8, 7  ;;  %v2946_v2 = vrot.slane %v2944_v6, 7  ;;  %v2976_v20 = vsel %vm10191_vm6, %v2901_v58, %v2975_v18  ;;  %v2979_v22 = vsel %vm10067_vm12, %v2902_v10, %v2978_v59  ;;  %v3008_v30 = vld [vmem:[#allocation3 + $0x3c] sm:$0x1]  ;;  %v3014_v58 = vld [vmem:[#allocation3 + $0x44] sm:$0x1] }
 0x46c   : > { %2977 = vst [vmem:[#allocation3 + $0x10] sm:$0xf] %v2976_v20  ;;  %v2982_v19 = vsel %vm10191_vm6, %v2909_v9, %v2981_v63  ;;  %v2985_v60 = vsel %vm10067_vm12, %v2910_v0, %v2984_v5  ;;  %v2988_v49 = vsel %vm10191_vm6, %v2917_v1, %v2987_v29  ;;  %v2991_v25 = vsel %vm10067_vm12, %v2918_v62, %v2990_v7  ;;  %v3011_v18 = vld [vmem:[#allocation3 + $0x40] sm:$0xf] }
 0x46d   : > { %2980 = vst [vmem:[#allocation3 + $0x14] sm:$0x1] %v2979_v22  ;;  %v2941_v10 = vor.u32 %v2939_v21, %v2938_v33  ;;  %v2942_v59 = vrot.slane %v2938_v33, 4  ;;  %v2949_v8 = vor.u32 %v2947_v34, %v2946_v2  ;;  %v2950_v6 = vrot.slane %v2946_v2, 4  ;;  %2983 = vst [vmem:[#allocation3 + $0x18] sm:$0xf] %v2982_v19 }
 0x46e   : > { %2989 = vst [vmem:[#allocation3 + $0x20] sm:$0xf] %v2988_v49  ;;  %2986 = vst [vmem:[#allocation3 + $0x1c] sm:$0x1] %v2985_v60  ;;  %v2994_v9 = vsel %vm10191_vm6, %v2925_v54, %v2993_v51  ;;  %v2997_v29 = vsel %vm10067_vm12, %v2926_v17, %v2996_v15  ;;  %v3000_v0 = vsel %vm10191_vm6, %v2933_v11, %v2999_v28  ;;  %v3057_v21 = vrot.slane %v3056_v37, 4 }
 0x46f   : > { %2992 = vst [vmem:[#allocation3 + $0x24] sm:$0x1] %v2991_v25  ;;  %v3003_v1 = vsel %vm10067_vm12, %v2934_v27, %v3002_v23  ;;  %2995 = vst [vmem:[#allocation3 + $0x28] sm:$0xf] %v2994_v9  ;;  %v3006_v2 = vsel %vm10191_vm6, %v2941_v10, %v3005_v36  ;;  %v3009_v33 = vsel %vm10067_vm12, %v2942_v59, %v3008_v30  ;;  %v10242_v41 = vld [vmem:[#allocation3] sm:$0xe] }
 0x470   : > { %3001 = vst [vmem:[#allocation3 + $0x30] sm:$0xf] %v3000_v0  ;;  %v3015_v62 = vsel %vm10067_vm12, %v2950_v6, %v3014_v58  ;;  %2998 = vst [vmem:[#allocation3 + $0x2c] sm:$0x1] %v2997_v29  ;;  %v3012_v15 = vsel %vm10191_vm6, %v2949_v8, %v3011_v18  ;;  %v3062_v20 = vsel %vm12253_vm8, %v3057_v21, %v3061_v13  ;;  %v7767_v60 = vrot.slane %v10242_v41, 9 }
 0x471   : > { %3004 = vst [vmem:[#allocation3 + $0x34] sm:$0x1] %v3003_v1  ;;  %3007 = vst [vmem:[#allocation3 + $0x38] sm:$0xf] %v3006_v2  ;;  %v10231_v63 = vld [vmem:[#allocation3 + $0x8] sm:$0xf] }
 0x472   : > { %3010 = vst [vmem:[#allocation3 + $0x3c] sm:$0x1] %v3009_v33  ;;  %3016 = vst [vmem:[#allocation3 + $0x44] sm:$0x1] %v3015_v62  ;;  %v10233_v5 = vld [vmem:[#allocation3 + $0xc] sm:$0x1] }
 0x473   : > { %3013 = vst [vmem:[#allocation3 + $0x40] sm:$0xf] %v3012_v15  ;;  %v3064_v34 = vshrl.u32 %v10231_v63, 16  ;;  %v3067_v12 = vshll.u32 %v10231_v63, 16  ;;  %v3073_v24 = vshll.u32 %v10233_v5, 16 }
 0x474   : > { %v10245_v7 = vld [vmem:[#allocation3 + $0x10] sm:$0xf]  ;;  %v10247_v51 = vld [vmem:[#allocation3 + $0x14] sm:$0x1]  ;;  %v10249_v11 = vld [vmem:[#allocation3 + $0x18] sm:$0xf] }
 0x475   : > { %v3066_v54 = vrot.slane %v3064_v34, 4  ;;  %v3069_v17 = vrot.slane %v3067_v12, 5  ;;  %v3078_v14 = vshrl.u32 %v10245_v7, 16  ;;  %v10253_v37 = vld [vmem:[#allocation3 + $0x1c] sm:$0x1]  ;;  %v3081_v43 = vshll.u32 %v10245_v7, 16 }
 0x476   : > { %v3092_v27 = vshrl.u32 %v10249_v11, 16  ;;  %v3095_v28 = vshll.u32 %v10249_v11, 16  ;;  %v10260_v36 = vld [vmem:[#allocation3 + $0x20] sm:$0xf]  ;;  %v10262_v19 = vld [vmem:[#allocation3 + $0x28] sm:$0xf] }
 0x477   : > { %v3070_v22 = vor.u32 %v3069_v17, %v3066_v54  ;;  %v3080_v23 = vrot.slane %v3078_v14, 4  ;;  %v3075_v49 = vrot.slane %v3073_v24, 5  ;;  %v3083_v25 = vrot.slane %v3081_v43, 5  ;;  %v8973_v10 = vld [vmem:[%s12121_s2] ss:$8 sps:$4 sm:$0xff]  }
 0x478   : > { %v3094_v30 = vrot.slane %v3092_v27, 4  ;;  %v3097_v58 = vrot.slane %v3095_v28, 5  ;;  %v3087_v59 = vshll.u32 %v10247_v51, 16  ;;  %v3106_v8 = vshrl.u32 %v10260_v36, 16  ;;  %v8978_v9 = vld [vmem:[%s12121_s2 + $0x14] ss:$8 sps:$4 sm:$0xff]  }
 0x479   : > { %v3071_v18 = vrot.slane %v3070_v22, 4  ;;  %v3109_v6 = vshll.u32 %v10260_v36, 16  ;;  %v3084_v29 = vor.u32 %v3083_v25, %v3080_v23  ;;  %v3101_v1 = vshll.u32 %v10253_v37, 16  ;;  %v10275_v2 = vld [vmem:[#allocation3 + $0x24] sm:$0x1] }
 0x47a   : > { %v3098_v0 = vor.u32 %v3097_v58, %v3094_v30  ;;  %v3120_v33 = vshrl.u32 %v10262_v19, 16  ;;  %v3108_v15 = vrot.slane %v3106_v8, 4  ;;  %v3123_v13 = vshll.u32 %v10262_v19, 16  ;;  %v10281_v34 = vld [vmem:[#allocation3 + $0x30] sm:$0xf] }
 0x47b   : > { %v3076_v62 = vsel %vm12253_vm8, %v3071_v18, %v3075_v49  ;;  %v3111_v21 = vrot.slane %v3109_v6, 5  ;;  %v3085_v41 = vrot.slane %v3084_v29, 4  ;;  %v10283_v54 = vld [vmem:[#allocation3 + $0x2c] sm:$0x1]  ;;  %v3524_v17 = vld [vmem:[#allocation3 + $0x8] sm:$0xe] }
 0x47c   : > { %v7727_v12 = vcombine.low %v3062_v20, %v3076_v62  ;;  %v3099_v24 = vrot.slane %v3098_v0, 4  ;;  %v3115_v43 = vshll.u32 %v10275_v2, 16  ;;  %v3122_v27 = vrot.slane %v3120_v33, 4  ;;  %v10286_v22 = vld [vmem:[#allocation3 + $0x38] sm:$0xf] }
 0x47d   : > { %v3112_v14 = vor.u32 %v3111_v21, %v3108_v15  ;;  %v3125_v28 = vrot.slane %v3123_v13, 5  ;;  %v8976_v23 = vld [vmem:[%s12121_s2 + $0x10] ss:$8 sps:$4 sm:$0xff]   ;;  %v3089_v49 = vrot.slane %v3087_v59, 5  ;;  %v3103_v25 = vrot.slane %v3101_v1, 5 }
 0x47e   : > { %3306 = vmatmul.mubr.bf16.vlgmr.msra.gmra.mrb[4].mxu1 %v7727_v12  ;;  %v3134_v20 = vshrl.u32 %v10281_v34, 16  ;;  %v3137_v30 = vshll.u32 %v10281_v34, 16  ;;  %v3553_v58 = vrot.slane %v10233_v5, 5  ;;  %v12254_v18 = vmov 0   ;;  %v8981_v8 = vld [vmem:[%s12121_s2 + $0x24] ss:$8 sps:$4 sm:$0xff]  }
 0x47f   : > { %3451 = vmatpush1.bf16.msra.mxu1 %v8973_v10  ;;  %3315 = vmatprep.mubr.bf16.mxu1 %v12254_v18  ;;  %v3126_v6 = vor.u32 %v3125_v28, %v3122_v27  ;;  %v3129_v29 = vshll.u32 %v10283_v54, 16  ;;  %v7768_v0 = vrot.slane %v3524_v17, 9  ;;  %v3090_v59 = vsel %vm12253_vm8, %v3085_v41, %v3089_v49  ;;  %v3525_v10 = vld [vmem:[#allocation3 + $0x10] sm:$0xe]  ;;  %v3526_v62 = vld [vmem:[#allocation3 + $0x18] sm:$0xe] }
 0x480   : > { %3452 = vmatprep.subr.bf16.mxu1 %v8978_v9  ;;  %v3104_v1 = vsel %vm12253_vm8, %v3099_v24, %v3103_v25  ;;  %v3113_v33 = vrot.slane %v3112_v14, 4  ;;  %v3148_v5 = vshrl.u32 %v10286_v22, 16  ;;  %v8979_v15 = vld [vmem:[%s12121_s2 + $0x20] ss:$8 sps:$4 sm:$0xff]   ;;  %v3117_v21 = vrot.slane %v3115_v43, 5 }
 0x481   : > { %v3151_v13 = vshll.u32 %v10286_v22, 16  ;;  %v3527_v12 = vld [vmem:[#allocation3 + $0x20] sm:$0xe]  ;;  %v8984_v9 = vld [vmem:[%s12121_s2 + $0x34] ss:$8 sps:$4 sm:$0xff]   ;;  %v3136_v41 = vrot.slane %v3134_v20, 4  ;;  %v10315_v24 = vsel %vm12255_vm10, %v7767_v60, %v3549_v26  ;;  %v7728_v27 = vcombine.low %v3090_v59, %v3104_v1 }
 0x482   : > { %v3139_v17 = vrot.slane %v3137_v30, 5  ;;  %v3528_v14 = vld [vmem:[#allocation3 + $0x28] sm:$0xe]  ;;  %v3127_v28 = vrot.slane %v3126_v6, 4  ;;  %v3131_v43 = vrot.slane %v3129_v29, 5  ;;  %v3118_v42 = vsel %vm12253_vm8, %v3113_v33, %v3117_v21 }
 0x483   : > { %3453 = vmatpush1.bf16.msra.mxu1 %v8976_v23  ;;  %v3047_v49 = vld [vmem:[#allocation3 + $0x34] sm:$0x1]  ;;  %v3529_v25 = vld [vmem:[#allocation3 + $0x30] sm:$0xe]  ;;  %v3150_v47 = vrot.slane %v3148_v5, 4  ;;  %v10321_v20 = vsel %vm12255_vm10, %v7768_v0, %v3553_v58  ;;  %v7769_v16 = vrot.slane %v3525_v10, 9 }
 0x484   : > { %3454 = vmatprep.subr.bf16.mxu1 %v8981_v8  ;;  %v3530_v30 = vld [vmem:[#allocation3 + $0x38] sm:$0xe]  ;;  %v3153_v26 = vrot.slane %v3151_v13, 5  ;;  %v7775_v60 = vcombine.low %v10315_v24, %v10321_v20  ;;  %v3557_v23 = vrot.slane %v10247_v51, 5  ;;  %v7770_v6 = vrot.slane %v3526_v62, 9 }
 0x485   : > { %v3140_v29 = vor.u32 %v3139_v17, %v3136_v41  ;;  %v3561_v8 = vrot.slane %v10253_v37, 5  ;;  %v7771_v59 = vrot.slane %v3527_v12, 9  ;;  %v3565_v1 = vrot.slane %v10275_v2, 5  ;;  %v8982_v58 = vld [vmem:[%s12121_s2 + $0x30] ss:$8 sps:$4 sm:$0xff]  }
 0x486   : > { %3316 = vmatmul.mubr.bf16.gmra.mrb[8].mxu1 %v7728_v27  ;;  %v3132_v0 = vsel %vm12253_vm8, %v3127_v28, %v3131_v43  ;;  %v3048_v33 = vld [vmem:[#allocation3 + $0x3c] sm:$0x1]  ;;  %v10336_v51 = vsel %vm12255_vm10, %v7769_v16, %v3557_v23  ;;  %v7772_v5 = vrot.slane %v3528_v14, 9  ;;  %v3569_v37 = vrot.slane %v10283_v54, 5  ;;  %v9036_v24 = vld [vmem:[%s12121_s2 + $0x1b4] ss:$8 sps:$4 sm:$0xff]  }
 0x487   : > { %3455 = vmatpush1.bf16.msra.mxu1 %v8979_v15  ;;  %3325 = vmatprep.mubr.bf16.mxu1 %v12254_v18  ;;  %v8987_v2 = vld [vmem:[%s12121_s2 + $0x44] ss:$8 sps:$4 sm:$0xff]   ;;  %v10344_v10 = vsel %vm12255_vm10, %v7770_v6, %v3561_v8  ;;  %v10348_v62 = vsel %vm12255_vm10, %v7771_v59, %v3565_v1  ;;  %v7773_v15 = vrot.slane %v3529_v25, 9  ;;  %v3573_v21 = vrot.slane %v3047_v49, 5  ;;  %v8990_v25 = vld [vmem:[%s12121_s2 + $0x54] ss:$8 sps:$4 sm:$0xff]  }
 0x488   : > { %3456 = vmatprep.subr.bf16.mxu1 %v8984_v9  ;;  %v3154_v13 = vor.u32 %v3153_v26, %v3150_v47  ;;  %v7776_v12 = vcombine.low %v10336_v51, %v10344_v10  ;;  %v10354_v54 = vsel %vm12255_vm10, %v7772_v5, %v3569_v37  ;;  %v7774_v9 = vrot.slane %v3530_v30, 9  ;;  %v8985_v47 = vld [vmem:[%s12121_s2 + $0x40] ss:$8 sps:$4 sm:$0xff]   ;;  %v8993_v8 = vld [vmem:[%s12121_s2 + $0x64] ss:$8 sps:$4 sm:$0xff]  }
 0x489   : > { %v7777_v41 = vcombine.low %v10348_v62, %v10354_v54  ;;  %v10360_v17 = vsel %vm12255_vm10, %v7773_v15, %v3573_v21  ;;  %v3577_v14 = vrot.slane %v3048_v33, 5  ;;  %v3143_v27 = vshll.u32 %v3047_v49, 16  ;;  %v8991_v1 = vld [vmem:[%s12121_s2 + $0x60] ss:$8 sps:$4 sm:$0xff]   ;;  %v9000_v5 = vld [vmem:[%s12121_s2 + $0x104] ss:$8 sps:$4 sm:$0xff]  }
 0x48a   : > { %v3157_v28 = vshll.u32 %v3048_v33, 16  ;;  %v7729_v43 = vcombine.low %v3118_v42, %v3132_v0  ;;  %v3141_v30 = vrot.slane %v3140_v29, 4  ;;  %v3155_v26 = vrot.slane %v3154_v13, 4  ;;  %v8988_v42 = vld [vmem:[%s12121_s2 + $0x50] ss:$8 sps:$4 sm:$0xff]  }
 0x48b   : > { %3457 = vmatpush1.bf16.msra.mxu1 %v8982_v58  ;;  %v10370_v16 = vsel %vm12255_vm10, %v7774_v9, %v3577_v14  ;;  %v3145_v49 = vrot.slane %v3143_v27, 5  ;;  %v8996_v0 = vld [vmem:[%s12121_s2 + $0x74] ss:$8 sps:$4 sm:$0xff]   ;;  %v8994_v33 = vld [vmem:[%s12121_s2 + $0x70] ss:$8 sps:$4 sm:$0xff]  }
 0x48c   : > { %3458 = vmatprep.subr.bf16.mxu1 %v8987_v2  ;;  %v7778_v23 = vcombine.low %v10360_v17, %v10370_v16  ;;  %v3159_v6 = vrot.slane %v3157_v28, 5  ;;  %v8998_v37 = vld [vmem:[%s12121_s2 + $0x100] ss:$8 sps:$4 sm:$0xff]   ;;  %v7747_v2 = vcombine.low %v10171_v52, %v10231_v63  ;;  %v9003_v15 = vld [vmem:[%s12121_s2 + $0x114] ss:$8 sps:$4 sm:$0xff]   ;;  %v7748_v63 = vcombine.low %v10245_v7, %v10249_v11 }
 0x48d   : > { %v3146_v29 = vsel %vm12253_vm8, %v3141_v30, %v3145_v49  ;;  %v9001_v21 = vld [vmem:[%s12121_s2 + $0x110] ss:$8 sps:$4 sm:$0xff]   ;;  %v9007_v13 = vld [vmem:[%s12121_s2 + $0x124] ss:$8 sps:$4 sm:$0xff]   ;;  %v9005_v52 = vld [vmem:[%s12121_s2 + $0x120] ss:$8 sps:$4 sm:$0xff]   ;;  %v7749_v11 = vcombine.low %v10260_v36, %v10262_v19  ;;  %v7750_v19 = vcombine.low %v10281_v34, %v10286_v22 }
 0x48e   : > { %3326 = vmatmul.mubr.bf16.gmra.mrb[12].mxu1 %v7729_v43  ;;  %v3160_v59 = vsel %vm12253_vm8, %v3155_v26, %v3159_v6  ;;  %v9010_v9 = vld [vmem:[%s12121_s2 + $0x134] ss:$8 sps:$4 sm:$0xff]   ;;  %v9008_v14 = vld [vmem:[%s12121_s2 + $0x130] ss:$8 sps:$4 sm:$0xff]   ;;  %v9012_v7 = vld [vmem:[%s12121_s2 + $0x140] ss:$8 sps:$4 sm:$0xff]  }
 0x48f   : > { %3459 = vmatpush1.bf16.msra.mxu1 %v8985_v47  ;;  %3335 = vmatprep.mubr.bf16.mxu1 %v12254_v18  ;;  %v7730_v58 = vcombine.low %v3146_v29, %v3160_v59  ;;  %v9014_v47 = vld [vmem:[%s12121_s2 + $0x144] ss:$8 sps:$4 sm:$0xff]   ;;  %v9017_v27 = vld [vmem:[%s12121_s2 + $0x154] ss:$8 sps:$4 sm:$0xff]   ;;  %v9015_v28 = vld [vmem:[%s12121_s2 + $0x150] ss:$8 sps:$4 sm:$0xff]  }
 0x490   : > { %3460 = vmatprep.subr.bf16.mxu1 %v8990_v25  ;;  %v9021_v43 = vld [vmem:[%s12121_s2 + $0x164] ss:$8 sps:$4 sm:$0xff]   ;;  %v9019_v36 = vld [vmem:[%s12121_s2 + $0x160] ss:$8 sps:$4 sm:$0xff]   ;;  %v9024_v25 = vld [vmem:[%s12121_s2 + $0x174] ss:$8 sps:$4 sm:$0xff]  }
 0x491   : > { %v9022_v30 = vld [vmem:[%s12121_s2 + $0x170] ss:$8 sps:$4 sm:$0xff]   ;;  %v9027_v26 = vld [vmem:[%s12121_s2 + $0x184] ss:$8 sps:$4 sm:$0xff]   ;;  %v9025_v34 = vld [vmem:[%s12121_s2 + $0x180] ss:$8 sps:$4 sm:$0xff]  }
 0x492   : > { %v9030_v22 = vld [vmem:[%s12121_s2 + $0x194] ss:$8 sps:$4 sm:$0xff]   ;;  %v9033_v49 = vld [vmem:[%s12121_s2 + $0x1a4] ss:$8 sps:$4 sm:$0xff]   ;;  %v9031_v6 = vld [vmem:[%s12121_s2 + $0x1a0] ss:$8 sps:$4 sm:$0xff]  }
 0x493   : > { %3461 = vmatpush1.bf16.msra.mxu1 %v8988_v42  ;;  %v9028_v42 = vld [vmem:[%s12121_s2 + $0x190] ss:$8 sps:$4 sm:$0xff]   ;;  %v9042_v51 = vld [vmem:[%s12121_s2 + $0x1d4] ss:$8 sps:$4 sm:$0xff]   ;;  %v9043_v29 = vld [vmem:[%s12121_s2 + $0x1e0] ss:$8 sps:$4 sm:$0xff]  }
 0x494   : > { %3462 = vmatprep.subr.bf16.mxu1 %v8993_v8  ;;  %v9034_v20 = vld [vmem:[%s12121_s2 + $0x1b0] ss:$8 sps:$4 sm:$0xff]   ;;  %v9037_v8 = vld [vmem:[%s12121_s2 + $0x1c0] ss:$8 sps:$4 sm:$0xff]   ;;  %v9048_v62 = vld [vmem:[%s12121_s2 + $0x1f4] ss:$8 sps:$4 sm:$0xff]  }
 0x495   : > { %v9040_v10 = vld [vmem:[%s12121_s2 + $0x1d0] ss:$8 sps:$4 sm:$0xff]   ;;  %v9050_v59 = vld [vmem:[%s12121_s2 + $0x200] ss:$8 sps:$4 sm:$0xff]   ;;  %v9055_v17 = vld [vmem:[%s12121_s2 + $0x214] ss:$8 sps:$4 sm:$0xff]  }
 0x496   : > { %3336 = vmatmul.mubr.bf16.gmra.mrb[16].mxu1 %v7730_v58  ;;  %v9046_v54 = vld [vmem:[%s12121_s2 + $0x1f0] ss:$8 sps:$4 sm:$0xff]   ;;  %v9057_v58 = vld [vmem:[%s12121_s2 + $0x220] ss:$8 sps:$4 sm:$0xff]  }
 0x497   : > { %3463 = vmatpush1.bf16.msra.mxu1 %v8991_v1  ;;  %3482 = vmatprep.mubr.bf16.mxu1 %v12254_v18  ;;  %v9049_v1 = vld [vmem:[#allocation3 + $0x8] ss:$8 sps:$4 sm:$0xff]  }
 0x498   : > { %3464 = vmatprep.subr.bf16.mxu1 %v8996_v0  ;;  %v9053_v16 = vld [vmem:[%s12121_s2 + $0x210] ss:$8 sps:$4 sm:$0xff]  }
 0x499   : > { %v3997_v0 = vld [vmem:[#allocation3 + $0x8] sm:$0xf] }
 0x49b   : > { %3465 = vmatpush1.bf16.msra.mxu1 %v8994_v33  ;;  %v3999_v33 = vld [vmem:[#allocation3 + $0x10] sm:$0xf] }
 0x49c   : > { %3691 = vmatprep.subr.bf16.mxu1 %v9000_v5  ;;  %v9056_v5 = vld [vmem:[#allocation3 + $0x18] ss:$8 sps:$4 sm:$0xff]  }
 0x49e   : > { %3483 = vmatmul.mubr.bf16.vlgmr.msra.gmra.mrb[4].mxu1 %v7747_v2  ;;  %v4014_v2 = vshrl.u32 %v3997_v0, 16 }
 0x49f   : > { %3692 = vmatpush1.bf16.msra.mxu1 %v8998_v37  ;;  %3492 = vmatprep.mubr.bf16.mxu1 %v12254_v18  ;;  %v9062_v37 = vld [vmem:[%s12121_s2 + $0x234] ss:$8 sps:$4 sm:$0xff]  }
 0x4a0   : > { %3693 = vmatprep.subr.bf16.mxu1 %v9003_v15  ;;  %v4017_v15 = vshll.u32 %v3997_v0, 16  ;;  %v9074_v0 = vld [vmem:[%s12121_s2 + $0x270] ss:$8 sps:$4 sm:$0xff]  }
 0x4a3   : > { %3694 = vmatpush1.bf16.msra.mxu1 %v9001_v21  ;;  %v4028_v21 = vshrl.u32 %v3999_v33, 16 }
 0x4a4   : > { %3695 = vmatprep.subr.bf16.mxu1 %v9007_v13  ;;  %v4031_v13 = vshll.u32 %v3999_v33, 16 }
 0x4a6   : > { %3493 = vmatmul.mubr.bf16.gmra.mrb[8].mxu1 %v7748_v63  ;;  %v9066_v63 = vld [vmem:[%s12121_s2 + $0x244] ss:$8 sps:$4 sm:$0xff]  }
 0x4a7   : > { %3696 = vmatpush1.bf16.msra.mxu1 %v9005_v52  ;;  %3502 = vmatprep.mubr.bf16.mxu1 %v12254_v18  ;;  %v9060_v52 = vld [vmem:[%s12121_s2 + $0x230] ss:$8 sps:$4 sm:$0xff]  }
 0x4a8   : > { %3697 = vmatprep.subr.bf16.mxu1 %v9010_v9  ;;  %v4016_v9 = vrot.slane %v4014_v2, 4 }
 0x4ab   : > { %3698 = vmatpush1.bf16.msra.mxu1 %v9008_v14  ;;  %v4019_v14 = vrot.slane %v4017_v15, 5 }
 0x4ac   : > { %3699 = vmatprep.subr.bf16.mxu1 %v9014_v47  ;;  %v4030_v47 = vrot.slane %v4028_v21, 4  ;;  %v9079_v21 = vld [vmem:[%s12121_s2 + $0x284] ss:$8 sps:$4 sm:$0xff]  }
 0x4ae   : > { %3503 = vmatmul.mubr.bf16.gmra.mrb[12].mxu1 %v7749_v11  ;;  %v9064_v11 = vld [vmem:[%s12121_s2 + $0x240] ss:$8 sps:$4 sm:$0xff]  }
 0x4af   : > { %3700 = vmatpush1.bf16.msra.mxu1 %v9012_v7  ;;  %3512 = vmatprep.mubr.bf16.mxu1 %v12254_v18  ;;  %v4033_v7 = vrot.slane %v4031_v13, 5 }
 0x4b0   : > { %3701 = vmatprep.subr.bf16.mxu1 %v9017_v27  ;;  %v9069_v27 = vld [vmem:[%s12121_s2 + $0x254] ss:$8 sps:$4 sm:$0xff]  }
 0x4b3   : > { %3702 = vmatpush1.bf16.msra.mxu1 %v9015_v28  ;;  %v9063_v28 = vld [vmem:[#allocation3 + $0x28] ss:$8 sps:$4 sm:$0xff]  }
 0x4b4   : > { %3703 = vmatprep.subr.bf16.mxu1 %v9021_v43  ;;  %v4001_v43 = vld [vmem:[#allocation3 + $0x18] sm:$0xf] }
 0x4b6   : > { %3513 = vmatmul.mubr.bf16.gmra.mrb[16].mxu1 %v7750_v19  ;;  %v10554_v19 = vld [vmem:[#allocation3 + $0xc] sm:$0x1] }
 0x4b7   : > { %3704 = vmatpush1.bf16.msra.mxu1 %v9019_v36  ;;  %3723 = vmatprep.mubr.bf16.mxu1 %v12254_v18  ;;  %v4003_v36 = vld [vmem:[#allocation3 + $0x20] sm:$0xf] }
 0x4b8   : > { %3705 = vmatprep.subr.bf16.mxu1 %v9024_v25  ;;  %v10556_v25 = vld [vmem:[#allocation3 + $0x14] sm:$0x1] }
 0x4bb   : > { %3706 = vmatpush1.bf16.msra.mxu1 %v9022_v30  ;;  %v4020_v30 = vor.u32 %v4019_v14, %v4016_v9 }
 0x4bc   : > { %3908 = vmatprep.subr.bf16.mxu1 %v9027_v26  ;;  %v4034_v26 = vor.u32 %v4033_v7, %v4030_v47 }
 0x4be   : > { %3724 = vmatmul.mubr.bf16.vlgmr.msra.gmra.mrb[4].mxu1 %v7775_v60  ;;  %v9039_v60 = vld [vmem:[%s12121_s2 + $0x1c4] ss:$8 sps:$4 sm:$0xff]  }
 0x4bf   : > { %3909 = vmatpush1.bf16.msra.mxu1 %v9025_v34  ;;  %3733 = vmatprep.mubr.bf16.mxu1 %v12254_v18  ;;  %v9067_v34 = vld [vmem:[%s12121_s2 + $0x250] ss:$8 sps:$4 sm:$0xff]  }
 0x4c0   : > { %3910 = vmatprep.subr.bf16.mxu1 %v9030_v22  ;;  %v4042_v22 = vshrl.u32 %v4001_v43, 16 }
 0x4c3   : > { %3911 = vmatpush1.bf16.msra.mxu1 %v9028_v42  ;;  %v4045_v42 = vshll.u32 %v4001_v43, 16  ;;  %v9082_v43 = vld [vmem:[%s12121_s2 + $0x294] ss:$8 sps:$4 sm:$0xff]  }
 0x4c4   : > { %3912 = vmatprep.subr.bf16.mxu1 %v9033_v49  ;;  %v4056_v49 = vshrl.u32 %v4003_v36, 16 }
 0x4c6   : > { %3734 = vmatmul.mubr.bf16.gmra.mrb[8].mxu1 %v7776_v12  ;;  %v9045_v12 = vld [vmem:[%s12121_s2 + $0x1e4] ss:$8 sps:$4 sm:$0xff]  }
 0x4c7   : > { %3913 = vmatpush1.bf16.msra.mxu1 %v9031_v6  ;;  %3743 = vmatprep.mubr.bf16.mxu1 %v12254_v18  ;;  %v4059_v6 = vshll.u32 %v4003_v36, 16 }
 0x4c8   : > { %3914 = vmatprep.subr.bf16.mxu1 %v9036_v24  ;;  %v9073_v24 = vld [vmem:[%s12121_s2 + $0x264] ss:$8 sps:$4 sm:$0xff]  }
 0x4cb   : > { %3915 = vmatpush1.bf16.msra.mxu1 %v9034_v20  ;;  %v4023_v20 = vshll.u32 %v10554_v19, 16 }
 0x4cc   : > { %3916 = vmatprep.subr.bf16.mxu1 %v9039_v60  ;;  %v4037_v60 = vshll.u32 %v10556_v25, 16 }
 0x4ce   : > { %3744 = vmatmul.mubr.bf16.gmra.mrb[12].mxu1 %v7777_v41  ;;  %v9052_v41 = vld [vmem:[%s12121_s2 + $0x204] ss:$8 sps:$4 sm:$0xff]  }
 0x4cf   : > { %3917 = vmatpush1.bf16.msra.mxu1 %v9037_v8  ;;  %3753 = vmatprep.mubr.bf16.mxu1 %v12254_v18  ;;  %v4021_v8 = vrot.slane %v4020_v30, 4 }
 0x4d0   : > { %3918 = vmatprep.subr.bf16.mxu1 %v9042_v51  ;;  %v4035_v51 = vrot.slane %v4034_v26, 4 }
 0x4d3   : > { %3919 = vmatpush1.bf16.msra.mxu1 %v9040_v10  ;;  %v9071_v10 = vld [vmem:[%s12121_s2 + $0x260] ss:$8 sps:$4 sm:$0xff]  }
 0x4d4   : > { %3920 = vmatprep.subr.bf16.mxu1 %v9045_v12  ;;  %v4044_v12 = vrot.slane %v4042_v22, 4 }
 0x4d6   : > { %3754 = vmatmul.mubr.bf16.gmra.mrb[16].mxu1 %v7778_v23  ;;  %v9059_v23 = vld [vmem:[%s12121_s2 + $0x224] ss:$8 sps:$4 sm:$0xff]  }
 0x4d7   : > { %3921 = vmatpush1.bf16.msra.mxu1 %v9043_v29  ;;  %3940 = vmatprep.mubr.bf16.mxu1 %v12254_v18  ;;  %v4047_v29 = vrot.slane %v4045_v42, 5 }
 0x4d8   : > { %3922 = vmatprep.subr.bf16.mxu1 %v9048_v62  ;;  %v4058_v62 = vrot.slane %v4056_v49, 4  ;;  %v4009_v49 = vld [vmem:[#allocation3 + $0x38] sm:$0xf] }
 0x4d9   : > { %v4048_v2 = vor.u32 %v4047_v29, %v4044_v12 }
 0x4db   : > { %3923 = vmatpush1.bf16.msra.mxu1 %v9046_v54  ;;  %v4061_v54 = vrot.slane %v4059_v6, 5  ;;  %v4011_v6 = vld [vmem:[#allocation3 + $0x40] sm:$0xf] }
 0x4dc   : > { %4237 = vmatprep.subr.bf16.mxu1 %v9052_v41  ;;  %v9070_v41 = vld [vmem:[#allocation3 + $0x38] ss:$8 sps:$4 sm:$0xff]  }
 0x4dd   : > { %v4062_v15 = vor.u32 %v4061_v54, %v4058_v62  ;;  %v4098_v62 = vshrl.u32 %v4009_v49, 16  ;;  %v4101_v54 = vshll.u32 %v4009_v49, 16 }
 0x4de   : > { %3941 = vmatmul.mubr.bf16.vlgmr.msra.gmra.mrb[4].mxu1 %v9049_v1  ;;  %v4025_v1 = vrot.slane %v4023_v20, 5 }
 0x4df   : > { %4238 = vmatpush1.bf16.msra.mxu1 %v9050_v59  ;;  %3950 = vmatprep.mubr.bf16.mxu1 %v12254_v18  ;;  %v9076_v59 = vld [vmem:[%s12121_s2 + $0x274] ss:$8 sps:$4 sm:$0xff]  }
 0x4e0   : > { %4239 = vmatprep.subr.bf16.mxu1 %v9055_v17  ;;  %v4039_v17 = vrot.slane %v4037_v60, 5 }
 0x4e2   : > { %v4040_v33 = vsel %vm12253_vm8, %v4035_v51, %v4039_v17  ;;  %v10607_v51 = vld [vmem:[#allocation3 + $0x2c] sm:$0x1] }
 0x4e3   : > { %4240 = vmatpush1.bf16.msra.mxu1 %v9053_v16  ;;  %v4005_v16 = vld [vmem:[#allocation3 + $0x28] sm:$0xf]  ;;  %v4079_v17 = vshll.u32 %v10607_v51, 16 }
 0x4e4   : > { %4241 = vmatprep.subr.bf16.mxu1 %v9059_v23  ;;  %v4007_v23 = vld [vmem:[#allocation3 + $0x30] sm:$0xf]  ;;  %v4070_v13 = vshrl.u32 %v4005_v16, 16 }
 0x4e5   : > { %v4087_v9 = vshll.u32 %v4007_v23, 16 }
 0x4e6   : > { %3951 = vmatmul.mubr.bf16.gmra.mrb[8].mxu1 %v9056_v5  ;;  %v10581_v5 = vld [vmem:[#allocation3 + $0x1c] sm:$0x1]  ;;  %v4072_v36 = vrot.slane %v4070_v13, 4 }
 0x4e7   : > { %4242 = vmatpush1.bf16.msra.mxu1 %v9057_v58  ;;  %3960 = vmatprep.mubr.bf16.mxu1 %v12254_v18  ;;  %v4026_v58 = vsel %vm12253_vm8, %v4021_v8, %v4025_v1  ;;  %v4051_v14 = vshll.u32 %v10581_v5, 16  ;;  %v9085_v8 = vld [vmem:[%s12121_s2 + $0x2a4] ss:$8 sps:$4 sm:$0xff]   ;;  %v9083_v1 = vld [vmem:[%s12121_s2 + $0x2a0] ss:$8 sps:$4 sm:$0xff]  }
 0x4e8   : > { %4243 = vmatprep.subr.bf16.mxu1 %v9062_v37  ;;  %v10583_v37 = vld [vmem:[#allocation3 + $0x24] sm:$0x1]  ;;  %v7815_v7 = vcombine.low %v4026_v58, %v4040_v33 }
 0x4e9   : > { %v4065_v47 = vshll.u32 %v10583_v37, 16  ;;  %v4053_v22 = vrot.slane %v4051_v14, 5  ;;  %v9088_v58 = vld [vmem:[%s12121_s2 + $0x2b4] ss:$8 sps:$4 sm:$0xff]   ;;  %v9091_v14 = vld [vmem:[%s12121_s2 + $0x2c4] ss:$8 sps:$4 sm:$0xff]  }
 0x4eb   : > { %4244 = vmatpush1.bf16.msra.mxu1 %v9060_v52  ;;  %v4073_v52 = vshll.u32 %v4005_v16, 16  ;;  %v4067_v42 = vrot.slane %v4065_v47, 5  ;;  %v10626_v47 = vld [vmem:[#allocation3 + $0x3c] sm:$0x1] }
 0x4ec   : > { %4245 = vmatprep.subr.bf16.mxu1 %v9066_v63  ;;  %v4084_v63 = vshrl.u32 %v4007_v23, 16 }
 0x4ed   : > { %v4075_v30 = vrot.slane %v4073_v52, 5  ;;  %v9086_v52 = vld [vmem:[%s12121_s2 + $0x2b0] ss:$8 sps:$4 sm:$0xff]  }
 0x4ee   : > { %3961 = vmatmul.mubr.bf16.gmra.mrb[12].mxu1 %v9063_v28  ;;  %v4063_v28 = vrot.slane %v4062_v15, 4  ;;  %v4086_v26 = vrot.slane %v4084_v63, 4  ;;  %v4103_v15 = vrot.slane %v4101_v54, 5  ;;  %v4081_v63 = vrot.slane %v4079_v17, 5  ;;  %v9095_v54 = vld [vmem:[%s12121_s2 + $0x2e0] ss:$8 sps:$4 sm:$0xff]  }
 0x4ef   : > { %4246 = vmatpush1.bf16.msra.mxu1 %v9064_v11  ;;  %3970 = vmatprep.mubr.bf16.mxu1 %v12254_v18  ;;  %v9077_v11 = vld [vmem:[%s12121_s2 + $0x280] ss:$8 sps:$4 sm:$0xff]   ;;  %v4076_v12 = vor.u32 %v4075_v30, %v4072_v36  ;;  %v4107_v30 = vshll.u32 %v10626_v47, 16  ;;  %v4352_v17 = vrot.slane %v10554_v19, 5 }
 0x4f0   : > { %4247 = vmatprep.subr.bf16.mxu1 %v9069_v27  ;;  %v4049_v27 = vrot.slane %v4048_v2, 4  ;;  %v4068_v60 = vsel %vm12253_vm8, %v4063_v28, %v4067_v42  ;;  %v4100_v2 = vrot.slane %v4098_v62, 4  ;;  %v9089_v36 = vld [vmem:[%s12121_s2 + $0x2c0] ss:$8 sps:$4 sm:$0xff]  }
 0x4f1   : > { %v4327_v62 = vld [vmem:[#allocation3 + $0x10] sm:$0xe] }
 0x4f2   : > { %v4054_v20 = vsel %vm12253_vm8, %v4049_v27, %v4053_v22  ;;  %v4104_v28 = vor.u32 %v4103_v15, %v4100_v2  ;;  %v9094_v22 = vld [vmem:[%s12121_s2 + $0x2d4] ss:$8 sps:$4 sm:$0xff]   ;;  %v4329_v2 = vld [vmem:[#allocation3 + $0x20] sm:$0xe]  ;;  %v9101_v15 = vld [vmem:[%s12121_s2 + $0x300] ss:$8 sps:$4 sm:$0xff]  }
 0x4f3   : > { %4248 = vmatpush1.bf16.msra.mxu1 %v9067_v34  ;;  %v4089_v34 = vrot.slane %v4087_v9, 5  ;;  %v7816_v23 = vcombine.low %v4054_v20, %v4068_v60  ;;  %v9097_v60 = vld [vmem:[%s12121_s2 + $0x2e4] ss:$8 sps:$4 sm:$0xff]  }
 0x4f4   : > { %4249 = vmatprep.subr.bf16.mxu1 %v9073_v24  ;;  %v9080_v24 = vld [vmem:[%s12121_s2 + $0x290] ss:$8 sps:$4 sm:$0xff]   ;;  %v4105_v42 = vrot.slane %v4104_v28, 4 }
 0x4f5   : > { %v4090_v29 = vor.u32 %v4089_v34, %v4086_v26 }
 0x4f6   : > { %3971 = vmatmul.mubr.bf16.gmra.mrb[16].mxu1 %v9070_v41  ;;  %v4112_v41 = vshrl.u32 %v4011_v6, 16 }
 0x4f7   : > { %4250 = vmatpush1.bf16.msra.mxu1 %v9071_v10  ;;  %4269 = vmatprep.mubr.bf16.mxu1 %v12254_v18  ;;  %v10609_v10 = vld [vmem:[#allocation3 + $0x34] sm:$0x1]  ;;  %v4091_v33 = vrot.slane %v4090_v29, 4  ;;  %v4326_v29 = vld [vmem:[#allocation3 + $0x8] sm:$0xe] }
 0x4f8   : > { %4251 = vmatprep.subr.bf16.mxu1 %v9076_v59  ;;  %v4115_v59 = vshll.u32 %v4011_v6, 16  ;;  %v4093_v16 = vshll.u32 %v10609_v10, 16  ;;  %v9092_v6 = vld [vmem:[%s12121_s2 + $0x2d0] ss:$8 sps:$4 sm:$0xff]  }
 0x4fa   : > { %v4117_v13 = vrot.slane %v4115_v59, 5  ;;  %v4095_v9 = vrot.slane %v4093_v16, 5  ;;  %v9100_v59 = vld [vmem:[%s12121_s2 + $0x2f4] ss:$8 sps:$4 sm:$0xff]   ;;  %v7836_v16 = vrot.slane %v4327_v62, 9 }
 0x4fb   : > { %4252 = vmatpush1.bf16.msra.mxu1 %v9074_v0  ;;  %v4077_v0 = vrot.slane %v4076_v12, 4 }
 0x4fc   : > { %4494 = vmatprep.subr.bf16.mxu1 %v9079_v21  ;;  %v4114_v21 = vrot.slane %v4112_v41, 4  ;;  %v4096_v27 = vsel %vm12253_vm8, %v4091_v33, %v4095_v9  ;;  %v7838_v9 = vrot.slane %v4329_v2, 9  ;;  %v9131_v2 = vld [vmem:[%s12121_s2 + $0x394] ss:$8 sps:$4 sm:$0xff]  }
 0x4fe   : > { %4270 = vmatmul.mubr.bf16.vlgmr.msra.gmra.mrb[4].mxu1 %v7815_v7  ;;  %v10628_v7 = vld [vmem:[#allocation3 + $0x44] sm:$0x1] }
 0x4ff   : > { %4495 = vmatpush1.bf16.msra.mxu1 %v9077_v11  ;;  %4279 = vmatprep.mubr.bf16.mxu1 %v12254_v18  ;;  %v4082_v11 = vsel %vm12253_vm8, %v4077_v0, %v4081_v63  ;;  %v4121_v26 = vshll.u32 %v10628_v7, 16  ;;  %v9103_v0 = vld [vmem:[%s12121_s2 + $0x304] ss:$8 sps:$4 sm:$0xff]   ;;  %v4360_v63 = vrot.slane %v10581_v5, 5 }
 0x500   : > { %4496 = vmatprep.subr.bf16.mxu1 %v9082_v43  ;;  %v4118_v43 = vor.u32 %v4117_v13, %v4114_v21  ;;  %v7817_v34 = vcombine.low %v4082_v11, %v4096_v27  ;;  %v9106_v13 = vld [vmem:[%s12121_s2 + $0x314] ss:$8 sps:$4 sm:$0xff]   ;;  %v9104_v11 = vld [vmem:[%s12121_s2 + $0x310] ss:$8 sps:$4 sm:$0xff]   ;;  %v9109_v27 = vld [vmem:[%s12121_s2 + $0x324] ss:$8 sps:$4 sm:$0xff]  }
 0x501   : > { %v4123_v20 = vrot.slane %v4121_v26, 5  ;;  %v9112_v26 = vld [vmem:[%s12121_s2 + $0x334] ss:$8 sps:$4 sm:$0xff]  }
 0x502   : > { %v4119_v49 = vrot.slane %v4118_v43, 4  ;;  %v4331_v43 = vld [vmem:[#allocation3 + $0x30] sm:$0xe] }
 0x503   : > { %4497 = vmatpush1.bf16.msra.mxu1 %v9080_v24  ;;  %v4109_v24 = vrot.slane %v4107_v30, 5 }
 0x504   : > { %4498 = vmatprep.subr.bf16.mxu1 %v9085_v8  ;;  %v4124_v12 = vsel %vm12253_vm8, %v4119_v49, %v4123_v20  ;;  %v4372_v49 = vrot.slane %v10609_v10, 5  ;;  %v4332_v10 = vld [vmem:[#allocation3 + $0x38] sm:$0xe] }
 0x505   : > { %v4110_v8 = vsel %vm12253_vm8, %v4105_v42, %v4109_v24  ;;  %v7840_v42 = vrot.slane %v4331_v43, 9  ;;  %v9115_v24 = vld [vmem:[%s12121_s2 + $0x344] ss:$8 sps:$4 sm:$0xff]   ;;  %v7841_v62 = vrot.slane %v4332_v10, 9 }
 0x506   : > { %4280 = vmatmul.mubr.bf16.gmra.mrb[8].mxu1 %v7816_v23  ;;  %v7818_v41 = vcombine.low %v4110_v8, %v4124_v12  ;;  %v4356_v23 = vrot.slane %v10556_v25, 5  ;;  %v4328_v25 = vld [vmem:[#allocation3 + $0x18] sm:$0xe]  ;;  %v9149_v10 = vld [vmem:[%s12121_s2 + $0x3e4] ss:$8 sps:$4 sm:$0xff]  }
 0x507   : > { %4499 = vmatpush1.bf16.msra.mxu1 %v9083_v1  ;;  %4289 = vmatprep.mubr.bf16.mxu1 %v12254_v18  ;;  %v7835_v1 = vrot.slane %v4326_v29, 9  ;;  %v9113_v8 = vld [vmem:[%s12121_s2 + $0x340] ss:$8 sps:$4 sm:$0xff]   ;;  %v9118_v29 = vld [vmem:[%s12121_s2 + $0x354] ss:$8 sps:$4 sm:$0xff]  }
 0x508   : > { %4500 = vmatprep.subr.bf16.mxu1 %v9088_v58  ;;  %v9098_v58 = vld [vmem:[%s12121_s2 + $0x2f0] ss:$8 sps:$4 sm:$0xff]   ;;  %v4357_v19 = vsel %vm12255_vm10, %v7836_v16, %v4356_v23 }
 0x509   : > { %v4353_v33 = vsel %vm12255_vm10, %v7835_v1, %v4352_v17  ;;  %v9116_v1 = vld [vmem:[%s12121_s2 + $0x350] ss:$8 sps:$4 sm:$0xff]   ;;  %v9121_v17 = vld [vmem:[%s12121_s2 + $0x364] ss:$8 sps:$4 sm:$0xff]  }
 0x50a   : > { %v7843_v21 = vcombine.low %v4353_v33, %v4357_v19  ;;  %v9128_v33 = vld [vmem:[%s12121_s2 + $0x384] ss:$8 sps:$4 sm:$0xff]   ;;  %v9126_v19 = vld [vmem:[%s12121_s2 + $0x380] ss:$8 sps:$4 sm:$0xff]  }
 0x50b   : > { %4501 = vmatpush1.bf16.msra.mxu1 %v9086_v52  ;;  %v7837_v52 = vrot.slane %v4328_v25, 9  ;;  %v9125_v25 = vld [vmem:[#allocation3 + $0x10] ss:$8 sps:$4 sm:$0xff]  }
 0x50c   : > { %4502 = vmatprep.subr.bf16.mxu1 %v9091_v14  ;;  %v4364_v14 = vrot.slane %v10583_v37, 5  ;;  %v4330_v37 = vld [vmem:[#allocation3 + $0x28] sm:$0xe] }
 0x50d   : > { %v4361_v28 = vsel %vm12255_vm10, %v7837_v52, %v4360_v63  ;;  %v9132_v52 = vld [vmem:[#allocation3 + $0x20] ss:$8 sps:$4 sm:$0xff]   ;;  %v9138_v63 = vld [vmem:[%s12121_s2 + $0x3b4] ss:$8 sps:$4 sm:$0xff]  }
 0x50e   : > { %4290 = vmatmul.mubr.bf16.gmra.mrb[12].mxu1 %v7817_v34  ;;  %v4365_v5 = vsel %vm12255_vm10, %v7838_v9, %v4364_v14  ;;  %v7839_v34 = vrot.slane %v4330_v37, 9  ;;  %v4801_v9 = vld [vmem:[#allocation3 + $0x10] sm:$0xf]  ;;  %v4803_v14 = vld [vmem:[#allocation3 + $0x18] sm:$0xf] }
 0x50f   : > { %4503 = vmatpush1.bf16.msra.mxu1 %v9089_v36  ;;  %4299 = vmatprep.mubr.bf16.mxu1 %v12254_v18  ;;  %v9107_v36 = vld [vmem:[%s12121_s2 + $0x320] ss:$8 sps:$4 sm:$0xff]   ;;  %v7844_v30 = vcombine.low %v4361_v28, %v4365_v5  ;;  %v4818_v28 = vshrl.u32 %v4801_v9, 16  ;;  %v4821_v5 = vshll.u32 %v4801_v9, 16  ;;  %v4832_v37 = vshrl.u32 %v4803_v14, 16 }
 0x510   : > { %4504 = vmatprep.subr.bf16.mxu1 %v9094_v22  ;;  %v4368_v22 = vrot.slane %v10607_v51, 5  ;;  %v4373_v51 = vsel %vm12255_vm10, %v7840_v42, %v4372_v49  ;;  %v4835_v43 = vshll.u32 %v4803_v14, 16  ;;  %v9155_v9 = vld [vmem:[%s12121_s2 + $0x404] ss:$8 sps:$4 sm:$0xff]   ;;  %v10804_v14 = vld [vmem:[#allocation3 + $0x2c] sm:$0x1] }
 0x511   : > { %v4834_v42 = vrot.slane %v4832_v37, 4 }
 0x512   : > { %v4369_v20 = vsel %vm12255_vm10, %v7839_v34, %v4368_v22  ;;  %v4820_v34 = vrot.slane %v4818_v28, 4  ;;  %v4823_v22 = vrot.slane %v4821_v5, 5  ;;  %v4837_v49 = vrot.slane %v4835_v43, 5 }
 0x513   : > { %4505 = vmatpush1.bf16.msra.mxu1 %v9092_v6  ;;  %v9110_v6 = vld [vmem:[%s12121_s2 + $0x330] ss:$8 sps:$4 sm:$0xff]   ;;  %v7845_v12 = vcombine.low %v4369_v20, %v4373_v51  ;;  %v10778_v51 = vld [vmem:[#allocation3 + $0x14] sm:$0x1] }
 0x514   : > { %4506 = vmatprep.subr.bf16.mxu1 %v9097_v60  ;;  %v4333_v60 = vld [vmem:[#allocation3 + $0x40] sm:$0xe] }
 0x515   : > { %v9143_v20 = vld [vmem:[%s12121_s2 + $0x3d0] ss:$8 sps:$4 sm:$0xff]  }
 0x516   : > { %4300 = vmatmul.mubr.bf16.gmra.mrb[16].mxu1 %v7818_v41  ;;  %v7842_v41 = vrot.slane %v4333_v60, 9  ;;  %v10783_v60 = vld [vmem:[#allocation3 + $0x1c] sm:$0x1] }
 0x517   : > { %4507 = vmatpush1.bf16.msra.mxu1 %v9095_v54  ;;  %4526 = vmatprep.mubr.bf16.mxu1 %v12254_v18  ;;  %v4376_v54 = vrot.slane %v10626_v47, 5  ;;  %v5160_v35 = vrot.slane %v10783_v60, 5 }
 0x518   : > { %4508 = vmatprep.subr.bf16.mxu1 %v9100_v59  ;;  %v4380_v59 = vrot.slane %v10628_v7, 5  ;;  %v9119_v7 = vld [vmem:[%s12121_s2 + $0x360] ss:$8 sps:$4 sm:$0xff]  }
 0x519   : > { %v4377_v16 = vsel %vm12255_vm10, %v7841_v62, %v4376_v54  ;;  %v4838_v62 = vor.u32 %v4837_v49, %v4834_v42  ;;  %v9158_v42 = vld [vmem:[%s12121_s2 + $0x414] ss:$8 sps:$4 sm:$0xff]  }
 0x51a   : > { %v4381_v47 = vsel %vm12255_vm10, %v7842_v41, %v4380_v59  ;;  %v4827_v59 = vshll.u32 %v10778_v51, 16 }
 0x51b   : > { %4509 = vmatpush1.bf16.msra.mxu1 %v9098_v58  ;;  %v7846_v23 = vcombine.low %v4377_v16, %v4381_v47  ;;  %v9124_v58 = vld [vmem:[%s12121_s2 + $0x374] ss:$8 sps:$4 sm:$0xff]   ;;  %v4841_v16 = vshll.u32 %v10783_v60, 16 }
 0x51c   : > { %4712 = vmatprep.subr.bf16.mxu1 %v9103_v0  ;;  %v9122_v0 = vld [vmem:[%s12121_s2 + $0x370] ss:$8 sps:$4 sm:$0xff]   ;;  %v9152_v47 = vld [vmem:[%s12121_s2 + $0x3f4] ss:$8 sps:$4 sm:$0xff]  }
 0x51e   : > { %4527 = vmatmul.mubr.bf16.vlgmr.msra.gmra.mrb[4].mxu1 %v7843_v21  ;;  %v9135_v21 = vld [vmem:[%s12121_s2 + $0x3a4] ss:$8 sps:$4 sm:$0xff]  }
 0x51f   : > { %4713 = vmatpush1.bf16.msra.mxu1 %v9101_v15  ;;  %4536 = vmatprep.mubr.bf16.mxu1 %v12254_v18  ;;  %v9129_v15 = vld [vmem:[%s12121_s2 + $0x390] ss:$8 sps:$4 sm:$0xff]  }
 0x520   : > { %4714 = vmatprep.subr.bf16.mxu1 %v9106_v13  ;;  %v9133_v13 = vld [vmem:[%s12121_s2 + $0x3a0] ss:$8 sps:$4 sm:$0xff]  }
 0x523   : > { %4715 = vmatpush1.bf16.msra.mxu1 %v9104_v11  ;;  %v9136_v11 = vld [vmem:[%s12121_s2 + $0x3b0] ss:$8 sps:$4 sm:$0xff]  }
 0x524   : > { %4716 = vmatprep.subr.bf16.mxu1 %v9109_v27  ;;  %v9142_v27 = vld [vmem:[%s12121_s2 + $0x3c4] ss:$8 sps:$4 sm:$0xff]  }
 0x526   : > { %4537 = vmatmul.mubr.bf16.gmra.mrb[8].mxu1 %v7844_v30  ;;  %v9139_v30 = vld [vmem:[#allocation3 + $0x30] ss:$8 sps:$4 sm:$0xff]  }
 0x527   : > { %4717 = vmatpush1.bf16.msra.mxu1 %v9107_v36  ;;  %4546 = vmatprep.mubr.bf16.mxu1 %v12254_v18  ;;  %v9140_v36 = vld [vmem:[%s12121_s2 + $0x3c0] ss:$8 sps:$4 sm:$0xff]  }
 0x528   : > { %4718 = vmatprep.subr.bf16.mxu1 %v9112_v26  ;;  %v9145_v26 = vld [vmem:[%s12121_s2 + $0x3d4] ss:$8 sps:$4 sm:$0xff]  }
 0x52b   : > { %4719 = vmatpush1.bf16.msra.mxu1 %v9110_v6  ;;  %v4805_v6 = vld [vmem:[#allocation3 + $0x20] sm:$0xf] }
 0x52c   : > { %4720 = vmatprep.subr.bf16.mxu1 %v9115_v24  ;;  %v4807_v24 = vld [vmem:[#allocation3 + $0x28] sm:$0xf] }
 0x52d   : > { %v4860_v54 = vshrl.u32 %v4807_v24, 16  ;;  %v4863_v41 = vshll.u32 %v4807_v24, 16  ;;  %v4815_v24 = vld [vmem:[#allocation3 + $0x48] sm:$0xf] }
 0x52e   : > { %4547 = vmatmul.mubr.bf16.gmra.mrb[12].mxu1 %v7845_v12  ;;  %v4846_v12 = vshrl.u32 %v4805_v6, 16 }
 0x52f   : > { %4721 = vmatpush1.bf16.msra.mxu1 %v9113_v8  ;;  %4556 = vmatprep.mubr.bf16.mxu1 %v12254_v18  ;;  %v4824_v8 = vor.u32 %v4823_v22, %v4820_v34  ;;  %v4869_v34 = vshll.u32 %v10804_v14, 16 }
 0x530   : > { %4722 = vmatprep.subr.bf16.mxu1 %v9118_v29  ;;  %v4849_v29 = vshll.u32 %v4805_v6, 16 }
 0x533   : > { %4723 = vmatpush1.bf16.msra.mxu1 %v9116_v1  ;;  %v9146_v1 = vld [vmem:[#allocation3 + $0x40] ss:$8 sps:$4 sm:$0xff]  }
 0x534   : > { %4724 = vmatprep.subr.bf16.mxu1 %v9121_v17  ;;  %v9147_v17 = vld [vmem:[%s12121_s2 + $0x3e0] ss:$8 sps:$4 sm:$0xff]  }
 0x536   : > { %4557 = vmatmul.mubr.bf16.gmra.mrb[16].mxu1 %v7846_v23  ;;  %v4848_v23 = vrot.slane %v4846_v12, 4 }
 0x537   : > { %4725 = vmatpush1.bf16.msra.mxu1 %v9119_v7  ;;  %4744 = vmatprep.mubr.bf16.mxu1 %v12254_v18  ;;  %v4825_v7 = vrot.slane %v4824_v8, 4 }
 0x538   : > { %4726 = vmatprep.subr.bf16.mxu1 %v9124_v58  ;;  %v4851_v58 = vrot.slane %v4849_v29, 5  ;;  %v4813_v29 = vld [vmem:[#allocation3 + $0x40] sm:$0xf] }
 0x53b   : > { %4727 = vmatpush1.bf16.msra.mxu1 %v9122_v0  ;;  %v4839_v0 = vrot.slane %v4838_v62, 4 }
 0x53c   : > { %5041 = vmatprep.subr.bf16.mxu1 %v9128_v33  ;;  %v4862_v33 = vrot.slane %v4860_v54, 4  ;;  %v9156_v54 = vld [vmem:[%s12121_s2 + $0x410] ss:$8 sps:$4 sm:$0xff]  }
 0x53e   : > { %4745 = vmatmul.mubr.bf16.vlgmr.msra.gmra.mrb[4].mxu1 %v9125_v25  ;;  %v4809_v25 = vld [vmem:[#allocation3 + $0x30] sm:$0xf] }
 0x53f   : > { %5042 = vmatpush1.bf16.msra.mxu1 %v9126_v19  ;;  %4754 = vmatprep.mubr.bf16.mxu1 %v12254_v18  ;;  %v4865_v19 = vrot.slane %v4863_v41, 5  ;;  %v4877_v28 = vshll.u32 %v4809_v25, 16  ;;  %v4871_v41 = vrot.slane %v4869_v34, 5  ;;  %v10848_v34 = vld [vmem:[#allocation3 + $0x4c] sm:$0x1] }
 0x540   : > { %5043 = vmatprep.subr.bf16.mxu1 %v9131_v2  ;;  %v4829_v2 = vrot.slane %v4827_v59, 5  ;;  %v10820_v59 = vld [vmem:[#allocation3 + $0x34] sm:$0x1] }
 0x541   : > { %v4866_v37 = vor.u32 %v4865_v19, %v4862_v33  ;;  %v4905_v19 = vshll.u32 %v4813_v29, 16 }
 0x543   : > { %5044 = vmatpush1.bf16.msra.mxu1 %v9129_v15  ;;  %v4811_v15 = vld [vmem:[#allocation3 + $0x38] sm:$0xf] }
 0x544   : > { %5045 = vmatprep.subr.bf16.mxu1 %v9135_v21  ;;  %v9150_v21 = vld [vmem:[%s12121_s2 + $0x3f0] ss:$8 sps:$4 sm:$0xff]   ;;  %v4888_v43 = vshrl.u32 %v4811_v15, 16 }
 0x546   : > { %4755 = vmatmul.mubr.bf16.gmra.mrb[8].mxu1 %v9132_v52  ;;  %v10797_v52 = vld [vmem:[#allocation3 + $0x24] sm:$0x1]  ;;  %v4890_v8 = vrot.slane %v4888_v43, 4 }
 0x547   : > { %5046 = vmatpush1.bf16.msra.mxu1 %v9133_v13  ;;  %4764 = vmatprep.mubr.bf16.mxu1 %v12254_v18  ;;  %v4843_v13 = vrot.slane %v4841_v16, 5  ;;  %v9161_v16 = vld [vmem:[%s12121_s2 + $0x424] ss:$8 sps:$4 sm:$0xff]  }
 0x548   : > { %5047 = vmatprep.subr.bf16.mxu1 %v9138_v63  ;;  %v4830_v63 = vsel %vm12253_vm8, %v4825_v7, %v4829_v2  ;;  %v4902_v7 = vshrl.u32 %v4813_v29, 16  ;;  %v4883_v2 = vshll.u32 %v10820_v59, 16 }
 0x549   : > { %v4844_v5 = vsel %vm12253_vm8, %v4839_v0, %v4843_v13  ;;  %v9164_v13 = vld [vmem:[%s12121_s2 + $0x434] ss:$8 sps:$4 sm:$0xff]  }
 0x54a   : > { %v7883_v22 = vcombine.low %v4830_v63, %v4844_v5  ;;  %v4907_v5 = vrot.slane %v4905_v19, 5  ;;  %v4885_v43 = vrot.slane %v4883_v2, 5  ;;  %v9176_v19 = vld [vmem:[%s12121_s2 + $0x474] ss:$8 sps:$4 sm:$0xff]   ;;  %v5156_v2 = vrot.slane %v10778_v51, 5 }
 0x54b   : > { %5048 = vmatpush1.bf16.msra.mxu1 %v9136_v11  ;;  %v4852_v11 = vor.u32 %v4851_v58, %v4848_v23  ;;  %v4919_v23 = vshll.u32 %v4815_v24, 16  ;;  %v5133_v51 = vld [vmem:[#allocation3 + $0x28] sm:$0xe] }
 0x54c   : > { %5049 = vmatprep.subr.bf16.mxu1 %v9142_v27  ;;  %v4874_v27 = vshrl.u32 %v4809_v25, 16  ;;  %v9159_v25 = vld [vmem:[%s12121_s2 + $0x420] ss:$8 sps:$4 sm:$0xff]  }
 0x54d   : > { %v4853_v49 = vrot.slane %v4852_v11, 4 }
 0x54e   : > { %4765 = vmatmul.mubr.bf16.gmra.mrb[12].mxu1 %v9139_v30  ;;  %v4855_v30 = vshll.u32 %v10797_v52, 16  ;;  %v4876_v6 = vrot.slane %v4874_v27, 4 }
 0x54f   : > { %5050 = vmatpush1.bf16.msra.mxu1 %v9140_v36  ;;  %4774 = vmatprep.mubr.bf16.mxu1 %v12254_v18  ;;  %v4891_v36 = vshll.u32 %v4811_v15, 16 }
 0x550   : > { %5051 = vmatprep.subr.bf16.mxu1 %v9145_v26  ;;  %v9153_v26 = vld [vmem:[%s12121_s2 + $0x400] ss:$8 sps:$4 sm:$0xff]   ;;  %v4857_v62 = vrot.slane %v4855_v30, 5  ;;  %v9167_v30 = vld [vmem:[%s12121_s2 + $0x444] ss:$8 sps:$4 sm:$0xff]  }
 0x551   : > { %v4893_v12 = vrot.slane %v4891_v36, 5 }
 0x553   : > { %5052 = vmatpush1.bf16.msra.mxu1 %v9143_v20  ;;  %v4867_v20 = vrot.slane %v4866_v37, 4  ;;  %v4894_v33 = vor.u32 %v4893_v12, %v4890_v8  ;;  %v9162_v37 = vld [vmem:[%s12121_s2 + $0x430] ss:$8 sps:$4 sm:$0xff]   ;;  %v9170_v12 = vld [vmem:[%s12121_s2 + $0x454] ss:$8 sps:$4 sm:$0xff]  }
 0x554   : > { %5053 = vmatprep.subr.bf16.mxu1 %v9149_v10  ;;  %v4879_v10 = vrot.slane %v4877_v28, 5  ;;  %v4904_v28 = vrot.slane %v4902_v7, 4 }
 0x555   : > { %v4872_v58 = vsel %vm12253_vm8, %v4867_v20, %v4871_v41  ;;  %v4895_v27 = vrot.slane %v4894_v33, 4  ;;  %v9165_v20 = vld [vmem:[%s12121_s2 + $0x440] ss:$8 sps:$4 sm:$0xff]   ;;  %v9168_v41 = vld [vmem:[%s12121_s2 + $0x450] ss:$8 sps:$4 sm:$0xff]  }
 0x556   : > { %4775 = vmatmul.mubr.bf16.gmra.mrb[16].mxu1 %v9146_v1  ;;  %v4916_v1 = vshrl.u32 %v4815_v24, 16  ;;  %v4880_v0 = vor.u32 %v4879_v10, %v4876_v6  ;;  %v4908_v6 = vor.u32 %v4907_v5, %v4904_v28  ;;  %v4925_v24 = vshll.u32 %v10848_v34, 16 }
 0x557   : > { %5054 = vmatpush1.bf16.msra.mxu1 %v9147_v17  ;;  %5073 = vmatprep.mubr.bf16.mxu1 %v12254_v18  ;;  %v4858_v17 = vsel %vm12253_vm8, %v4853_v49, %v4857_v62  ;;  %v7906_v28 = vrot.slane %v5133_v51, 9  ;;  %v5168_v5 = vrot.slane %v10804_v14, 5 }
 0x558   : > { %5055 = vmatprep.subr.bf16.mxu1 %v9152_v47  ;;  %v10827_v47 = vld [vmem:[#allocation3 + $0x3c] sm:$0x1]  ;;  %v4918_v63 = vrot.slane %v4916_v1, 4  ;;  %v4881_v11 = vrot.slane %v4880_v0, 4  ;;  %v4909_v29 = vrot.slane %v4908_v6, 4 }
 0x559   : > { %v4897_v15 = vshll.u32 %v10827_v47, 16  ;;  %v9171_v0 = vld [vmem:[%s12121_s2 + $0x460] ss:$8 sps:$4 sm:$0xff]  }
 0x55b   : > { %5056 = vmatpush1.bf16.msra.mxu1 %v9150_v21  ;;  %v7884_v21 = vcombine.low %v4858_v17, %v4872_v58  ;;  %v4899_v36 = vrot.slane %v4897_v15, 5  ;;  %v9173_v17 = vld [vmem:[%s12121_s2 + $0x464] ss:$8 sps:$4 sm:$0xff]   ;;  %v5131_v58 = vld [vmem:[#allocation3 + $0x18] sm:$0xe] }
 0x55c   : > { %5298 = vmatprep.subr.bf16.mxu1 %v9155_v9  ;;  %v4921_v9 = vrot.slane %v4919_v23, 5  ;;  %v5130_v23 = vld [vmem:[#allocation3 + $0x10] sm:$0xe]  ;;  %v7904_v15 = vrot.slane %v5131_v58, 9 }
 0x55d   : > { %v4900_v49 = vsel %vm12253_vm8, %v4895_v27, %v4899_v36  ;;  %v5164_v27 = vrot.slane %v10797_v52, 5  ;;  %v5134_v36 = vld [vmem:[#allocation3 + $0x30] sm:$0xe]  ;;  %v5176_v52 = vrot.slane %v10827_v47, 5 }
 0x55e   : > { %5074 = vmatmul.mubr.bf16.vlgmr.msra.gmra.mrb[4].mxu1 %v7883_v22  ;;  %v4922_v22 = vor.u32 %v4921_v9, %v4918_v63  ;;  %v5161_v63 = vsel %vm12255_vm10, %v7904_v15, %v5160_v35  ;;  %v5132_v9 = vld [vmem:[#allocation3 + $0x20] sm:$0xe] }
 0x55f   : > { %5299 = vmatpush1.bf16.msra.mxu1 %v9153_v26  ;;  %5083 = vmatprep.mubr.bf16.mxu1 %v12254_v18  ;;  %v10846_v26 = vld [vmem:[#allocation3 + $0x44] sm:$0x1]  ;;  %v7905_v60 = vrot.slane %v5132_v9, 9 }
 0x560   : > { %5300 = vmatprep.subr.bf16.mxu1 %v9158_v42  ;;  %v4886_v42 = vsel %vm12253_vm8, %v4881_v11, %v4885_v43  ;;  %v4911_v10 = vshll.u32 %v10846_v26, 16  ;;  %v4923_v62 = vrot.slane %v4922_v22, 4  ;;  %v5169_v43 = vsel %vm12255_vm10, %v7906_v28, %v5168_v5 }
 0x561   : > { %v7885_v8 = vcombine.low %v4886_v42, %v4900_v49  ;;  %v7907_v42 = vrot.slane %v5134_v36, 9  ;;  %v5172_v49 = vrot.slane %v10820_v59, 5  ;;  %v5184_v59 = vrot.slane %v10848_v34, 5 }
 0x562   : > { %v4913_v1 = vrot.slane %v4911_v10, 5  ;;  %v5137_v10 = vld [vmem:[#allocation3 + $0x48] sm:$0xe] }
 0x563   : > { %5301 = vmatpush1.bf16.msra.mxu1 %v9156_v54  ;;  %v4927_v54 = vrot.slane %v4925_v24, 5  ;;  %v5173_v14 = vsel %vm12255_vm10, %v7907_v42, %v5172_v49 }
 0x564   : > { %5302 = vmatprep.subr.bf16.mxu1 %v9161_v16  ;;  %v4914_v16 = vsel %vm12253_vm8, %v4909_v29, %v4913_v1  ;;  %v5180_v29 = vrot.slane %v10846_v26, 5 }
 0x565   : > { %v4928_v7 = vsel %vm12253_vm8, %v4923_v62, %v4927_v54  ;;  %v7910_v62 = vrot.slane %v5137_v10, 9  ;;  %vm12280_vm8 = vmmov %vm12257_vm1 }
 0x566   : > { %5084 = vmatmul.mubr.bf16.gmra.mrb[8].mxu1 %v7884_v21  ;;  %v7886_v33 = vcombine.low %v4914_v16, %v4928_v7  ;;  %v9174_v21 = vld [vmem:[%s12121_s2 + $0x470] ss:$8 sps:$4 sm:$0xff]  }
 0x567   : > { %5303 = vmatpush1.bf16.msra.mxu1 %v9159_v25  ;;  %5093 = vmatprep.mubr.bf16.mxu1 %v12254_v18  ;;  %v7903_v25 = vrot.slane %v5130_v23, 9  ;;  %v5185_v54 = vsel %vm12255_vm10, %v7910_v62, %v5184_v59 }
 0x568   : > { %5304 = vmatprep.subr.bf16.mxu1 %v9164_v13 }
 0x569   : > { %v5157_v13 = vsel %vm12255_vm10, %v7903_v25, %v5156_v2 }
 0x56a   : > { %v7911_v11 = vcombine.low %v5157_v13, %v5161_v63 }
 0x56b   : > { %5305 = vmatpush1.bf16.msra.mxu1 %v9162_v37  ;;  %v5165_v37 = vsel %vm12255_vm10, %v7905_v60, %v5164_v27 }
 0x56c   : > { %5306 = vmatprep.subr.bf16.mxu1 %v9167_v30  ;;  %v5135_v30 = vld [vmem:[#allocation3 + $0x38] sm:$0xe]  ;;  %v7912_v22 = vcombine.low %v5165_v37, %v5169_v43 }
 0x56d   : > { %v7908_v6 = vrot.slane %v5135_v30, 9 }
 0x56e   : > { %5094 = vmatmul.mubr.bf16.gmra.mrb[12].mxu1 %v7885_v8 }
 0x56f   : > { %5307 = vmatpush1.bf16.msra.mxu1 %v9165_v20  ;;  %5103 = vmatprep.mubr.bf16.mxu1 %v12254_v18  ;;  %v5177_v24 = vsel %vm12255_vm10, %v7908_v6, %v5176_v52  ;;  %v5136_v20 = vld [vmem:[#allocation3 + $0x40] sm:$0xe] }
 0x570   : > { %5308 = vmatprep.subr.bf16.mxu1 %v9170_v12  ;;  %v7913_v8 = vcombine.low %v5173_v14, %v5177_v24  ;;  %v7909_v12 = vrot.slane %v5136_v20, 9 }
 0x572   : > { %v5181_v47 = vsel %vm12255_vm10, %v7909_v12, %v5180_v29 }
 0x573   : > { %5309 = vmatpush1.bf16.msra.mxu1 %v9168_v41  ;;  %v7914_v41 = vcombine.low %v5181_v47, %v5185_v54 }
 0x574   : > { %5310 = vmatprep.subr.bf16.mxu1 %v9173_v17 }
 0x576   : > { %5104 = vmatmul.mubr.bf16.gmra.mrb[16].mxu1 %v7886_v33 }
 0x577   : > { %5311 = vmatpush1.bf16.msra.mxu1 %v9171_v0  ;;  %5330 = vmatprep.mubr.bf16.mxu1 %v12254_v18 }
 0x578   : > { %5312 = vmatprep.subr.bf16.mxu1 %v9176_v19 }
 0x57b   : > { %5313 = vmatpush1.bf16.msra.mxu1 %v9174_v21 }
 0x57e   : > { %5331 = vmatmul.mubr.bf16.vlgmr.msra.gmra.mrb[4].mxu1 %v7911_v11 }
 0x57f   : > { %5340 = vmatprep.mubr.bf16.mxu1 %v12254_v18 }
 0x586   : > { %5341 = vmatmul.mubr.bf16.gmra.mrb[8].mxu1 %v7912_v22 }
 0x587   : > { %5350 = vmatprep.mubr.bf16.mxu1 %v12254_v18 }
 0x58e   : > { %5351 = vmatmul.mubr.bf16.gmra.mrb[12].mxu1 %v7913_v8 }
 0x58f   : > { %5360 = vmatprep.mubr.bf16.mxu1 %v12254_v18 }
 0x596   : > { %5361 = vmatmul.mubr.bf16.gmra.mrb[16].mxu1 %v7914_v41 }
 0x651   : > { %v10910_v1 = vpop.f32.mrb[4].mxu1 }
 0x652   : > { %v10912_v17 = vpop.f32.mrb[5].mxu1  ;;  %v5458_v26 = vmul.f32 %v10910_v1, %v10910_v1 }
 0x653   : > { %v10914_v16 = vpop.f32.mrb[6].mxu1  ;;  %v5459_v39 = vmul.f32 %v10912_v17, %v10912_v17 }
 0x654   : > { %v8600_v18 = vpack.c.bf16 %v10914_v16, %v10910_v1  ;;  %v5460_v34 = vmul.f32 %v10914_v16, %v10914_v16  ;;  %v10922_v7 = vpop.f32.mrb[7].mxu1 }
 0x655   : > { %v8598_v23 = vpack.c.bf16 %v10922_v7, %v10912_v17  ;;  %v5461_v58 = vmul.f32 %v10922_v7, %v10922_v7 }
 0x656   : > { %v8616_v0 = vpack.c.bf16 %v5460_v34, %v5458_v26  ;;  %v12256_v26 = vmov 1.0   ;;  %v5546_v34 = vadd.s32 136, %v9730_v48 }
 0x657   : > { %8599 = vmatprep.subr.bf16.mxu0 %v8598_v23  ;;  %v8614_v33 = vpack.c.bf16 %v5461_v58, %v5459_v39  ;;  %v12258_v39 = vmov 0.0  }
 0x658   : > { %8601 = vmatpush1.bf16.msra.mxu0 %v8600_v18  ;;  %v5545_v18 = vadd.s32 128, %v9730_v48  ;;  %v5684_v58 = vand.u32 31, %v5546_v34  ;;  %v5553_v34 = vadd.s32 192, %v9730_v48 }
 0x659   : > { %v10930_v19 = vpop.f32.mrb[8].mxu1 }
 0x65a   : > { %v10932_v25 = vpop.f32.mrb[9].mxu1  ;;  %v5462_v15 = vmul.f32 %v10930_v19, %v10930_v19  ;;  %v5677_v23 = vand.u32 31, %v5545_v18  ;;  %vm11007_vm9 = vcmp.eq.s32.totalorder %v5684_v58, %v9743_v44  ;;  %v12283_v58 = vmov 0 }
 0x65b   : > { %v10934_v2 = vpop.f32.mrb[10].mxu1  ;;  %v5463_v63 = vmul.f32 %v10932_v25, %v10932_v25 }
 0x65c   : > { %v8604_v35 = vpack.c.bf16 %v10934_v2, %v10930_v19  ;;  %v5464_v21 = vmul.f32 %v10934_v2, %v10934_v2  ;;  %v10942_v13 = vpop.f32.mrb[11].mxu1  ;;  %vm11002_vm11 = vcmp.eq.s32.totalorder %v5677_v23, %v9743_v44  ;;  %v5554_v23 = vadd.s32 200, %v9730_v48 }
 0x65d   : > { %v8602_v9 = vpack.c.bf16 %v10942_v13, %v10932_v25  ;;  %v5465_v51 = vmul.f32 %v10942_v13, %v10942_v13  ;;  %vm12158_vm2 = vmpackc.low %vm11007_vm9, %vm11002_vm11 }
 0x65e   : > { %v8620_v11 = vpack.c.bf16 %v5464_v21, %v5462_v15  ;;  %v5547_v15 = vadd.s32 144, %v9730_v48  ;;  %v5572_v21 = vand.u32 31, %v9736_v40 }
 0x65f   : > { %8603 = vmatprep.subr.bf16.mxu0 %v8602_v9  ;;  %v8618_v60 = vpack.c.bf16 %v5465_v51, %v5463_v63  ;;  %v5549_v63 = vadd.s32 160, %v9730_v48  ;;  %v5550_v9 = vadd.s32 168, %v9730_v48 }
 0x660   : > { %8605 = vmatpush1.bf16.msra.mxu0 %v8604_v35  ;;  %v5548_v35 = vadd.s32 152, %v9730_v48  ;;  %vm11017_vm3 = vcmp.eq.s32.totalorder %v5572_v21, %v9743_v44  ;;  %v5556_v21 = vadd.s32 216, %v9730_v48 }
 0x661   : > { %v10950_v27 = vpop.f32.mrb[12].mxu1 }
 0x662   : > { %v10952_v28 = vpop.f32.mrb[13].mxu1  ;;  %v5466_v37 = vmul.f32 %v10950_v27, %v10950_v27 }
 0x663   : > { %v10954_v5 = vpop.f32.mrb[14].mxu1  ;;  %v5467_v22 = vmul.f32 %v10952_v28, %v10952_v28 }
 0x664   : > { %v8608_v43 = vpack.c.bf16 %v10954_v5, %v10950_v27  ;;  %v5468_v36 = vmul.f32 %v10954_v5, %v10954_v5  ;;  %v10962_v30 = vpop.f32.mrb[15].mxu1 }
 0x665   : > { %v8606_v42 = vpack.c.bf16 %v10962_v30, %v10952_v28  ;;  %v5469_v49 = vmul.f32 %v10962_v30, %v10962_v30 }
 0x666   : > { %v8624_v6 = vpack.c.bf16 %v5468_v36, %v5466_v37  ;;  %v5579_v36 = vand.u32 31, %v9747_v46  ;;  %v6041_v37 = vadd.s32 128, %v9743_v44 }
 0x667   : > { %8607 = vmatprep.subr.bf16.mxu0 %v8606_v42  ;;  %v8622_v52 = vpack.c.bf16 %v5469_v49, %v5467_v22  ;;  %v5586_v22 = vand.u32 31, %v9759_v4  ;;  %v5705_v42 = vand.u32 31, %v5549_v63  ;;  %v5712_v49 = vand.u32 31, %v5550_v9 }
 0x668   : > { %8609 = vmatpush1.bf16.msra.mxu0 %v8608_v43  ;;  %vm11056_vm0 = vcmp.eq.s32.totalorder %v5579_v36, %v9743_v44  ;;  %v12285_v63 = vmov 0  ;;  %v12287_v9 = vmov 0  ;;  %v12289_v36 = vmov 0 }
 0x669   : > { %v10970_v14 = vpop.f32.mrb[16].mxu1  ;;  %vm11061_vm4 = vcmp.eq.s32.totalorder %v5586_v22, %v9743_v44  ;;  %vm11066_vm5 = vcmp.eq.s32.totalorder %v5705_v42, %v9743_v44  ;;  %vm11071_vm6 = vcmp.eq.s32.totalorder %v5712_v49, %v9743_v44  ;;  %v12291_v22 = vmov 0 }
 0x66a   : > { %v10972_v24 = vpop.f32.mrb[17].mxu1  ;;  %v5470_v10 = vmul.f32 %v10970_v14, %v10970_v14  ;;  %vm12160_vm10 = vmpackc.low %vm11061_vm4, %vm11056_vm0  ;;  %v5754_v49 = vand.u32 31, %v5556_v21  ;;  %v5560_v21 = vadd.s32 248, %v9730_v48  ;;  %v6053_v43 = vand.u32 31, %v6041_v37 }
 0x66b   : > { %v10974_v20 = vpop.f32.mrb[18].mxu1  ;;  %v5471_v62 = vmul.f32 %v10972_v24, %v10972_v24 }
 0x66c   : > { %v8612_v8 = vpack.c.bf16 %v10974_v20, %v10970_v14  ;;  %v5472_v12 = vmul.f32 %v10974_v20, %v10974_v20  ;;  %v10982_v29 = vpop.f32.mrb[19].mxu1 }
 0x66d   : > { %v8610_v59 = vpack.c.bf16 %v10982_v29, %v10972_v24  ;;  %v5473_v47 = vmul.f32 %v10982_v29, %v10982_v29 }
 0x66e   : > { %v8628_v54 = vpack.c.bf16 %v5472_v12, %v5470_v10  ;;  %v5551_v10 = vadd.s32 176, %v9730_v48  ;;  %v12271_v12 = vmov 1.0|1.0  }
 0x66f   : > { %v8626_v41 = vpack.c.bf16 %v5473_v47, %v5471_v62  ;;  %8611 = vmatprep.subr.bf16.mxu0 %v8610_v59  ;;  %v5593_v62 = vand.u32 31, %v9771_v38  ;;  %v5600_v59 = vand.u32 31, %v9774_v3  ;;  %v12272_v47 = vmov 0 }
 0x670   : > { %8613 = vmatpush1.bf16.msra.mxu0 %v8612_v8  ;;  %v5552_v8 = vadd.s32 184, %v9730_v48  ;;  %v12273_v47 = vsel %vm11056_vm0, 4294967295, %v12272_v47  ;;  %v12276_v38 = vmov 0  ;;  %v12278_v3 = vmov 0 }
 0x671   : > { %8615 = vmatprep.subr.bf16.mxu0 %v8614_v33  ;;  %v5565_v33 = vand.u32 31, %v9730_v48  ;;  %v12277_v38 = vsel %vm11066_vm5, 4294967295, %v12276_v38  ;;  %v12279_v3 = vsel %vm11071_vm6, 4294967295, %v12278_v3 }
 0x672   : > { %v5726_v18 = vand.u32 31, %v5552_v8  ;;  %v5558_v8 = vadd.s32 232, %v9730_v48 }
 0x673   : > { %7931 = vmatmul.mubr.msk.f32.vlgmr.msra.gmra.mrb[16].mxu0 %vm12257_vm1, %v12256_v26  ;;  %vm11012_vm14 = vcmp.eq.s32.totalorder %v5565_v33, %v9743_v44  ;;  %vm11096_vm1 = vcmp.eq.s32.totalorder %v5593_v62, %v9743_v44  ;;  %v5555_v33 = vadd.s32 208, %v9730_v48  ;;  %v12299_v62 = vmov 0 }
 0x674   : > { %8617 = vmatpush1.bf16.msra.mxu0 %v8616_v0  ;;  %5538 = vmatprep.mubr.f32.mxu0 %v12258_v39  ;;  %vm12157_vm12 = vmpackc.low %vm11017_vm3, %vm11012_vm14 }
 0x675   : > { %8619 = vmatprep.subr.bf16.mxu0 %v8618_v60  ;;  %v5698_v60 = vand.u32 31, %v5548_v35  ;;  %v5614_v35 = vand.u32 31, %v9810_v31  ;;  %v5628_v31 = vand.u32 31, %v9846_v53  ;;  %v5747_v42 = vand.u32 31, %v5555_v33 }
 0x676   : > { %v12295_v53 = vmov 0  ;;  %v5559_v33 = vadd.s32 240, %v9730_v48 }
 0x677   : > { %vm11033_vm7 = vcmp.eq.s32.totalorder %v5698_v60, %v9743_v44  ;;  %v5740_v60 = vand.u32 31, %v5554_v23  ;;  %v5642_v23 = vand.u32 31, %v9865_v56 }
 0x678   : > { %8621 = vmatpush1.bf16.msra.mxu0 %v8620_v11  ;;  %v5691_v11 = vand.u32 31, %v5547_v15  ;;  %v5607_v15 = vand.u32 31, %v9807_v61  ;;  %v5621_v61 = vand.u32 31, %v9843_v50  ;;  %v12293_v50 = vmov 0 }
 0x679   : > { %8623 = vmatprep.subr.bf16.mxu0 %v8622_v52  ;;  %v12269_v52 = vmov 0 }
 0x67a   : > { %vm11028_vm13 = vcmp.eq.s32.totalorder %v5691_v11, %v9743_v44  ;;  %v12270_v52 = vsel %vm11033_vm7, 4294967295, %v12269_v52  ;;  %v5733_v11 = vand.u32 31, %v5553_v34  ;;  %vm11146_vm0 = vcmp.eq.s32.totalorder %v5607_v15, %v9743_v44 }
 0x67b   : > { %vm12156_vm15 = vmpackc.low %vm11033_vm7, %vm11028_vm13  ;;  %v12290_v36 = vsel %vm11146_vm0, 4294967295, %v12289_v36  ;;  %vm11184_vm7 = vcmp.eq.s32.totalorder %v5621_v61, %v9743_v44  ;;  %v5635_v34 = vand.u32 31, %v9862_v32  ;;  %v12309_v32 = vmov 0 }
 0x67c   : > { %8625 = vmatpush1.bf16.msra.mxu0 %v8624_v6  ;;  %v12267_v6 = vmov 0  ;;  %v12300_v62 = vsel %vm11184_vm7, 4294967295, %v12299_v62 }
 0x67d   : > { %8627 = vmatprep.subr.bf16.mxu0 %v8626_v41  ;;  %v12268_v6 = vsel %vm11028_vm13, 4294967295, %v12267_v6  ;;  %v5719_v41 = vand.u32 31, %v5551_v10  ;;  %vm11156_vm13 = vcmp.eq.s32.totalorder %v5733_v11, %v9743_v44  ;;  %v5557_v10 = vadd.s32 224, %v9730_v48 }
 0x67e   : > { %v12294_v50 = vsel %vm11156_vm13, 4294967295, %v12293_v50  ;;  %v5649_v11 = vand.u32 31, %v9903_v55 }
 0x67f   : > { %v5761_v15 = vand.u32 31, %v5557_v10  ;;  %v5663_v10 = vand.u32 31, %v9932_v45  ;;  %v12328_v45 = vmov 0 }
 0x680   : > { %8629 = vmatpush1.bf16.msra.mxu0 %v8628_v54  ;;  %v12274_v54 = vmov 0 }
 0x681   : > { %8631 = vmatprep.subr.msk.bf16.mxu0 %vm12158_vm2, %v12271_v12  ;;  %v12275_v54 = vsel %vm11061_vm4, 4294967295, %v12274_v54  ;;  %vm11119_vm2 = vcmp.eq.s32.totalorder %v5726_v18, %v9743_v44  ;;  %vm11203_vm4 = vcmp.eq.s32.totalorder %v5754_v49, %v9743_v44  ;;  %v12305_v18 = vmov 0 }
 0x682   : > { %v12288_v9 = vsel %vm11119_vm2, 4294967295, %v12287_v9  ;;  %v12306_v18 = vsel %vm11203_vm4, 4294967295, %v12305_v18  ;;  %v5782_v49 = vand.u32 31, %v5560_v21 }
 0x683   : > { %7932 = vmatmul.mubr.msk.f32.vlgmr.msra.gmra.mrb[18].mxu0 %vm12280_vm8, %v12256_v26  ;;  %v12281_v26 = vmov 0  ;;  %vm11101_vm8 = vcmp.eq.s32.totalorder %v5600_v59, %v9743_v44  ;;  %v12301_v59 = vmov 0 }
 0x684   : > { %8633 = vmatpush3.bf16.msk.msra.mxu0 %vm12157_vm12, %v12271_v12  ;;  %v12282_v26 = vsel %vm11096_vm1, 4294967295, %v12281_v26  ;;  %v12284_v58 = vsel %vm11101_vm8, 4294967295, %v12283_v58  ;;  %vm11114_vm12 = vcmp.eq.s32.totalorder %v5719_v41, %v9743_v44  ;;  %v12303_v41 = vmov 0 }
 0x685   : > { %8635 = vmatprep.subr.msk.bf16.mxu0 %vm12156_vm15, %v12271_v12  ;;  %vm12162_vm15 = vmpackc.low %vm11071_vm6, %vm11066_vm5  ;;  %v12286_v63 = vsel %vm11114_vm12, 4294967295, %v12285_v63  ;;  %vm11161_vm5 = vcmp.eq.s32.totalorder %v5740_v60, %v9743_v44  ;;  %v5656_v60 = vand.u32 31, %v9906_v57 }
 0x686   : > { %v12296_v53 = vsel %vm11161_vm5, 4294967295, %v12295_v53  ;;  %vm12298_vm6 = vmpackc.low %vm11119_vm2, %vm11114_vm12 }
 0x687   : > { %vm12308_vm12 = vmpackc.low %vm11161_vm5, %vm11156_vm13 }
 0x688   : > { %8637 = vmatpush3.bf16.msk.msra.mxu0 %vm12160_vm10, %v12271_v12  ;;  %vm12297_vm10 = vmpackc.low %vm11101_vm8, %vm11096_vm1  ;;  %vm11189_vm1 = vcmp.eq.s32.totalorder %v5628_v31, %v9743_v44 }
 0x689   : > { %8639 = vmatprep.subr.msk.bf16.mxu0 %vm12162_vm15, %v12271_v12  ;;  %vm11151_vm15 = vcmp.eq.s32.totalorder %v5614_v35, %v9743_v44  ;;  %v12302_v59 = vsel %vm11189_vm1, 4294967295, %v12301_v59  ;;  %v5768_v35 = vand.u32 31, %v5558_v8  ;;  %vm12176_vm2 = vmpackc.low %vm11189_vm1, %vm11184_vm7  ;;  %vm11274_vm7 = vcmp.eq.s32.totalorder %v5649_v11, %v9743_v44  ;;  %v12322_v8 = vld [vmem:[#allocation4_spill] sm:$0xff] }
 0x68a   : > { %v12292_v22 = vsel %vm11151_vm15, 4294967295, %v12291_v22 }
 0x68b   : > { %vm11249_vm8 = vcmp.eq.s32.totalorder %v5768_v35, %v9743_v44  ;;  %v12330_v35 = vmov 0 }
 0x68c   : > { %8641 = vmatpush3.bf16.msk.msra.mxu0 %vm12297_vm10, %v12271_v12  ;;  %vm11198_vm10 = vcmp.eq.s32.totalorder %v5747_v42, %v9743_v44  ;;  %v5775_v42 = vand.u32 31, %v5559_v33 }
 0x68d   : > { %8643 = vmatprep.subr.msk.bf16.mxu0 %vm12298_vm6, %v12271_v12  ;;  %v12304_v41 = vsel %vm11198_vm10, 4294967295, %v12303_v41  ;;  %vm12307_vm6 = vmpackc.low %vm11151_vm15, %vm11146_vm0  ;;  %vm11232_vm0 = vcmp.eq.s32.totalorder %v5635_v34, %v9743_v44  ;;  %v5670_v34 = vand.u32 31, %v12322_v8  ;;  %vm11291_vm15 = vcmp.eq.s32.totalorder %v5782_v49, %v9743_v44 }
 0x68e   : > { %v12310_v32 = vsel %vm11232_vm0, 4294967295, %v12309_v32  ;;  %vm12317_vm13 = vmpackc.low %vm11203_vm4, %vm11198_vm10 }
 0x690   : > { %8645 = vmatpush3.bf16.msk.msra.mxu0 %vm12307_vm6, %v12271_v12  ;;  %vm11237_vm6 = vcmp.eq.s32.totalorder %v5642_v23, %v9743_v44  ;;  %v12323_v23 = vmov 0 }
 0x691   : > { %8647 = vmatprep.subr.msk.bf16.mxu0 %vm12308_vm12, %v12271_v12  ;;  %vm11244_vm12 = vcmp.eq.s32.totalorder %v5761_v15, %v9743_v44  ;;  %vm12181_vm5 = vmpackc.low %vm11237_vm6, %vm11232_vm0  ;;  %vm11316_vm0 = vcmp.eq.s32.totalorder %v5663_v10, %v9743_v44 }
 0x692   : > { %vm12327_vm10 = vmpackc.low %vm11249_vm8, %vm11244_vm12  ;;  %v12329_v45 = vsel %vm11316_vm0, 4294967295, %v12328_v45 }
 0x694   : > { %8649 = vmatpush3.bf16.msk.msra.mxu0 %vm12176_vm2, %v12271_v12  ;;  %vm11279_vm2 = vcmp.eq.s32.totalorder %v5656_v60, %v9743_v44  ;;  %v9195_v60 = vmov 1983009808  }
 0x695   : > { %8651 = vmatprep.subr.msk.bf16.mxu0 %vm12317_vm13, %v12271_v12  ;;  %vm11286_vm13 = vcmp.eq.s32.totalorder %v5775_v42, %v9743_v44  ;;  %vm12182_vm4 = vmpackc.low %vm11279_vm2, %vm11274_vm7 }
 0x696   : > { %v12324_v23 = vsel %vm11286_vm13, 4294967295, %v12323_v23  ;;  %vm12183_vm1 = vmpackc.low %vm11291_vm15, %vm11286_vm13  ;;  %vm12340_vm13 = vnez %v12279_v3 }
 0x698   : > { %8653 = vmatpush3.bf16.msk.msra.mxu0 %vm12181_vm5, %v12271_v12  ;;  %vm11321_vm5 = vcmp.eq.s32.totalorder %v5670_v34, %v9743_v44 }
 0x699   : > { %8655 = vmatprep.subr.msk.bf16.mxu0 %vm12327_vm10, %v12271_v12  ;;  %v12331_v35 = vsel %vm11321_vm5, 4294967295, %v12330_v35  ;;  %vm12184_vm10 = vmpackc.low %vm11321_vm5, %vm11316_vm0  ;;  %vm12335_vm0 = vnez %v12268_v6  ;;  %v6046_v6 = vand.u32 31, %v9743_v44 }
 0x69c   : > { %8657 = vmatpush3.bf16.msk.msra.mxu0 %vm12182_vm4, %v12271_v12  ;;  %vm12332_vm4 = vmpackc.low %vm11007_vm9, %vm11002_vm11  ;;  %vm12337_vm11 = vnez %v12275_v54  ;;  %vm12338_vm9 = vnez %v12273_v47 }
 0x69d   : > { %8659 = vmatprep.subr.msk.bf16.mxu0 %vm12183_vm1, %v12271_v12  ;;  %vm12333_vm1 = vmpackc.low %vm11017_vm3, %vm11012_vm14  ;;  %vm12341_vm14 = vnez %v12277_v38 }
 0x69e   : > { %vm12342_vm3 = vmpackc.low %vm12340_vm13, %vm12341_vm14  ;;  %vm12350_vm13 = vnez %v12290_v36 }
 0x6a0   : > { %8661 = vmatpush3.bf16.msk.msra.mxu0 %vm12184_vm10, %v12271_v12  ;;  %vm12334_vm10 = vnez %v12270_v52 }
 0x6a1   : > { %8663 = vmatprep.subr.msk.bf16.mxu0 %vm12332_vm4, %v12271_v12  ;;  %vm12336_vm5 = vmpackc.low %vm12334_vm10, %vm12335_vm0  ;;  %vm12344_vm0 = vnez %v12282_v26  ;;  %vm12346_vm10 = vnez %v12288_v9 }
 0x6a2   : > { %vm12339_vm4 = vmpackc.low %vm12337_vm11, %vm12338_vm9  ;;  %vm12347_vm11 = vnez %v12286_v63 }
 0x6a3   : > { %vm12348_vm9 = vmpackc.low %vm12346_vm10, %vm12347_vm11  ;;  %vm12356_vm10 = vnez %v12300_v62 }
 0x746   : > { %v5453_v33 = vpop.f32.mrb[16].mxu0 }
 0x747   : > { %v5455_v21 = vpop.f32.mrb[17].mxu0 }
 0x748   : > { %6154 = vmatprep.mubr.f32.mxu0 %v5455_v21 }
 0x749   : > { %6155 = vmatmul.mubr.f32.vlgmr.msra.gmra.mrb[20].mxu0 %v5453_v33 }
 0x74a   : > { %8665 = vmatpush3.bf16.msk.msra.mxu0 %vm12333_vm1, %v12271_v12  ;;  %vm12343_vm1 = vnez %v12284_v58 }
 0x74b   : > { %8667 = vmatprep.subr.msk.bf16.mxu0 %vm12336_vm5, %v12271_v12  ;;  %vm12345_vm5 = vmpackc.low %vm12343_vm1, %vm12344_vm0  ;;  %vm12353_vm1 = vnez %v12294_v50  ;;  %v12376_v50 = vld [vmem:[#allocation5_spill] sm:$0xff] }
 0x74e   : > { %8669 = vmatpush3.bf16.msk.msra.mxu0 %vm12339_vm4, %v12271_v12  ;;  %vm12349_vm4 = vnez %v12292_v22 }
 0x74f   : > { %8671 = vmatprep.subr.msk.bf16.mxu0 %vm12342_vm3, %v12271_v12  ;;  %vm12351_vm14 = vmpackc.low %vm12349_vm4, %vm12350_vm13  ;;  %vm12352_vm3 = vnez %v12296_v53  ;;  %vm12359_vm4 = vnez %v12304_v41 }
 0x750   : > { %vm12354_vm0 = vmpackc.low %vm12352_vm3, %vm12353_vm1 }
 0x751   : > { %vm12363_vm1 = vmpackc.low %vm11249_vm8, %vm11244_vm12 }
 0x752   : > { %8673 = vmatpush3.bf16.msk.msra.mxu0 %vm12345_vm5, %v12271_v12  ;;  %vm12355_vm5 = vnez %v12302_v59 }
 0x753   : > { %8675 = vmatprep.subr.msk.bf16.mxu0 %vm12348_vm9, %v12271_v12  ;;  %vm12357_vm11 = vmpackc.low %vm12355_vm5, %vm12356_vm10  ;;  %vm12358_vm9 = vnez %v12306_v18  ;;  %vm6069_vm5 = vcmp.eq.s32.totalorder %v6053_v43, %v9736_v40  ;;  %vm12365_vm10 = vnez %v12324_v23 }
 0x754   : > { %vm12360_vm13 = vmpackc.low %vm12358_vm9, %vm12359_vm4  ;;  %vm6068_vm9 = vcmp.eq.s32.totalorder %v6046_v6, %v9736_v40  ;;  %vm12369_vm4 = vnez %v12331_v35 }
 0x755   : > { %vm12366_vm8 = vmpackc.low %vm11291_vm15, %vm12365_vm10 }
 0x756   : > { %8677 = vmatpush3.bf16.msk.msra.mxu0 %vm12351_vm14, %v12271_v12  ;;  %v5540_v0 = vpop.f32.mrb[18].mxu0  ;;  %vm12361_vm14 = vnez %v12310_v32 }
 0x757   : > { %8679 = vmatprep.subr.msk.bf16.mxu0 %vm12354_vm0, %v12271_v12  ;;  %v5542_v51 = vpop.f32.mrb[19].mxu0  ;;  %vm12362_vm3 = vmpackc.low %vm11237_vm6, %vm12361_vm14  ;;  %vm6067_vm0 = vcmp.eq.s32.totalorder %v6053_v43, %v9730_v48  ;;  %vm6073_vm14 = vcmp.eq.s32.totalorder %v6053_v43, %v9759_v4 }
 0x758   : > { %6225 = vmatprep.mubr.f32.mxu0 %v5542_v51  ;;  %vm12364_vm6 = vmpackc.low %vm11279_vm2, %vm11274_vm7  ;;  %vm12370_vm2 = vnez %v12329_v45 }
 0x759   : > { %vm11441_vm12 = vmpackc.low %vm6069_vm5, %vm6067_vm0 }
 0x75a   : > { %8681 = vmatpush3.bf16.msk.msra.mxu0 %vm12357_vm11, %v12271_v12  ;;  %vm6066_vm11 = vcmp.eq.s32.totalorder %v6046_v6, %v9730_v48  ;;  %vm12371_vm7 = vmpackc.low %vm12369_vm4, %vm12370_vm2 }
 0x75b   : > { %8683 = vmatprep.subr.msk.bf16.mxu0 %vm12360_vm13, %v12271_v12  ;;  %vm11456_vm15 = vmpackc.low %vm6068_vm9, %vm6066_vm11  ;;  %vm6071_vm13 = vcmp.eq.s32.totalorder %v6053_v43, %v9747_v46  ;;  %vm7188_vm11 = vcmask 1043459   ;;  %vm7431_vm9 = vcmask 785408  }
 0x75c   : > { %vm8698_vm0 = vmpackc.low %vm6073_vm14, %vm6071_vm13 }
 0x75e   : > { %8685 = vmatpush3.bf16.msk.msra.mxu0 %vm12362_vm3, %v12271_v12  ;;  %vm6070_vm3 = vcmp.eq.s32.totalorder %v6046_v6, %v9747_v46 }
 0x75f   : > { %8687 = vmatprep.subr.msk.bf16.mxu0 %vm12363_vm1, %v12271_v12  ;;  %vm6072_vm1 = vcmp.eq.s32.totalorder %v6046_v6, %v9759_v4 }
 0x760   : > { %vm8700_vm5 = vmpackc.low %vm6072_vm1, %vm6070_vm3 }
 0x762   : > { %8689 = vmatpush3.bf16.msk.msra.mxu0 %vm12364_vm6, %v12271_v12  ;;  %vm12374_vm6 = vcmask 261120  }
 0x763   : > { %8691 = vmatprep.subr.msk.bf16.mxu0 %vm12366_vm8, %v12271_v12  ;;  %vm12375_vm10 = vmmov %vm12374_vm6  ;;  %vm7184_vm8 = vcmask 1041409  }
 0x764   : > { %vm12377_vm4 = vmmov %vm12374_vm6 }
 0x765   : > { %vm12378_vm2 = vmmov %vm12377_vm4 }
 0x766   : > { %8693 = vmatpush3.bf16.msk.msra.mxu0 %vm12371_vm7, %v12271_v12  ;;  %vm12379_vm7 = vcmask 523264   ;;  %vm12381_vm13 = vmmov %vm12378_vm2 }
 0x767   : > { %8695 = vmatprep.subr.msk.bf16.mxu0 %vm11441_vm12, %v12271_v12  ;;  %vm12382_vm14 = vmmov %vm12378_vm2 }
 0x768   : > { %vm12383_vm3 = vmmov %vm12379_vm7 }
 0x769   : > { %6226 = vmatmul.mubr.f32.vlgmr.msra.gmra.mrb[22].mxu0 %v5540_v0  ;;  %vm12384_vm1 = vmmov %vm12383_vm3 }
 0x76a   : > { %8697 = vmatpush1.bf16.msk.msra.mxu0 %vm11456_vm15, %v12271_v12  ;;  %6303 = vmatprep.mubr.f32.mxu0 %v12258_v39 }
 0x76b   : > { %8699 = vmatprep.subr.msk.bf16.mxu0 %vm8698_vm0, %v12271_v12 }
 0x76e   : > { %8701 = vmatpush1.bf16.msk.msra.mxu0 %vm8700_vm5, %v12271_v12 }
 0x76f   : > { %8703 = vmatprep.subr.msk.bf16.mxu0 %vm11441_vm12, %v12271_v12  ;;  %vm7186_vm12 = vcmask 1042434  }
 0x81c   : > { %v8252_v40 = vpop.f32.mrb[20].mxu0 }
 0x81d   : > { %v8253_v47 = vpop.f32.mrb[21].mxu0 }
 0x81e   : > { %v8254_v54 = vadd.f32 %v8253_v47, %v8252_v40 }
 0x820   : > { %v6160_v38 = vmul.f32 0.001953125, %v8254_v54 }
 0x822   : > { %8045 = vmatmul.mubr.msk.f32.vlgmr.msra.gmra.mrb[24].mxu0 %vm12374_vm6, %v6160_v38  ;;  %v6232_v26 = vmul.f32 %v6160_v38, %v6160_v38 }
 0x823   : > { %8705 = vmatpush1.bf16.msk.msra.mxu0 %vm11456_vm15, %v12271_v12  ;;  %6377 = vmatprep.mubr.f32.mxu0 %v12258_v39  ;;  %vm12380_vm15 = vmmov %vm12379_vm7 }
 0x824   : > { %8707 = vmatprep.subr.msk.bf16.mxu0 %vm8698_vm0, %v12271_v12 }
 0x827   : > { %8709 = vmatpush1.bf16.msk.msra.mxu0 %vm8700_vm5, %v12271_v12 }
 0x83c   : > { %v8287_v46 = vpop.f32.mrb[22].mxu0 }
 0x83d   : > { %v8288_v4 = vpop.f32.mrb[23].mxu0 }
 0x83e   : > { %v8289_v3 = vadd.f32 %v8288_v4, %v8287_v46 }
 0x840   : > { %v6231_v58 = vmul.f32 0.001953125, %v8289_v3 }
 0x842   : > { %v6233_v63 = vsub.f32 %v6231_v58, %v6232_v26 }
 0x844   : > { %v6234_v9 = vadd.f32 1e-05, %v6233_v63 }
 0x846   : > { %9179 = vrsqrt.f32 %v6234_v9 }
 0x850   : > { %v9180_v36 = vpop.eup %9179 }
 0x851   : > { %8054 = vmatmul.mubr.msk.f32.vlgmr.msra.gmra.mrb[26].mxu0 %vm12375_vm10, %v9180_v36 }
 0x8f5   : > { %v6305_v22 = vpop.f32.mrb[24].mxu0 }
 0x8f6   : > { %v11482_v53 = vrot.slane %v6305_v22, %v12376_v50  ;;  %v6307_v39 = vpop.f32.mrb[25].mxu0 }
 0x8f7   : > { %v11485_v62 = vrot.slane %v6307_v39, %v12376_v50 }
 0x8f8   : > { %v6396_v12 = vsub.f32 %v10930_v19, %v11482_v53  ;;  %v6398_v59 = vsub.f32 %v10934_v2, %v11482_v53  ;;  %v6392_v41 = vsub.f32 %v10910_v1, %v11482_v53  ;;  %v6394_v18 = vsub.f32 %v10914_v16, %v11482_v53 }
 0x8f9   : > { %v6397_v32 = vsub.f32 %v10932_v25, %v11485_v62  ;;  %v6399_v56 = vsub.f32 %v10942_v13, %v11485_v62  ;;  %v6393_v11 = vsub.f32 %v10912_v17, %v11485_v62  ;;  %v6395_v19 = vsub.f32 %v10922_v7, %v11485_v62 }
 0x8fa   : > { %v6400_v2 = vsub.f32 %v10950_v27, %v11482_v53  ;;  %v6401_v1 = vsub.f32 %v10952_v28, %v11485_v62  ;;  %v6402_v16 = vsub.f32 %v10954_v5, %v11482_v53  ;;  %v6403_v25 = vsub.f32 %v10962_v30, %v11485_v62 }
 0x8fb   : > { %v6404_v13 = vsub.f32 %v10970_v14, %v11482_v53  ;;  %v6405_v17 = vsub.f32 %v10972_v24, %v11485_v62  ;;  %v6406_v7 = vsub.f32 %v10974_v20, %v11482_v53  ;;  %v6407_v27 = vsub.f32 %v10982_v29, %v11485_v62 }
 0x8fc   : > { %v6483_v28 = vunpack.c.l.s4 %v9195_v60 }
 0x8fe   : > { %v6484_v61 = vunpack.c.0.s8 %v6483_v28 }
 0x900   : > { %v11527_v49 = vsub.s32 %v6484_v61, %v9730_v48 }
 0x924   : > { %v6379_v31 = vpop.f32.mrb[26].mxu0 }
 0x925   : > { %v11521_v5 = vrot.slane %v6379_v31, %v12376_v50  ;;  %v6381_v30 = vpop.f32.mrb[27].mxu0 }
 0x926   : > { %v11524_v42 = vrot.slane %v6381_v30, %v12376_v50 }
 0x927   : > { %v6420_v55 = vmul.f32 %v11521_v5, %v6396_v12  ;;  %v6422_v57 = vmul.f32 %v11521_v5, %v6398_v59  ;;  %v6416_v10 = vmul.f32 %v11521_v5, %v6392_v41  ;;  %v6418_v8 = vmul.f32 %v11521_v5, %v6394_v18 }
 0x928   : > { %v6421_v48 = vmul.f32 %v11524_v42, %v6397_v32  ;;  %v6423_v34 = vmul.f32 %v11524_v42, %v6399_v56  ;;  %v6417_v23 = vmul.f32 %v11524_v42, %v6393_v11  ;;  %v6419_v15 = vmul.f32 %v11524_v42, %v6395_v19 }
 0x929   : > { %v6436_v45 = vmax.f32 %v6420_v55, 0.0  ;;  %v6438_v35 = vmax.f32 %v6422_v57, 0.0  ;;  %v11542_v33 = vmax.f32 %v6416_v10, 0.0  ;;  %v11544_v21 = vmax.f32 %v6418_v8, 0.0 }
 0x92a   : > { %v6437_v0 = vmax.f32 %v6421_v48, 0.0  ;;  %v6439_v51 = vmax.f32 %v6423_v34, 0.0  ;;  %v11546_v37 = vmax.f32 %v6417_v23, 0.0  ;;  %v11548_v43 = vmax.f32 %v6419_v15, 0.0 }
 0x92b   : > { %6452 = vst [vmem:[%s11536_s10 + $0x20] sm:$0xff] %v6436_v45  ;;  %6454 = vst [vmem:[%s11536_s10 + $0x30] sm:$0xff] %v6438_v35  ;;  %v6424_v6 = vmul.f32 %v11521_v5, %v6400_v2  ;;  %v6425_v44 = vmul.f32 %v11524_v42, %v6401_v1  ;;  %v6426_v52 = vmul.f32 %v11521_v5, %v6402_v16 }
 0x92c   : > { %6448 = vst [vmem:[%s11536_s10] sm:$0xff] %v11542_v33  ;;  %6450 = vst [vmem:[%s11536_s10 + $0x10] sm:$0xff] %v11544_v21  ;;  %v6427_v40 = vmul.f32 %v11524_v42, %v6403_v25  ;;  %v6516_v47 = vcombine.low %v6436_v45, %v6437_v0  ;;  %v6534_v54 = vcombine.low %v6438_v35, %v6439_v51 }
 0x92d   : > { %6455 = vst [vmem:[%s11536_s10 + $0x38] sm:$0xff] %v6439_v51  ;;  %6453 = vst [vmem:[%s11536_s10 + $0x28] sm:$0xff] %v6437_v0  ;;  %v6480_v38 = vcombine.low %v11542_v33, %v11546_v37  ;;  %v6498_v46 = vcombine.low %v11544_v21, %v11548_v43  ;;  %v6517_v4 = vcombine.high %v6436_v45, %v6437_v0  ;;  %v11570_v26 = vmax.f32 %v6424_v6, 0.0 }
 0x92e   : > { %6451 = vst [vmem:[%s11536_s10 + $0x18] sm:$0xff] %v11548_v43  ;;  %6449 = vst [vmem:[%s11536_s10 + $0x8] sm:$0xff] %v11546_v37  ;;  %v6535_v3 = vcombine.high %v6438_v35, %v6439_v51  ;;  %v11572_v58 = vmax.f32 %v6425_v44, 0.0  ;;  %v11575_v63 = vrot.slane %v6516_v47, %v11527_v49  ;;  %v11578_v9 = vrot.slane %v6534_v54, %v11527_v49 }
 0x92f   : > { %v11581_v36 = vrot.slane %v6480_v38, %v11527_v49  ;;  %v11584_v22 = vrot.slane %v6498_v46, %v11527_v49  ;;  %v11587_v39 = vrot.slane %v6517_v4, %v11527_v49  ;;  %v11592_v59 = vmax.f32 %v6426_v52, 0.0  ;;  %6456 = vst [vmem:[%s11536_s10 + $0x40] sm:$0xff] %v11570_v26 }
 0x930   : > { %v11590_v12 = vrot.slane %v6535_v3, %v11527_v49  ;;  %v6443_v41 = vmax.f32 %v6427_v40, 0.0  ;;  %6457 = vst [vmem:[%s11536_s10 + $0x48] sm:$0xff] %v11572_v58  ;;  %v8063_v18 = vrot.slane %v11575_v63, 9  ;;  %v8067_v32 = vrot.slane %v11578_v9, 9 }
 0x931   : > { %v8055_v56 = vrot.slane %v11581_v36, 9  ;;  %v8059_v11 = vrot.slane %v11584_v22, 9  ;;  %v8065_v19 = vrot.slane %v11587_v39, 9  ;;  %6458 = vst [vmem:[%s11536_s10 + $0x50] sm:$0xff] %v11592_v59  ;;  %v6552_v1 = vcombine.low %v11570_v26, %v11572_v58 }
 0x932   : > { %v8069_v2 = vrot.slane %v11590_v12, 9  ;;  %6459 = vst [vmem:[%s11536_s10 + $0x58] sm:$0xff] %v6443_v41  ;;  %v6570_v16 = vcombine.low %v11592_v59, %v6443_v41  ;;  %v6760_v25 = vmax.f32 %v11575_v63, %v8063_v18  ;;  %v6764_v60 = vmax.f32 %v11578_v9, %v8067_v32 }
 0x933   : > { %v6752_v28 = vmax.f32 %v11581_v36, %v8055_v56  ;;  %v6756_v61 = vmax.f32 %v11584_v22, %v8059_v11  ;;  %v6762_v31 = vmax.f32 %v11587_v39, %v8065_v19  ;;  %v6560_v55 = vrot.slane %v6552_v1, %v11527_v49 }
 0x934   : > { %v6766_v30 = vmax.f32 %v11590_v12, %v8069_v2  ;;  %v11618_v57 = vrot.slane %v6570_v16, %v11527_v49  ;;  %v11620_v10 = vmax.f32 %v6760_v25, %v6764_v60  ;;  %v6428_v48 = vmul.f32 %v11521_v5, %v6404_v13 }
 0x935   : > { %v11622_v8 = vmax.f32 %v6752_v28, %v6756_v61  ;;  %v6429_v34 = vmul.f32 %v11524_v42, %v6405_v17  ;;  %v8071_v15 = vrot.slane %v6560_v55, 9  ;;  %v6430_v35 = vmul.f32 %v11521_v5, %v6406_v7 }
 0x936   : > { %v11632_v23 = vmax.f32 %v6762_v31, %v6766_v30  ;;  %v8075_v45 = vrot.slane %v11618_v57, 9  ;;  %6824 = vrot.lane.b32.xlu1 %v11620_v10, %s9196_s11  ;;  %v6431_v14 = vmul.f32 %v11524_v42, %v6407_v27  ;;  %v6444_v24 = vmax.f32 %v6428_v48, 0.0 }
 0x937   : > { %6816 = vrot.lane.b32.xlu0 %v11622_v8, %s9196_s11  ;;  %v6445_v13 = vmax.f32 %v6429_v34, 0.0  ;;  %v6481_v20 = vcombine.high %v11542_v33, %v11546_v37  ;;  %v6768_v53 = vmax.f32 %v6560_v55, %v8071_v15  ;;  %v6446_v7 = vmax.f32 %v6430_v35, 0.0 }
 0x938   : > { %v6772_v17 = vmax.f32 %v11618_v57, %v8075_v45  ;;  %v6499_v5 = vcombine.high %v11544_v21, %v11548_v43  ;;  %v6447_v0 = vmax.f32 %v6431_v14, 0.0  ;;  %6460 = vst [vmem:[%s11536_s10 + $0x60] sm:$0xff] %v6444_v24  ;;  %v6553_v51 = vcombine.high %v11570_v26, %v11572_v58 }
 0x939   : > { %6461 = vst [vmem:[%s11536_s10 + $0x68] sm:$0xff] %v6445_v13  ;;  %v6589_v29 = vcombine.high %v6444_v24, %v6445_v13  ;;  %v6588_v62 = vcombine.low %v6444_v24, %v6445_v13  ;;  %v11655_v27 = vrot.slane %v6481_v20, %v11527_v49  ;;  %6462 = vst [vmem:[%s11536_s10 + $0x70] sm:$0xff] %v6446_v7 }
 0x93a   : > { %v11657_v42 = vmax.f32 %v6768_v53, %v6772_v17  ;;  %v11661_v33 = vrot.slane %v6499_v5, %v11527_v49  ;;  %v6571_v37 = vcombine.high %v11592_v59, %v6443_v41  ;;  %6828 = vrot.lane.b32.xlu1 %v11632_v23, %s9196_s11  ;;  %6463 = vst [vmem:[%s11536_s10 + $0x78] sm:$0xff] %v6447_v0 }
 0x93b   : > { %v11670_v21 = vrot.slane %v6589_v29, %v11527_v49  ;;  %v6607_v43 = vcombine.high %v6446_v7, %v6447_v0  ;;  %v6596_v6 = vrot.slane %v6588_v62, %v11527_v49  ;;  %v6606_v44 = vcombine.low %v6446_v7, %v6447_v0 }
 0x93c   : > { %6832 = vrot.lane.b32.xlu0 %v11657_v42, %s9196_s11  ;;  %v8057_v52 = vrot.slane %v11655_v27, 9  ;;  %v8061_v40 = vrot.slane %v11661_v33, 9  ;;  %v11678_v47 = vrot.slane %v6553_v51, %v11527_v49  ;;  %v11681_v54 = vrot.slane %v6571_v37, %v11527_v49 }
 0x93d   : > { %v6621_v38 = vrot.slane %v6607_v43, %v11527_v49  ;;  %v8081_v46 = vrot.slane %v11670_v21, 9  ;;  %v6614_v4 = vrot.slane %v6606_v44, %v11527_v49  ;;  %v8079_v3 = vrot.slane %v6596_v6, 9 }
 0x93e   : > { %v6754_v26 = vmax.f32 %v11655_v27, %v8057_v52  ;;  %v6758_v58 = vmax.f32 %v11661_v33, %v8061_v40  ;;  %v8073_v59 = vrot.slane %v11678_v47, 9  ;;  %v8077_v41 = vrot.slane %v11681_v54, 9 }
 0x93f   : > { %v8085_v18 = vrot.slane %v6621_v38, 9  ;;  %v6778_v32 = vmax.f32 %v11670_v21, %v8081_v46  ;;  %v8083_v56 = vrot.slane %v6614_v4, 9  ;;  %v6776_v11 = vmax.f32 %v6596_v6, %v8079_v3 }
 0x940   : > { %v11691_v19 = vmax.f32 %v6754_v26, %v6758_v58  ;;  %v6770_v2 = vmax.f32 %v11678_v47, %v8073_v59  ;;  %v6774_v49 = vmax.f32 %v11681_v54, %v8077_v41  ;;  %v6532_v1 = vcombine.high %v11575_v63, %v11575_v63 }
 0x941   : > { %v6782_v16 = vmax.f32 %v6621_v38, %v8085_v18  ;;  %v6780_v25 = vmax.f32 %v6614_v4, %v8083_v56  ;;  %v6550_v60 = vcombine.high %v11578_v9, %v11578_v9  ;;  %v6568_v28 = vcombine.high %v6560_v55, %v6560_v55 }
 0x942   : > { %v11699_v61 = vmax.f32 %v6770_v2, %v6774_v49  ;;  %v8064_v31 = vrot.slane %v6532_v1, 9  ;;  %v6586_v30 = vcombine.high %v11618_v57, %v11618_v57  ;;  %v6604_v48 = vcombine.high %v6596_v6, %v6596_v6 }
 0x943   : > { %v11703_v34 = vmax.f32 %v6778_v32, %v6782_v16  ;;  %v11705_v15 = vmax.f32 %v6776_v11, %v6780_v25  ;;  %v8068_v45 = vrot.slane %v6550_v60, 9  ;;  %v8072_v35 = vrot.slane %v6568_v28, 9 }
 0x944   : > { %v6761_v63 = vmax.f32 %v6532_v1, %v8064_v31  ;;  %v8076_v14 = vrot.slane %v6586_v30, 9  ;;  %v6622_v24 = vcombine.high %v6614_v4, %v6614_v4  ;;  %v8080_v13 = vrot.slane %v6604_v48, 9 }
 0x945   : > { %6844 = vrot.lane.b32.xlu1 %v11703_v34, %s9196_s11  ;;  %6840 = vrot.lane.b32.xlu0 %v11705_v15, %s9196_s11  ;;  %v6765_v9 = vmax.f32 %v6550_v60, %v8068_v45  ;;  %v6769_v55 = vmax.f32 %v6568_v28, %v8072_v35  ;;  %v6496_v57 = vcombine.high %v11581_v36, %v11581_v36 }
 0x946   : > { %v6773_v20 = vmax.f32 %v6586_v30, %v8076_v14  ;;  %v8084_v53 = vrot.slane %v6622_v24, 9  ;;  %v6777_v17 = vmax.f32 %v6604_v48, %v8080_v13  ;;  %v6514_v7 = vcombine.high %v11584_v22, %v11584_v22 }
 0x947   : > { %v11715_v5 = vmax.f32 %v6761_v63, %v6765_v9  ;;  %v8056_v0 = vrot.slane %v6496_v57, 9  ;;  %v6533_v29 = vcombine.high %v11587_v39, %v11587_v39  ;;  %v6551_v62 = vcombine.high %v11590_v12, %v11590_v12 }
 0x948   : > { %v11721_v51 = vmax.f32 %v6769_v55, %v6773_v20  ;;  %v6781_v37 = vmax.f32 %v6622_v24, %v8084_v53  ;;  %v8060_v43 = vrot.slane %v6514_v7, 9  ;;  %v6497_v36 = vcombine.high %v11655_v27, %v11655_v27 }
 0x949   : > { %6972 = vrot.lane.b32.xlu1 %v11632_v23, %s9197_s12  ;;  %6820 = vrot.lane.b32.xlu0 %v11691_v19, %s9196_s11  ;;  %v6753_v22 = vmax.f32 %v6496_v57, %v8056_v0  ;;  %v8066_v6 = vrot.slane %v6533_v29, 9  ;;  %v8070_v39 = vrot.slane %v6551_v62, 9  ;;  %v6515_v12 = vcombine.high %v11661_v33, %v11661_v33 }
 0x94a   : > { %v11731_v44 = vmax.f32 %v6777_v17, %v6781_v37  ;;  %v6757_v52 = vmax.f32 %v6514_v7, %v8060_v43  ;;  %v8058_v40 = vrot.slane %v6497_v36, 9  ;;  %v6605_v27 = vcombine.high %v11670_v21, %v11670_v21 }
 0x94b   : > { %v6763_v46 = vmax.f32 %v6533_v29, %v8066_v6  ;;  %v6767_v4 = vmax.f32 %v6551_v62, %v8070_v39  ;;  %v8062_v3 = vrot.slane %v6515_v12, 9  ;;  %v6623_v26 = vcombine.high %v6621_v38, %v6621_v38 }
 0x94c   : > { %v11735_v58 = vmax.f32 %v6753_v22, %v6757_v52  ;;  %v6755_v59 = vmax.f32 %v6497_v36, %v8058_v40  ;;  %v8082_v41 = vrot.slane %v6605_v27, 9  ;;  %v6569_v18 = vcombine.high %v11678_v47, %v11678_v47 }
 0x94d   : > { %6988 = vrot.lane.b32.xlu1 %v11703_v34, %s9197_s12  ;;  %6836 = vrot.lane.b32.xlu0 %v11699_v61, %s9196_s11  ;;  %v11743_v33 = vmax.f32 %v6763_v46, %v6767_v4  ;;  %v6759_v21 = vmax.f32 %v6515_v12, %v8062_v3  ;;  %v8086_v32 = vrot.slane %v6623_v26, 9  ;;  %v6587_v38 = vcombine.high %v11681_v54, %v11681_v54 }
 0x94e   : > { %v6779_v56 = vmax.f32 %v6605_v27, %v8082_v41  ;;  %v8074_v11 = vrot.slane %v6569_v18, 9  ;;  %v6884_v62 = vrot.slane %v11620_v10, 2  ;;  %v6886_v43 = vrot.slane %v11632_v23, 2 }
 0x94f   : > { %v11747_v2 = vmax.f32 %v6755_v59, %v6759_v21  ;;  %v6783_v49 = vmax.f32 %v6623_v26, %v8086_v32  ;;  %v8078_v1 = vrot.slane %v6587_v38, 9  ;;  %v6888_v39 = vrot.slane %v11657_v42, 2 }
 0x950   : > { %v6771_v47 = vmax.f32 %v6569_v18, %v8074_v11  ;;  %v6894_v12 = vrot.slane %v11703_v34, 2  ;;  %v6885_v4 = vrot.slane %v11715_v5, 2  ;;  %v6890_v41 = vrot.slane %v11699_v61, 2 }
 0x951   : > { %7036 = vrot.lane.b32.xlu1 %v11632_v23, %s9198_s13  ;;  %6960 = vrot.lane.b32.xlu0 %v11622_v8, %s9197_s12  ;;  %v11753_v16 = vmax.f32 %v6779_v56, %v6783_v49  ;;  %v6775_v25 = vmax.f32 %v6587_v38, %v8078_v1  ;;  %v6889_v32 = vrot.slane %v11721_v51, 2 }
 0x953   : > { %v11755_v60 = vmax.f32 %v6771_v47, %v6775_v25 }
 0x955   : > { %7052 = vrot.lane.b32.xlu1 %v11703_v34, %s9198_s13  ;;  %6968 = vrot.lane.b32.xlu0 %v11620_v10, %s9197_s12 }
 0x959   : > { %6826 = vrot.lane.b32.xlu1 %v11715_v5, %s9196_s11  ;;  %6976 = vrot.lane.b32.xlu0 %v11657_v42, %s9197_s12 }
 0x95d   : > { %6834 = vrot.lane.b32.xlu1 %v11721_v51, %s9196_s11  ;;  %6984 = vrot.lane.b32.xlu0 %v11705_v15, %s9197_s12 }
 0x961   : > { %6842 = vrot.lane.b32.xlu1 %v11731_v44, %s9196_s11  ;;  %7024 = vrot.lane.b32.xlu0 %v11622_v8, %s9198_s13 }
 0x965   : > { %7032 = vrot.lane.b32.xlu0 %v11620_v10, %s9198_s13  ;;  %6962 = vrot.lane.b32.xlu1 %v11735_v58, %s9197_s12 }
 0x969   : > { %7040 = vrot.lane.b32.xlu0 %v11657_v42, %s9198_s13  ;;  %6970 = vrot.lane.b32.xlu1 %v11715_v5, %s9197_s12 }
 0x96d   : > { %7048 = vrot.lane.b32.xlu0 %v11705_v15, %s9198_s13  ;;  %6978 = vrot.lane.b32.xlu1 %v11721_v51, %s9197_s12 }
 0x971   : > { %6964 = vrot.lane.b32.xlu0 %v11691_v19, %s9197_s12  ;;  %6986 = vrot.lane.b32.xlu1 %v11731_v44, %s9197_s12 }
 0x975   : > { %6980 = vrot.lane.b32.xlu0 %v11699_v61, %s9197_s12  ;;  %7026 = vrot.lane.b32.xlu1 %v11735_v58, %s9198_s13 }
 0x979   : > { %7028 = vrot.lane.b32.xlu0 %v11691_v19, %s9198_s13  ;;  %7034 = vrot.lane.b32.xlu1 %v11715_v5, %s9198_s13 }
 0x97d   : > { %7044 = vrot.lane.b32.xlu0 %v11699_v61, %s9198_s13  ;;  %7042 = vrot.lane.b32.xlu1 %v11721_v51, %s9198_s13 }
 0x981   : > { %7050 = vrot.lane.b32.xlu1 %v11731_v44, %s9198_s13  ;;  %6818 = vrot.lane.b32.xlu0 %v11735_v58, %s9196_s11 }
 0x985   : > { %6830 = vrot.lane.b32.xlu1 %v11743_v33, %s9196_s11  ;;  %6822 = vrot.lane.b32.xlu0 %v11747_v2, %s9196_s11 }
 0x989   : > { %6846 = vrot.lane.b32.xlu1 %v11753_v16, %s9196_s11  ;;  %6838 = vrot.lane.b32.xlu0 %v11755_v60, %s9196_s11 }
 0x98d   : > { %6974 = vrot.lane.b32.xlu1 %v11743_v33, %s9197_s12  ;;  %6966 = vrot.lane.b32.xlu0 %v11747_v2, %s9197_s12 }
 0x991   : > { %6990 = vrot.lane.b32.xlu1 %v11753_v16, %s9197_s12  ;;  %6982 = vrot.lane.b32.xlu0 %v11755_v60, %s9197_s12 }
 0x995   : > { %7038 = vrot.lane.b32.xlu1 %v11743_v33, %s9198_s13  ;;  %7030 = vrot.lane.b32.xlu0 %v11747_v2, %s9198_s13 }
 0x999   : > { %7054 = vrot.lane.b32.xlu1 %v11753_v16, %s9198_s13  ;;  %7046 = vrot.lane.b32.xlu0 %v11755_v60, %s9198_s13 }
 0x9a8   : > { %v6825_v54 = vpop.permute.xlu1 %6824 }
 0x9a9   : > { %v11829_v28 = vpop.permute.xlu0 %6816  ;;  %v6916_v53 = vrot.slane %v6825_v54, 2  ;;  %v6868_v22 = vmax.f32 %v11620_v10, %v6825_v54  ;;  %v6892_v10 = vrot.slane %v11705_v15, 2 }
 0x9ab   : > { %v6948_v6 = vmax.f32 %v6884_v62, %v6916_v53 }
 0x9ac   : > { %v6829_v31 = vpop.permute.xlu1 %6828 }
 0x9ad   : > { %v6918_v37 = vrot.slane %v6829_v31, 2  ;;  %v6870_v27 = vmax.f32 %v11632_v23, %v6829_v31  ;;  %v7139_v23 = vrot.slane %v6868_v22, %v12376_v50  ;;  %v7250_v38 = vrot.slane %v6948_v6, %v12376_v50 }
 0x9ae   : > { %v11831_v30 = vpop.permute.xlu0 %6832 }
 0x9af   : > { %v6950_v26 = vmax.f32 %v6886_v43, %v6918_v37  ;;  %v6920_v59 = vrot.slane %v11831_v30, 2  ;;  %v7147_v49 = vrot.slane %v6870_v27, %v12376_v50 }
 0x9b1   : > { %v7258_v54 = vrot.slane %v6950_v26, %v12376_v50  ;;  %v6952_v31 = vmax.f32 %v6888_v39, %v6920_v59 }
 0x9b3   : > { %v7266_v27 = vrot.slane %v6952_v31, %v12376_v50 }
 0x9b7   : > { %v11833_v48 = vpop.permute.xlu1 %6844  ;;  %v11835_v45 = vpop.permute.xlu0 %6840 }
 0x9b8   : > { %v6924_v1 = vrot.slane %v11835_v45, 2 }
 0x9ba   : > { %v6956_v22 = vmax.f32 %v6892_v10, %v6924_v1 }
 0x9bb   : > { %v6973_v35 = vpop.permute.xlu1 %6972  ;;  %v11837_v63 = vpop.permute.xlu0 %6820 }
 0x9bc   : > { %v6998_v55 = vrot.slane %v6973_v35, 2  ;;  %v6926_v35 = vrot.slane %v11833_v48, 2 }
 0x9bf   : > { %v6989_v14 = vpop.permute.xlu1 %6988  ;;  %v11839_v24 = vpop.permute.xlu0 %6836 }
 0x9c0   : > { %v7006_v0 = vrot.slane %v6989_v14, 2 }
 0x9c3   : > { %v7037_v13 = vpop.permute.xlu1 %7036  ;;  %v11841_v9 = vpop.permute.xlu0 %6960 }
 0x9c4   : > { %v7062_v57 = vrot.slane %v7037_v13, 2 }
 0x9c6   : > { %v11843_v20 = vmax.f32 %v6998_v55, %v7062_v57  ;;  %v6893_v55 = vrot.slane %v11731_v44, 2 }
 0x9c7   : > { %v7053_v17 = vpop.permute.xlu1 %7052  ;;  %v11845_v7 = vpop.permute.xlu0 %6968 }
 0x9c8   : > { %v7070_v29 = vrot.slane %v7053_v17, 2  ;;  %v6878_v17 = vmax.f32 %v11703_v34, %v11833_v48 }
 0x9ca   : > { %v11849_v36 = vmax.f32 %v7006_v0, %v7070_v29  ;;  %v6876_v0 = vmax.f32 %v11705_v15, %v11835_v45  ;;  %v7179_v59 = vrot.slane %v6878_v17, %v12376_v50 }
 0x9cb   : > { %v6827_v52 = vpop.permute.xlu1 %6826  ;;  %v11854_v40 = vpop.permute.xlu0 %6976 }
 0x9cc   : > { %v6869_v46 = vmax.f32 %v11715_v5, %v6827_v52  ;;  %v6917_v3 = vrot.slane %v6827_v52, 2  ;;  %v6922_v5 = vrot.slane %v11839_v24, 2  ;;  %v7171_v15 = vrot.slane %v6876_v0, %v12376_v50 }
 0x9cd   : > { %v6864_v0 = vmax.f32 %v11622_v8, %v11829_v28 }
 0x9ce   : > { %v6949_v18 = vmax.f32 %v6885_v4, %v6917_v3  ;;  %v7143_v21 = vrot.slane %v6869_v46, %v12376_v50  ;;  %v6954_v29 = vmax.f32 %v6890_v41, %v6922_v5  ;;  %v6958_v46 = vmax.f32 %v6894_v12, %v6926_v35 }
 0x9cf   : > { %v11867_v56 = vpop.permute.xlu1 %6834  ;;  %v11869_v11 = vpop.permute.xlu0 %6984  ;;  %v6912_v35 = vrot.slane %v11829_v28, 2 }
 0x9d0   : > { %v7254_v47 = vrot.slane %v6949_v18, %v12376_v50  ;;  %v6921_v25 = vrot.slane %v11867_v56, 2  ;;  %v7190_v14 = vsel %vm7184_vm8, %v7143_v21, %v7139_v23  ;;  %v7274_v45 = vrot.slane %v6954_v29, %v12376_v50 }
 0x9d1   : > { %v11880_v57 = vsel %vm7186_vm12, %v7147_v49, %v7190_v14  ;;  %v7290_v12 = vrot.slane %v6958_v46, %v12376_v50  ;;  %v6873_v17 = vmax.f32 %v11721_v51, %v11867_v56  ;;  %v6874_v51 = vmax.f32 %v11699_v61, %v11839_v24 }
 0x9d2   : > { %v6953_v13 = vmax.f32 %v6889_v32, %v6921_v25  ;;  %v7298_v53 = vsel %vm7184_vm8, %v7254_v47, %v7250_v38  ;;  %v6887_v56 = vrot.slane %v11743_v33, 2  ;;  %v6883_v46 = vrot.slane %v11747_v2, 2 }
 0x9d3   : > { %v6843_v62 = vpop.permute.xlu1 %6842  ;;  %v11887_v37 = vpop.permute.xlu0 %7024  ;;  %v11890_v43 = vsel %vm7186_vm12, %v7258_v54, %v7298_v53  ;;  %v6914_v53 = vrot.slane %v11837_v63, 2  ;;  %v7159_v28 = vrot.slane %v6873_v17, %v12376_v50 }
 0x9d4   : > { %v7270_v6 = vrot.slane %v6953_v13, %v12376_v50  ;;  %v6877_v39 = vmax.f32 %v11731_v44, %v6843_v62  ;;  %v6925_v52 = vrot.slane %v6843_v62, 2  ;;  %v7282_v44 = vrot.slane %v6956_v22, %v12376_v50 }
 0x9d5   : > { %v6882_v62 = vrot.slane %v11691_v19, 2 }
 0x9d6   : > { %v6957_v34 = vmax.f32 %v6893_v55, %v6925_v52  ;;  %v7175_v48 = vrot.slane %v6877_v39, %v12376_v50  ;;  %v7301_v26 = vsel %vm7184_vm8, %v7270_v6, %v7266_v27  ;;  %v6880_v55 = vrot.slane %v11622_v8, 2 }
 0x9d7   : > { %v11898_v4 = vpop.permute.xlu0 %7032  ;;  %v11900_v3 = vpop.permute.xlu1 %6962  ;;  %v11909_v18 = vsel %vm7186_vm12, %v7274_v45, %v7301_v26  ;;  %v6872_v39 = vmax.f32 %v11657_v42, %v11831_v30  ;;  %v6866_v52 = vmax.f32 %v11691_v19, %v11837_v63  ;;  %v11954_v27 = vmax.f32 %v6882_v62, %v6914_v53 }
 0x9d8   : > { %v7286_v10 = vrot.slane %v6957_v34, %v12376_v50  ;;  %v7196_v41 = vsel %vm7184_vm8, %v7175_v48, %v7171_v15  ;;  %v6944_v29 = vmax.f32 %v6880_v55, %v6912_v35  ;;  %v6881_v8 = vrot.slane %v11735_v58, 2 }
 0x9d9   : > { %v11912_v21 = vsel %vm7186_vm12, %v7179_v59, %v7196_v41  ;;  %v6895_v34 = vrot.slane %v11753_v16, 2  ;;  %v7123_v42 = vrot.slane %v6864_v0, %v12376_v50  ;;  %v6891_v48 = vrot.slane %v11755_v60, 2 }
 0x9da   : > { %v7304_v32 = vsel %vm7184_vm8, %v7286_v10, %v7282_v44  ;;  %v7234_v30 = vrot.slane %v6944_v29, %v12376_v50  ;;  %v7155_v61 = vrot.slane %v6872_v39, %v12376_v50  ;;  %v7131_v24 = vrot.slane %v6866_v52, %v12376_v50 }
 0x9db   : > { %v11915_v23 = vpop.permute.xlu0 %7040  ;;  %v11917_v38 = vpop.permute.xlu1 %6970  ;;  %v11920_v5 = vsel %vm7186_vm12, %v7290_v12, %v7304_v32  ;;  %v7056_v15 = vrot.slane %v11887_v37, 2  ;;  %v7242_v26 = vrot.slane %v11954_v27, %v12376_v50  ;;  %v7163_v59 = vrot.slane %v6874_v51, %v12376_v50 }
 0x9dc   : > { %v6992_v44 = vrot.slane %v11841_v9, 2  ;;  %v7362_v12 = vrot.slane %v11843_v20, %v12376_v50  ;;  %v7060_v41 = vrot.slane %v11898_v4, 2  ;;  %v7193_v35 = vsel %vm7184_vm8, %v7159_v28, %v7155_v61 }
 0x9dd   : > { %v6996_v37 = vrot.slane %v11845_v7, 2  ;;  %v7004_v55 = vrot.slane %v11869_v11, 2  ;;  %v7194_v7 = vsel %vm7186_vm12, %v7163_v59, %v7193_v35  ;;  %v6993_v51 = vrot.slane %v11900_v3, 2 }
 0x9de   : > { %v11984_v9 = vmax.f32 %v6992_v44, %v7056_v15 }
 0x9df   : > { %v11922_v49 = vpop.permute.xlu0 %7048  ;;  %v11924_v1 = vpop.permute.xlu1 %6978 }
 0x9e3   : > { %v11926_v47 = vpop.permute.xlu0 %6964  ;;  %v11928_v25 = vpop.permute.xlu1 %6986 }
 0x9e7   : > { %v11930_v54 = vpop.permute.xlu0 %6980  ;;  %v11932_v31 = vpop.permute.xlu1 %7026 }
 0x9eb   : > { %v11935_v14 = vpop.permute.xlu0 %7028  ;;  %v11937_v13 = vpop.permute.xlu1 %7034 }
 0x9ec   : > { %v7058_v35 = vrot.slane %v11935_v14, 2 }
 0x9ef   : > { %v11946_v22 = vpop.permute.xlu0 %7044  ;;  %v11948_v6 = vpop.permute.xlu1 %7042 }
 0x9f3   : > { %v11965_v19 = vpop.permute.xlu1 %7050  ;;  %v6819_v63 = vpop.permute.xlu0 %6818 }
 0x9f4   : > { %v6865_v45 = vmax.f32 %v11735_v58, %v6819_v63  ;;  %v6913_v10 = vrot.slane %v6819_v63, 2  ;;  %v7000_v58 = vrot.slane %v11854_v40, 2  ;;  %v11991_v40 = vmax.f32 %v6996_v37, %v7060_v41 }
 0x9f5   : > { %v7057_v63 = vrot.slane %v11932_v31, 2  ;;  %v6997_v31 = vrot.slane %v11917_v38, 2 }
 0x9f6   : > { %v7127_v32 = vrot.slane %v6865_v45, %v12376_v50  ;;  %v6945_v53 = vmax.f32 %v6881_v8, %v6913_v10 }
 0x9f7   : > { %v6831_v17 = vpop.permute.xlu1 %6830  ;;  %v6823_v0 = vpop.permute.xlu0 %6822 }
 0x9f8   : > { %v6871_v29 = vmax.f32 %v11743_v33, %v6831_v17  ;;  %v6919_v62 = vrot.slane %v6831_v17, 2  ;;  %v6867_v4 = vmax.f32 %v11747_v2, %v6823_v0  ;;  %v7238_v39 = vrot.slane %v6945_v53, %v12376_v50 }
 0x9f9   : > { %v6915_v52 = vrot.slane %v6823_v0, 2  ;;  %v7185_v27 = vsel %vm7184_vm8, %v7127_v32, %v7123_v42  ;;  %v7064_v33 = vrot.slane %v11915_v23, 2  ;;  %v7069_v17 = vrot.slane %v11965_v19, 2 }
 0x9fa   : > { %v7151_v8 = vrot.slane %v6871_v29, %v12376_v50  ;;  %v7135_v28 = vrot.slane %v6867_v4, %v12376_v50  ;;  %v6951_v2 = vmax.f32 %v6887_v56, %v6919_v62  ;;  %v7187_v45 = vsel %vm7186_vm12, %v7131_v24, %v7185_v27 }
 0x9fb   : > { %v6847_v61 = vpop.permute.xlu1 %6846  ;;  %v6839_v15 = vpop.permute.xlu0 %6838  ;;  %v6947_v42 = vmax.f32 %v6883_v46, %v6915_v52  ;;  %v7295_v3 = vsel %vm7184_vm8, %v7238_v39, %v7234_v30  ;;  %v7061_v56 = vrot.slane %v11937_v13, 2  ;;  %v7089_v30 = vmax.f32 %v6993_v51, %v7057_v63 }
 0x9fc   : > { %v6879_v59 = vmax.f32 %v11753_v16, %v6847_v61  ;;  %v6875_v44 = vmax.f32 %v11755_v60, %v6839_v15  ;;  %v6927_v10 = vrot.slane %v6847_v61, 2  ;;  %v6923_v41 = vrot.slane %v6839_v15, 2 }
 0x9fd   : > { %v12004_v32 = vsel %vm7188_vm11, %v7151_v8, %v11880_v57  ;;  %v12007_v23 = vsel %vm7188_vm11, %v7135_v28, %v7187_v45  ;;  %v6994_v57 = vrot.slane %v11926_v47, 2  ;;  %v7296_v38 = vsel %vm7186_vm12, %v7242_v26, %v7295_v3 }
 0x9fe   : > { %v7183_v46 = vrot.slane %v6879_v59, %v12376_v50  ;;  %v7167_v24 = vrot.slane %v6875_v44, %v12376_v50  ;;  %7205 = vrot.lane.b32.xlu1 %v12004_v32, %s9196_s11  ;;  %7203 = vrot.lane.b32.xlu0 %v12007_v23, %s9196_s11  ;;  %v7065_v13 = vrot.slane %v11948_v6, 2  ;;  %v7262_v0 = vrot.slane %v6951_v2, %v12376_v50 }
 0x9ff   : > { %v6975_v37 = vpop.permute.xlu1 %6974  ;;  %v6967_v53 = vpop.permute.xlu0 %6966  ;;  %v7246_v62 = vrot.slane %v6947_v42, %v12376_v50  ;;  %v6959_v47 = vmax.f32 %v6895_v34, %v6927_v10  ;;  %v6955_v14 = vmax.f32 %v6891_v48, %v6923_v41  ;;  %v7096_v6 = vmax.f32 %v7000_v58, %v7064_v33 }
 0xa00   : > { %v12025_v29 = vsel %vm7188_vm11, %v7183_v46, %v11912_v21  ;;  %v12033_v26 = vsel %vm7188_vm11, %v7167_v24, %v7194_v7  ;;  %v7001_v19 = vrot.slane %v11924_v1, 2  ;;  %v7005_v4 = vrot.slane %v11928_v25, 2 }
 0xa01   : > { %v7093_v39 = vmax.f32 %v6997_v31, %v7061_v56  ;;  %v7068_v16 = vrot.slane %v11922_v49, 2  ;;  %v7342_v60 = vrot.slane %v7089_v30, %v12376_v50  ;;  %v7090_v21 = vmax.f32 %v6994_v57, %v7058_v35 }
 0xa02   : > { %7209 = vrot.lane.b32.xlu1 %v12025_v29, %s9196_s11  ;;  %7207 = vrot.lane.b32.xlu0 %v12033_v26, %s9196_s11  ;;  %v7066_v34 = vrot.slane %v11946_v22, 2  ;;  %v7338_v1 = vrot.slane %v11984_v9, %v12376_v50  ;;  %v7002_v25 = vrot.slane %v11930_v54, 2  ;;  %v7097_v52 = vmax.f32 %v7001_v19, %v7065_v13 }
 0xa03   : > { %v6991_v48 = vpop.permute.xlu1 %6990  ;;  %v6983_v58 = vpop.permute.xlu0 %6982  ;;  %v7101_v27 = vmax.f32 %v7005_v4, %v7069_v17  ;;  %v7294_v7 = vrot.slane %v6959_v47, %v12376_v50  ;;  %v7278_v51 = vrot.slane %v6955_v14, %v12376_v50  ;;  %v7300_v49 = vsel %vm7188_vm11, %v7262_v0, %v11890_v43 }
 0xa04   : > { %v7297_v8 = vsel %vm7188_vm11, %v7246_v62, %v7296_v38  ;;  %v7354_v22 = vrot.slane %v11991_v40, %v12376_v50  ;;  %v7370_v28 = vrot.slane %v7096_v6, %v12376_v50  ;;  %v7358_v9 = vrot.slane %v7093_v39, %v12376_v50 }
 0xa05   : > { %v7100_v54 = vmax.f32 %v7004_v55, %v7068_v16  ;;  %v7346_v33 = vrot.slane %v7090_v21, %v12376_v50  ;;  %v7098_v63 = vmax.f32 %v7002_v25, %v7066_v34  ;;  %v7399_v61 = vsel %vm7184_vm8, %v7342_v60, %v7338_v1 }
 0xa06   : > { %7309 = vrot.lane.b32.xlu1 %v7300_v49, %s9197_s12  ;;  %7307 = vrot.lane.b32.xlu0 %v7297_v8, %s9197_s12  ;;  %v6999_v15 = vrot.slane %v6975_v37, 2  ;;  %v6995_v40 = vrot.slane %v6967_v53, 2  ;;  %v7374_v59 = vrot.slane %v7097_v52, %v12376_v50  ;;  %v7390_v44 = vrot.slane %v7101_v27, %v12376_v50 }
 0xa07   : > { %v7039_v43 = vpop.permute.xlu1 %7038  ;;  %v7031_v2 = vpop.permute.xlu0 %7030  ;;  %v7306_v3 = vsel %vm7188_vm11, %v7294_v7, %v11920_v5  ;;  %v7303_v11 = vsel %vm7188_vm11, %v7278_v51, %v11909_v18  ;;  %v7402_v41 = vsel %vm7184_vm8, %v7358_v9, %v7354_v22  ;;  %v7386_v31 = vrot.slane %v7100_v54, %v12376_v50 }
 0xa08   : > { %v7063_v45 = vrot.slane %v7039_v43, 2  ;;  %v7059_v42 = vrot.slane %v7031_v2, 2  ;;  %v7007_v56 = vrot.slane %v6991_v48, 2  ;;  %v7003_v46 = vrot.slane %v6983_v58, 2 }
 0xa09   : > { %v7400_v30 = vsel %vm7186_vm12, %v7346_v33, %v7399_v61  ;;  %v7378_v53 = vrot.slane %v7098_v63, %v12376_v50  ;;  %v7403_v38 = vsel %vm7186_vm12, %v7362_v12, %v7402_v41  ;;  %v7408_v13 = vsel %vm7184_vm8, %v7390_v44, %v7386_v31 }
 0xa0a   : > { %v7095_v55 = vmax.f32 %v6999_v15, %v7063_v45  ;;  %v7091_v10 = vmax.f32 %v6995_v40, %v7059_v42  ;;  %7313 = vrot.lane.b32.xlu1 %v7306_v3, %s9197_s12  ;;  %7311 = vrot.lane.b32.xlu0 %v7303_v11, %s9197_s12  ;;  %v7405_v17 = vsel %vm7184_vm8, %v7374_v59, %v7370_v28 }
 0xa0b   : > { %v7055_v24 = vpop.permute.xlu1 %7054  ;;  %v7047_v57 = vpop.permute.xlu0 %7046  ;;  %v7394_v6 = vrot.slane %v11849_v36, %v12376_v50  ;;  %v7406_v4 = vsel %vm7186_vm12, %v7378_v53, %v7405_v17 }
 0xa0c   : > { %v7366_v5 = vrot.slane %v7095_v55, %v12376_v50  ;;  %v7350_v18 = vrot.slane %v7091_v10, %v12376_v50  ;;  %v7071_v35 = vrot.slane %v7055_v24, 2  ;;  %v7067_v37 = vrot.slane %v7047_v57, 2 }
 0xa0d   : > { %v7409_v19 = vsel %vm7186_vm12, %v7394_v6, %v7408_v13 }
 0xa0e   : > { %v7103_v0 = vmax.f32 %v7007_v56, %v7071_v35  ;;  %v7099_v62 = vmax.f32 %v7003_v46, %v7067_v37  ;;  %v7404_v47 = vsel %vm7188_vm11, %v7366_v5, %v7403_v38  ;;  %v7401_v14 = vsel %vm7188_vm11, %v7350_v18, %v7400_v30 }
 0xa0f   : > { %7413 = vrot.lane.b32.xlu1 %v7404_v47, %s9196_s11  ;;  %7411 = vrot.lane.b32.xlu0 %v7401_v14, %s9196_s11 }
 0xa10   : > { %v7398_v20 = vrot.slane %v7103_v0, %v12376_v50  ;;  %v7382_v12 = vrot.slane %v7099_v62, %v12376_v50 }
 0xa12   : > { %v7410_v39 = vsel %vm7188_vm11, %v7398_v20, %v7409_v19  ;;  %v7407_v16 = vsel %vm7188_vm11, %v7382_v12, %v7406_v4 }
 0xa13   : > { %7417 = vrot.lane.b32.xlu1 %v7410_v39, %s9196_s11  ;;  %7415 = vrot.lane.b32.xlu0 %v7407_v16, %s9196_s11 }
 0xa70   : > { %v7206_v36 = vpop.permute.xlu1 %7205  ;;  %v7204_v60 = vpop.permute.xlu0 %7203 }
 0xa71   : > { %v7424_v25 = vsel %vm12377_vm4, %v12004_v32, %v7206_v36  ;;  %v7423_v52 = vsel %vm12378_vm2, %v12007_v23, %v7204_v60 }
 0xa74   : > { %v7210_v21 = vpop.permute.xlu1 %7209  ;;  %v7208_v34 = vpop.permute.xlu0 %7207 }
 0xa75   : > { %v7426_v32 = vsel %vm12381_vm13, %v12025_v29, %v7210_v21  ;;  %v7425_v23 = vsel %vm12382_vm14, %v12033_v26, %v7208_v34 }
 0xa78   : > { %v7310_v48 = vpop.permute.xlu1 %7309  ;;  %v7308_v58 = vpop.permute.xlu0 %7307 }
 0xa79   : > { %v7428_v27 = vsel %vm12379_vm7, %v7424_v25, %v7310_v48  ;;  %v7427_v7 = vsel %vm12380_vm15, %v7423_v52, %v7308_v58 }
 0xa7c   : > { %v7314_v1 = vpop.permute.xlu1 %7313  ;;  %v7312_v50 = vpop.permute.xlu0 %7311 }
 0xa7d   : > { %v7430_v28 = vsel %vm12383_vm3, %v7426_v32, %v7314_v1  ;;  %v7429_v9 = vsel %vm12384_vm1, %v7425_v23, %v7312_v50 }
 0xa81   : > { %v7414_v51 = vpop.permute.xlu1 %7413  ;;  %v7412_v49 = vpop.permute.xlu0 %7411 }
 0xa82   : > { %v7433_v8 = vsel %vm7431_vm9, %v7428_v27, %v7414_v51  ;;  %v7432_v22 = vsel %vm7431_vm9, %v7427_v7, %v7412_v49 }
 0xa83   : > { %7437 = vst [vmem:[%s210_s19 + $0x4] sm:$0xf] %v7433_v8  ;;  %7436 = vst [vmem:[%s210_s19] sm:$0xf] %v7432_v22 }
 0xa85   : > { %v7418_v54 = vpop.permute.xlu1 %7417  ;;  %v7416_v33 = vpop.permute.xlu0 %7415 }
 0xa86   : > { %v7435_v63 = vsel %vm7431_vm9, %v7430_v28, %v7418_v54  ;;  %v7434_v43 = vsel %vm7431_vm9, %v7429_v9, %v7416_v33 }
 0xa87   : > { %7439 = vst [vmem:[%s210_s19 + $0xc] sm:$0xf] %v7435_v63  ;;  %7438 = vst [vmem:[%s210_s19 + $0x8] sm:$0xf] %v7434_v43 }
 0xa88 PF: > { %s15_s15 = sadd.s32 1, %s9187_s15  }
 0xa89   : > { %p12_p4 = scmp.ge.s32.totalorder %s15_s15, 4  }
 0xa8b   :  { %14 = sbr.rel (!%p12_p4) target bundleno = 1 (0x1), region = 80 }

</bundles_post_ra>
